<compile_context>
chip_gen: v7x
topology: tpu7x:2x2x1
jax: 0.10.0
libtpu: 0.0.40
codegen_flags: <defaults>
</compile_context>

<pallas_src>
import functools
import math

import numpy as np
import jax
import jax.numpy as jnp
from jax.experimental import pallas as pl
from jax.experimental.pallas import tpu as pltpu


def transformer_encoder_kernel(
    x_ref, pe_ref,
    wproj_ref, bproj_ref,
    wqkv_ref, bqkv_ref,
    wout_ref, bout_ref,
    w1_ref, b1_ref, w2_ref, b2_ref,
    g1_ref, be1_ref, g2_ref, be2_ref,
    o_ref,
    attn_scr,
    *, bchunk, seq, num_layers, d_model, nhead, eps=1e-5):
  """Transformer encoder body for one batch-chunk (fc_out head in wrapper)."""
  B, S, D = bchunk, seq, d_model
  N = B * S
  dh = D // nhead

  def layernorm(v, g, b):
    mu = jnp.mean(v, axis=-1, keepdims=True)
    var = jnp.mean((v - mu) ** 2, axis=-1, keepdims=True)
    return (v - mu) * jax.lax.rsqrt(var + eps) * g + b

  # (B, S, In) -> (B*S, In): merge leading (sublane) dims, lane dim untouched.
  x = x_ref[...].reshape(N, -1)

  # Input projection + positional encoding (dropout p=0.0 -> identity).
  h = jnp.dot(x, wproj_ref[...], preferred_element_type=jnp.float32) + bproj_ref[...]
  h = (h.reshape(B, S, D) + pe_ref[...][None]).reshape(N, D)   # pe broadcast in-kernel

  # Post-LN TransformerEncoder layers, statically unrolled (small L).
  for l in range(num_layers):
    # --- fused QKV projection: one (N, D) @ (D, 3D) matmul ---
    # (1/sqrt(dh) already folded into the Q third of wqkv/bqkv.)
    qkv = jnp.dot(h, wqkv_ref[l], preferred_element_type=jnp.float32) + bqkv_ref[l]
    q = qkv[:, 0 * D:1 * D].reshape(B, S, D)     # 128-lane-aligned splits (free)
    k = qkv[:, 1 * D:2 * D].reshape(B, S, D)
    v = qkv[:, 2 * D:3 * D].reshape(B, S, D)

    # --- multi-head attention; each head's output lands at its static lane
    #     offset in the (N, D) scratch so the output projection runs once at
    #     K=128 instead of nhead matmuls at K=dh. ---
    for hh in range(nhead):
      s0 = hh * dh
      qh = q[:, :, s0:s0 + dh]                   # (B, S, dh)
      kh = k[:, :, s0:s0 + dh]
      vh = v[:, :, s0:s0 + dh]
      sc = jnp.einsum("bqd,bkd->bqk", qh, kh,
                      preferred_element_type=jnp.float32)      # (B, S, S)
      sc = sc - jnp.max(sc, axis=-1, keepdims=True)
      p = jnp.exp(sc)
      p = p / jnp.sum(p, axis=-1, keepdims=True)               # exact softmax
      oh = jnp.einsum("bqk,bkd->bqd", p, vh,
                      preferred_element_type=jnp.float32)      # (B, S, dh)
      attn_scr[:, s0:s0 + dh] = oh.reshape(N, dh)

    attn = jnp.dot(attn_scr[...], wout_ref[l],
                   preferred_element_type=jnp.float32) + bout_ref[l]
    h = layernorm(h + attn, g1_ref[l], be1_ref[l])             # post-LN

    # --- feed-forward (relu) ---
    ff = jnp.maximum(
        jnp.dot(h, w1_ref[l], preferred_element_type=jnp.float32) + b1_ref[l], 0.0)
    ff = jnp.dot(ff, w2_ref[l], preferred_element_type=jnp.float32) + b2_ref[l]
    h = layernorm(h + ff, g2_ref[l], be2_ref[l])

  o_ref[...] = h.reshape(B, S, D)               # lane-dense (last dim = d_model)


def prepare_kernel_params(p, *, d_model, nhead):
  """One-time parameter prep: fold 1/sqrt(dh) into Q and fuse QKV weights."""
  dh = d_model // nhead
  scale = 1.0 / math.sqrt(dh)
  kp = dict(p)
  kp["wqkv"] = jnp.concatenate([p["wq"] * scale, p["wk"], p["wv"]], axis=-1)
  kp["bqkv"] = jnp.concatenate([p["bq"] * scale, p["bk"], p["bv"]], axis=-1)
  for name in ("wq", "bq", "wk", "bk", "wv", "bv"):
    kp.pop(name)
  return kp


def transformer_forward(x, pe, kp, *, num_layers, d_model, nhead):
  """Full TransformerEncoderModel forward: Pallas encoder + XLA fc_out head."""
  B, S, IN = x.shape
  D, L = d_model, num_layers
  FF = kp["w1"].shape[-1]

  # Batch-chunk grid: ~256 rows per step (whole batches per chunk so attention
  # stays within a step). At the test shapes this is a single step; for large
  # batches the "parallel" axis lets v7x's two TensorCores split the work.
  rows_target = 256
  bchunk = max(1, min(B, rows_target // max(S, 1)))
  while B % bchunk:
    bchunk -= 1
  nchunks = B // bchunk

  const2 = lambda i: (0, 0)
  const3 = lambda i: (0, 0, 0)

  in_specs = [
      pl.BlockSpec((bchunk, S, IN), lambda i: (i, 0, 0)),      # x
      pl.BlockSpec((S, D), const2),                            # pe (S, D)
      pl.BlockSpec((IN, D), const2), pl.BlockSpec((1, D), const2),        # proj
      pl.BlockSpec((L, D, 3 * D), const3), pl.BlockSpec((L, 1, 3 * D), const3),  # qkv
      pl.BlockSpec((L, D, D), const3), pl.BlockSpec((L, 1, D), const3),   # out proj
      pl.BlockSpec((L, D, FF), const3), pl.BlockSpec((L, 1, FF), const3), # ffn 1
      pl.BlockSpec((L, FF, D), const3), pl.BlockSpec((L, 1, D), const3),  # ffn 2
      pl.BlockSpec((L, 1, D), const3), pl.BlockSpec((L, 1, D), const3),   # ln1
      pl.BlockSpec((L, 1, D), const3), pl.BlockSpec((L, 1, D), const3),   # ln2
  ]
  out_specs = pl.BlockSpec((bchunk, S, D), lambda i: (i, 0, 0))

  kernel = functools.partial(
      transformer_encoder_kernel,
      bchunk=bchunk, seq=S, num_layers=L, d_model=D, nhead=nhead)

  h_enc = pl.pallas_call(
      kernel,
      out_shape=jax.ShapeDtypeStruct((B, S, D), jnp.float32),
      grid_spec=pltpu.PrefetchScalarGridSpec(
          num_scalar_prefetch=0,
          grid=(nchunks,),
          in_specs=in_specs,
          out_specs=out_specs,
          scratch_shapes=[pltpu.VMEM((bchunk * S, D), jnp.float32)]),
      compiler_params=pltpu.CompilerParams(
          dimension_semantics=("parallel",),
          vmem_limit_bytes=32 * 1024 * 1024),
  )(x, pe,
    kp["wproj"], kp["bproj"],
    kp["wqkv"], kp["bqkv"],
    kp["wout"], kp["bout"],
    kp["w1"], kp["b1"], kp["w2"], kp["b2"],
    kp["g1"], kp["be1"], kp["g2"], kp["be2"])

  # Tiny (d_model, output_size) head in plain XLA -> kernel output stays
  # lane-dense instead of forcing masked 2-lane-wide stores in the kernel.
  return h_enc @ kp["wfc"] + kp["bfc"]


def reference_forward(x, pe, p, *, num_layers, d_model, nhead):
  """Pure-JAX reference replicating PyTorch semantics (post-LN, relu FFN)."""
  dh = d_model // nhead

  def ln(v, g, b):
    mu = v.mean(-1, keepdims=True)
    var = ((v - mu) ** 2).mean(-1, keepdims=True)
    return (v - mu) / jnp.sqrt(var + 1e-5) * g + b

  h = x @ p["wproj"] + p["bproj"]
  h = h + pe[None]
  B, S, D = h.shape
  for l in range(num_layers):
    q = (h @ p["wq"][l] + p["bq"][l]).reshape(B, S, nhead, dh)
    k = (h @ p["wk"][l] + p["bk"][l]).reshape(B, S, nhead, dh)
    v = (h @ p["wv"][l] + p["bv"][l]).reshape(B, S, nhead, dh)
    sc = jnp.einsum("bqhd,bkhd->bhqk", q, k) / math.sqrt(dh)
    pr = jax.nn.softmax(sc, axis=-1)
    a = jnp.einsum("bhqk,bkhd->bqhd", pr, v).reshape(B, S, D)
    a = a @ p["wout"][l] + p["bout"][l]
    h = ln(h + a, p["g1"][l], p["be1"][l])
    f = jax.nn.relu(h @ p["w1"][l] + p["b1"][l]) @ p["w2"][l] + p["b2"][l]
    h = ln(h + f, p["g2"][l], p["be2"][l])
  return h @ p["wfc"] + p["bfc"]


def make_positional_encoding(seq_len, d_model):
  position = jnp.arange(seq_len, dtype=jnp.float32)[:, None]
  div_term = jnp.exp(jnp.arange(0, d_model, 2, dtype=jnp.float32) *
                     (-math.log(10000.0) / d_model))
  pe = jnp.zeros((seq_len, d_model), jnp.float32)
  pe = pe.at[:, 0::2].set(jnp.sin(position * div_term))
  pe = pe.at[:, 1::2].set(jnp.cos(position * div_term))
  return pe


if __name__ == "__main__":
  # Small shapes consistent with the module (d_model/nhead at module defaults).
  B, S, IN = 2, 8, 16
  D, H, L, FF, OUT = 128, 8, 2, 256, 2

  key = jax.random.PRNGKey(0)
  keys = iter(jax.random.split(key, 64))

  def init(shape, scale=0.05):
    return scale * jax.random.normal(next(keys), shape, jnp.float32)

  params = {
      # input projection (weights pre-transposed to (in, out))
      "wproj": init((IN, D)), "bproj": init((1, D)),
      # per-layer attention weights, in_proj split into Q/K/V
      "wq": init((L, D, D)), "bq": init((L, 1, D)),
      "wk": init((L, D, D)), "bk": init((L, 1, D)),
      "wv": init((L, D, D)), "bv": init((L, 1, D)),
      "wout": init((L, D, D)), "bout": init((L, 1, D)),
      # per-layer FFN
      "w1": init((L, D, FF)), "b1": init((L, 1, FF)),
      "w2": init((L, FF, D)), "b2": init((L, 1, D)),
      # per-layer LayerNorms (PyTorch init: gamma=1, beta=0)
      "g1": jnp.ones((L, 1, D), jnp.float32), "be1": jnp.zeros((L, 1, D), jnp.float32),
      "g2": jnp.ones((L, 1, D), jnp.float32), "be2": jnp.zeros((L, 1, D), jnp.float32),
      # output head (applied in the wrapper, outside the kernel)
      "wfc": init((D, OUT)), "bfc": init((1, OUT)),
  }

  x = jax.random.normal(next(keys), (B, S, IN), jnp.float32)
  pe = make_positional_encoding(S, D)

  # One-time parameter prep (scale folding + QKV fusion) outside the forward.
  kparams = prepare_kernel_params(params, d_model=D, nhead=H)

  fwd = jax.jit(functools.partial(
      transformer_forward, num_layers=L, d_model=D, nhead=H))
  out = jax.block_until_ready(fwd(x, pe, kparams))

  ref = reference_forward(x, pe, params, num_layers=L, d_model=D, nhead=H)
  np.testing.assert_allclose(np.asarray(out), np.asarray(ref),
                             rtol=3e-3, atol=3e-3)

  print("KERNEL_OK")
</pallas_src>

<mosaic_0001>
module attributes {stable_mosaic.version = 11 : i64} {
  func.func @transformer_encoder_kernel(%arg0: i32, %arg1: memref<2x8x16xf32, #tpu.memory_space<vmem>>, %arg2: memref<8x128xf32, #tpu.memory_space<vmem>>, %arg3: memref<16x128xf32, #tpu.memory_space<vmem>>, %arg4: memref<1x128xf32, #tpu.memory_space<vmem>>, %arg5: memref<2x128x384xf32, #tpu.memory_space<vmem>>, %arg6: memref<2x1x384xf32, #tpu.memory_space<vmem>>, %arg7: memref<2x128x128xf32, #tpu.memory_space<vmem>>, %arg8: memref<2x1x128xf32, #tpu.memory_space<vmem>>, %arg9: memref<2x128x256xf32, #tpu.memory_space<vmem>>, %arg10: memref<2x1x256xf32, #tpu.memory_space<vmem>>, %arg11: memref<2x256x128xf32, #tpu.memory_space<vmem>>, %arg12: memref<2x1x128xf32, #tpu.memory_space<vmem>>, %arg13: memref<2x1x128xf32, #tpu.memory_space<vmem>>, %arg14: memref<2x1x128xf32, #tpu.memory_space<vmem>>, %arg15: memref<2x1x128xf32, #tpu.memory_space<vmem>>, %arg16: memref<2x1x128xf32, #tpu.memory_space<vmem>>, %arg17: memref<2x8x128xf32, #tpu.memory_space<vmem>>, %arg18: memref<16x128xf32, #tpu.memory_space<vmem>>) attributes {dimension_semantics = [#tpu.dimension_semantics<parallel>], iteration_bounds = array<i64: 1>, scalar_prefetch = 0 : i64, scratch_operands = 1 : i64, tpu.core_type = #tpu.core_type<tc>, window_params = [{transform_indices = @transform_0, window_bounds = array<i64: 2, 8, 16>}, {pipeline_mode = #tpu.pipeline_mode<synchronous>, transform_indices = @transform_1, window_bounds = array<i64: 8, 128>}, {pipeline_mode = #tpu.pipeline_mode<synchronous>, transform_indices = @transform_2, window_bounds = array<i64: 16, 128>}, {pipeline_mode = #tpu.pipeline_mode<synchronous>, transform_indices = @transform_3, window_bounds = array<i64: 1, 128>}, {pipeline_mode = #tpu.pipeline_mode<synchronous>, transform_indices = @transform_4, window_bounds = array<i64: 2, 128, 384>}, {pipeline_mode = #tpu.pipeline_mode<synchronous>, transform_indices = @transform_5, window_bounds = array<i64: 2, 1, 384>}, {pipeline_mode = #tpu.pipeline_mode<synchronous>, transform_indices = @transform_6, window_bounds = array<i64: 2, 128, 128>}, {pipeline_mode = #tpu.pipeline_mode<synchronous>, transform_indices = @transform_7, window_bounds = array<i64: 2, 1, 128>}, {pipeline_mode = #tpu.pipeline_mode<synchronous>, transform_indices = @transform_8, window_bounds = array<i64: 2, 128, 256>}, {pipeline_mode = #tpu.pipeline_mode<synchronous>, transform_indices = @transform_9, window_bounds = array<i64: 2, 1, 256>}, {pipeline_mode = #tpu.pipeline_mode<synchronous>, transform_indices = @transform_10, window_bounds = array<i64: 2, 256, 128>}, {pipeline_mode = #tpu.pipeline_mode<synchronous>, transform_indices = @transform_11, window_bounds = array<i64: 2, 1, 128>}, {pipeline_mode = #tpu.pipeline_mode<synchronous>, transform_indices = @transform_12, window_bounds = array<i64: 2, 1, 128>}, {pipeline_mode = #tpu.pipeline_mode<synchronous>, transform_indices = @transform_13, window_bounds = array<i64: 2, 1, 128>}, {pipeline_mode = #tpu.pipeline_mode<synchronous>, transform_indices = @transform_14, window_bounds = array<i64: 2, 1, 128>}, {pipeline_mode = #tpu.pipeline_mode<synchronous>, transform_indices = @transform_15, window_bounds = array<i64: 2, 1, 128>}, {transform_indices = @transform_16, window_bounds = array<i64: 2, 8, 128>}]} {
    %c0 = arith.constant 0 : index
    %c0_0 = arith.constant 0 : index
    %c0_1 = arith.constant 0 : index
    %0 = vector.load %arg1[%c0, %c0_0, %c0_1] : memref<2x8x16xf32, #tpu.memory_space<vmem>>, vector<2x8x16xf32>
    %1 = vector.shape_cast %0 : vector<2x8x16xf32> to vector<16x16xf32>
    %c0_2 = arith.constant 0 : index
    %c0_3 = arith.constant 0 : index
    %2 = vector.load %arg3[%c0_2, %c0_3] : memref<16x128xf32, #tpu.memory_space<vmem>>, vector<16x128xf32>
    %cst = arith.constant dense<0.000000e+00> : vector<16x128xf32>
    %3 = tpu.matmul %1, %2, %cst {dimension_numbers = #tpu.dot_dimension_numbers<[1], [0], [0], [1], [0, 0, 1, 1], [], []>} : vector<16x16xf32>, vector<16x128xf32>, vector<16x128xf32> -> vector<16x128xf32>
    %c0_4 = arith.constant 0 : index
    %c0_5 = arith.constant 0 : index
    %4 = vector.load %arg4[%c0_4, %c0_5] : memref<1x128xf32, #tpu.memory_space<vmem>>, vector<1x128xf32>
    %5 = vector.broadcast %4 : vector<1x128xf32> to vector<16x128xf32>
    %6 = arith.addf %3, %5 : vector<16x128xf32>
    %7 = vector.shape_cast %6 : vector<16x128xf32> to vector<2x8x128xf32>
    %c0_6 = arith.constant 0 : index
    %c0_7 = arith.constant 0 : index
    %8 = vector.load %arg2[%c0_6, %c0_7] : memref<8x128xf32, #tpu.memory_space<vmem>>, vector<8x128xf32>
    %9 = vector.shape_cast %8 : vector<8x128xf32> to vector<1x8x128xf32>
    %10 = vector.broadcast %9 : vector<1x8x128xf32> to vector<2x8x128xf32>
    %11 = arith.addf %7, %10 : vector<2x8x128xf32>
    %12 = vector.shape_cast %11 : vector<2x8x128xf32> to vector<16x128xf32>
    %c0_8 = arith.constant 0 : index
    %c0_9 = arith.constant 0 : index
    %c0_10 = arith.constant 0 : index
    %13 = vector.load %arg5[%c0_8, %c0_9, %c0_10] : memref<2x128x384xf32, #tpu.memory_space<vmem>>, vector<1x128x384xf32>
    %14 = vector.shape_cast %13 : vector<1x128x384xf32> to vector<128x384xf32>
    %cst_11 = arith.constant dense<0.000000e+00> : vector<16x384xf32>
    %15 = tpu.matmul %12, %14, %cst_11 {dimension_numbers = #tpu.dot_dimension_numbers<[1], [0], [0], [1], [0, 0, 1, 1], [], []>} : vector<16x128xf32>, vector<128x384xf32>, vector<16x384xf32> -> vector<16x384xf32>
    %c0_12 = arith.constant 0 : index
    %c0_13 = arith.constant 0 : index
    %c0_14 = arith.constant 0 : index
    %16 = vector.load %arg6[%c0_12, %c0_13, %c0_14] : memref<2x1x384xf32, #tpu.memory_space<vmem>>, vector<1x1x384xf32>
    %17 = vector.shape_cast %16 : vector<1x1x384xf32> to vector<1x384xf32>
    %18 = vector.broadcast %17 : vector<1x384xf32> to vector<16x384xf32>
    %19 = arith.addf %15, %18 : vector<16x384xf32>
    %20 = vector.extract_strided_slice %19 {offsets = [0, 0], sizes = [16, 128], strides = [1, 1]} : vector<16x384xf32> to vector<16x128xf32>
    %21 = vector.shape_cast %20 : vector<16x128xf32> to vector<2x8x128xf32>
    %22 = vector.extract_strided_slice %19 {offsets = [0, 128], sizes = [16, 128], strides = [1, 1]} : vector<16x384xf32> to vector<16x128xf32>
    %23 = vector.shape_cast %22 : vector<16x128xf32> to vector<2x8x128xf32>
    %24 = vector.extract_strided_slice %19 {offsets = [0, 256], sizes = [16, 128], strides = [1, 1]} : vector<16x384xf32> to vector<16x128xf32>
    %25 = vector.shape_cast %24 : vector<16x128xf32> to vector<2x8x128xf32>
    %26 = vector.extract_strided_slice %21 {offsets = [0, 0, 0], sizes = [2, 8, 16], strides = [1, 1, 1]} : vector<2x8x128xf32> to vector<2x8x16xf32>
    %27 = vector.extract_strided_slice %23 {offsets = [0, 0, 0], sizes = [2, 8, 16], strides = [1, 1, 1]} : vector<2x8x128xf32> to vector<2x8x16xf32>
    %28 = vector.extract_strided_slice %25 {offsets = [0, 0, 0], sizes = [2, 8, 16], strides = [1, 1, 1]} : vector<2x8x128xf32> to vector<2x8x16xf32>
    "tpu.trace_start"() <{level = 10 : i32, message = "bqd,bkd->bqk"}> : () -> ()
    %cst_15 = arith.constant dense<0.000000e+00> : vector<2x8x8xf32>
    %29 = tpu.matmul %26, %27, %cst_15 {dimension_numbers = #tpu.dot_dimension_numbers<[2], [2], [1], [1], [0, 0, 0, 1, 1, 1], [0], [0]>} : vector<2x8x16xf32>, vector<2x8x16xf32>, vector<2x8x8xf32> -> vector<2x8x8xf32>
    "tpu.trace_stop"() : () -> ()
    %cst_16 = arith.constant dense<0xFF800000> : vector<2x8xf32>
    %30 = vector.multi_reduction <maximumf>, %29, %cst_16 [2] : vector<2x8x8xf32> to vector<2x8xf32>
    %31 = vector.shape_cast %30 : vector<2x8xf32> to vector<2x8x1xf32>
    %32 = vector.broadcast %31 : vector<2x8x1xf32> to vector<2x8x8xf32>
    %33 = arith.subf %29, %32 : vector<2x8x8xf32>
    %34 = math.exp %33 : vector<2x8x8xf32>
    %cst_17 = arith.constant dense<0.000000e+00> : vector<2x8xf32>
    %35 = vector.multi_reduction <add>, %34, %cst_17 [2] : vector<2x8x8xf32> to vector<2x8xf32>
    %36 = vector.shape_cast %35 : vector<2x8xf32> to vector<2x8x1xf32>
    %37 = vector.broadcast %36 : vector<2x8x1xf32> to vector<2x8x8xf32>
    %38 = arith.divf %34, %37 : vector<2x8x8xf32>
    "tpu.trace_start"() <{level = 10 : i32, message = "bqk,bkd->bqd"}> : () -> ()
    %cst_18 = arith.constant dense<0.000000e+00> : vector<2x8x16xf32>
    %39 = tpu.matmul %38, %28, %cst_18 {dimension_numbers = #tpu.dot_dimension_numbers<[2], [1], [1], [2], [0, 0, 0, 1, 1, 2], [0], [0]>} : vector<2x8x8xf32>, vector<2x8x16xf32>, vector<2x8x16xf32> -> vector<2x8x16xf32>
    "tpu.trace_stop"() : () -> ()
    %40 = vector.shape_cast %39 : vector<2x8x16xf32> to vector<16x16xf32>
    %c0_19 = arith.constant 0 : index
    %c0_20 = arith.constant 0 : index
    %41 = vector.load %arg18[%c0_19, %c0_20] : memref<16x128xf32, #tpu.memory_space<vmem>>, vector<16x16xf32>
    tpu.vector_store %arg18[%c0_19, %c0_20], %40 {strides = array<i32>} : memref<16x128xf32, #tpu.memory_space<vmem>>, vector<16x16xf32>,
    %42 = vector.extract_strided_slice %21 {offsets = [0, 0, 16], sizes = [2, 8, 16], strides = [1, 1, 1]} : vector<2x8x128xf32> to vector<2x8x16xf32>
    %43 = vector.extract_strided_slice %23 {offsets = [0, 0, 16], sizes = [2, 8, 16], strides = [1, 1, 1]} : vector<2x8x128xf32> to vector<2x8x16xf32>
    %44 = vector.extract_strided_slice %25 {offsets = [0, 0, 16], sizes = [2, 8, 16], strides = [1, 1, 1]} : vector<2x8x128xf32> to vector<2x8x16xf32>
    "tpu.trace_start"() <{level = 10 : i32, message = "bqd,bkd->bqk"}> : () -> ()
    %cst_21 = arith.constant dense<0.000000e+00> : vector<2x8x8xf32>
    %45 = tpu.matmul %42, %43, %cst_21 {dimension_numbers = #tpu.dot_dimension_numbers<[2], [2], [1], [1], [0, 0, 0, 1, 1, 1], [0], [0]>} : vector<2x8x16xf32>, vector<2x8x16xf32>, vector<2x8x8xf32> -> vector<2x8x8xf32>
    "tpu.trace_stop"() : () -> ()
    %cst_22 = arith.constant dense<0xFF800000> : vector<2x8xf32>
    %46 = vector.multi_reduction <maximumf>, %45, %cst_22 [2] : vector<2x8x8xf32> to vector<2x8xf32>
    %47 = vector.shape_cast %46 : vector<2x8xf32> to vector<2x8x1xf32>
    %48 = vector.broadcast %47 : vector<2x8x1xf32> to vector<2x8x8xf32>
    %49 = arith.subf %45, %48 : vector<2x8x8xf32>
    %50 = math.exp %49 : vector<2x8x8xf32>
    %cst_23 = arith.constant dense<0.000000e+00> : vector<2x8xf32>
    %51 = vector.multi_reduction <add>, %50, %cst_23 [2] : vector<2x8x8xf32> to vector<2x8xf32>
    %52 = vector.shape_cast %51 : vector<2x8xf32> to vector<2x8x1xf32>
    %53 = vector.broadcast %52 : vector<2x8x1xf32> to vector<2x8x8xf32>
    %54 = arith.divf %50, %53 : vector<2x8x8xf32>
    "tpu.trace_start"() <{level = 10 : i32, message = "bqk,bkd->bqd"}> : () -> ()
    %cst_24 = arith.constant dense<0.000000e+00> : vector<2x8x16xf32>
    %55 = tpu.matmul %54, %44, %cst_24 {dimension_numbers = #tpu.dot_dimension_numbers<[2], [1], [1], [2], [0, 0, 0, 1, 1, 2], [0], [0]>} : vector<2x8x8xf32>, vector<2x8x16xf32>, vector<2x8x16xf32> -> vector<2x8x16xf32>
    "tpu.trace_stop"() : () -> ()
    %56 = vector.shape_cast %55 : vector<2x8x16xf32> to vector<16x16xf32>
    %c0_25 = arith.constant 0 : index
    %c16 = arith.constant 16 : index
    %57 = vector.load %arg18[%c0_25, %c16] : memref<16x128xf32, #tpu.memory_space<vmem>>, vector<16x16xf32>
    tpu.vector_store %arg18[%c0_25, %c16], %56 {strides = array<i32>} : memref<16x128xf32, #tpu.memory_space<vmem>>, vector<16x16xf32>,
    %58 = vector.extract_strided_slice %21 {offsets = [0, 0, 32], sizes = [2, 8, 16], strides = [1, 1, 1]} : vector<2x8x128xf32> to vector<2x8x16xf32>
    %59 = vector.extract_strided_slice %23 {offsets = [0, 0, 32], sizes = [2, 8, 16], strides = [1, 1, 1]} : vector<2x8x128xf32> to vector<2x8x16xf32>
    %60 = vector.extract_strided_slice %25 {offsets = [0, 0, 32], sizes = [2, 8, 16], strides = [1, 1, 1]} : vector<2x8x128xf32> to vector<2x8x16xf32>
    "tpu.trace_start"() <{level = 10 : i32, message = "bqd,bkd->bqk"}> : () -> ()
    %cst_26 = arith.constant dense<0.000000e+00> : vector<2x8x8xf32>
    %61 = tpu.matmul %58, %59, %cst_26 {dimension_numbers = #tpu.dot_dimension_numbers<[2], [2], [1], [1], [0, 0, 0, 1, 1, 1], [0], [0]>} : vector<2x8x16xf32>, vector<2x8x16xf32>, vector<2x8x8xf32> -> vector<2x8x8xf32>
    "tpu.trace_stop"() : () -> ()
    %cst_27 = arith.constant dense<0xFF800000> : vector<2x8xf32>
    %62 = vector.multi_reduction <maximumf>, %61, %cst_27 [2] : vector<2x8x8xf32> to vector<2x8xf32>
    %63 = vector.shape_cast %62 : vector<2x8xf32> to vector<2x8x1xf32>
    %64 = vector.broadcast %63 : vector<2x8x1xf32> to vector<2x8x8xf32>
    %65 = arith.subf %61, %64 : vector<2x8x8xf32>
    %66 = math.exp %65 : vector<2x8x8xf32>
    %cst_28 = arith.constant dense<0.000000e+00> : vector<2x8xf32>
    %67 = vector.multi_reduction <add>, %66, %cst_28 [2] : vector<2x8x8xf32> to vector<2x8xf32>
    %68 = vector.shape_cast %67 : vector<2x8xf32> to vector<2x8x1xf32>
    %69 = vector.broadcast %68 : vector<2x8x1xf32> to vector<2x8x8xf32>
    %70 = arith.divf %66, %69 : vector<2x8x8xf32>
    "tpu.trace_start"() <{level = 10 : i32, message = "bqk,bkd->bqd"}> : () -> ()
    %cst_29 = arith.constant dense<0.000000e+00> : vector<2x8x16xf32>
    %71 = tpu.matmul %70, %60, %cst_29 {dimension_numbers = #tpu.dot_dimension_numbers<[2], [1], [1], [2], [0, 0, 0, 1, 1, 2], [0], [0]>} : vector<2x8x8xf32>, vector<2x8x16xf32>, vector<2x8x16xf32> -> vector<2x8x16xf32>
    "tpu.trace_stop"() : () -> ()
    %72 = vector.shape_cast %71 : vector<2x8x16xf32> to vector<16x16xf32>
    %c0_30 = arith.constant 0 : index
    %c32 = arith.constant 32 : index
    %73 = vector.load %arg18[%c0_30, %c32] : memref<16x128xf32, #tpu.memory_space<vmem>>, vector<16x16xf32>
    tpu.vector_store %arg18[%c0_30, %c32], %72 {strides = array<i32>} : memref<16x128xf32, #tpu.memory_space<vmem>>, vector<16x16xf32>,
    %74 = vector.extract_strided_slice %21 {offsets = [0, 0, 48], sizes = [2, 8, 16], strides = [1, 1, 1]} : vector<2x8x128xf32> to vector<2x8x16xf32>
    %75 = vector.extract_strided_slice %23 {offsets = [0, 0, 48], sizes = [2, 8, 16], strides = [1, 1, 1]} : vector<2x8x128xf32> to vector<2x8x16xf32>
    %76 = vector.extract_strided_slice %25 {offsets = [0, 0, 48], sizes = [2, 8, 16], strides = [1, 1, 1]} : vector<2x8x128xf32> to vector<2x8x16xf32>
    "tpu.trace_start"() <{level = 10 : i32, message = "bqd,bkd->bqk"}> : () -> ()
    %cst_31 = arith.constant dense<0.000000e+00> : vector<2x8x8xf32>
    %77 = tpu.matmul %74, %75, %cst_31 {dimension_numbers = #tpu.dot_dimension_numbers<[2], [2], [1], [1], [0, 0, 0, 1, 1, 1], [0], [0]>} : vector<2x8x16xf32>, vector<2x8x16xf32>, vector<2x8x8xf32> -> vector<2x8x8xf32>
    "tpu.trace_stop"() : () -> ()
    %cst_32 = arith.constant dense<0xFF800000> : vector<2x8xf32>
    %78 = vector.multi_reduction <maximumf>, %77, %cst_32 [2] : vector<2x8x8xf32> to vector<2x8xf32>
    %79 = vector.shape_cast %78 : vector<2x8xf32> to vector<2x8x1xf32>
    %80 = vector.broadcast %79 : vector<2x8x1xf32> to vector<2x8x8xf32>
    %81 = arith.subf %77, %80 : vector<2x8x8xf32>
    %82 = math.exp %81 : vector<2x8x8xf32>
    %cst_33 = arith.constant dense<0.000000e+00> : vector<2x8xf32>
    %83 = vector.multi_reduction <add>, %82, %cst_33 [2] : vector<2x8x8xf32> to vector<2x8xf32>
    %84 = vector.shape_cast %83 : vector<2x8xf32> to vector<2x8x1xf32>
    %85 = vector.broadcast %84 : vector<2x8x1xf32> to vector<2x8x8xf32>
    %86 = arith.divf %82, %85 : vector<2x8x8xf32>
    "tpu.trace_start"() <{level = 10 : i32, message = "bqk,bkd->bqd"}> : () -> ()
    %cst_34 = arith.constant dense<0.000000e+00> : vector<2x8x16xf32>
    %87 = tpu.matmul %86, %76, %cst_34 {dimension_numbers = #tpu.dot_dimension_numbers<[2], [1], [1], [2], [0, 0, 0, 1, 1, 2], [0], [0]>} : vector<2x8x8xf32>, vector<2x8x16xf32>, vector<2x8x16xf32> -> vector<2x8x16xf32>
    "tpu.trace_stop"() : () -> ()
    %88 = vector.shape_cast %87 : vector<2x8x16xf32> to vector<16x16xf32>
    %c0_35 = arith.constant 0 : index
    %c48 = arith.constant 48 : index
    %89 = vector.load %arg18[%c0_35, %c48] : memref<16x128xf32, #tpu.memory_space<vmem>>, vector<16x16xf32>
    tpu.vector_store %arg18[%c0_35, %c48], %88 {strides = array<i32>} : memref<16x128xf32, #tpu.memory_space<vmem>>, vector<16x16xf32>,
    %90 = vector.extract_strided_slice %21 {offsets = [0, 0, 64], sizes = [2, 8, 16], strides = [1, 1, 1]} : vector<2x8x128xf32> to vector<2x8x16xf32>
    %91 = vector.extract_strided_slice %23 {offsets = [0, 0, 64], sizes = [2, 8, 16], strides = [1, 1, 1]} : vector<2x8x128xf32> to vector<2x8x16xf32>
    %92 = vector.extract_strided_slice %25 {offsets = [0, 0, 64], sizes = [2, 8, 16], strides = [1, 1, 1]} : vector<2x8x128xf32> to vector<2x8x16xf32>
    "tpu.trace_start"() <{level = 10 : i32, message = "bqd,bkd->bqk"}> : () -> ()
    %cst_36 = arith.constant dense<0.000000e+00> : vector<2x8x8xf32>
    %93 = tpu.matmul %90, %91, %cst_36 {dimension_numbers = #tpu.dot_dimension_numbers<[2], [2], [1], [1], [0, 0, 0, 1, 1, 1], [0], [0]>} : vector<2x8x16xf32>, vector<2x8x16xf32>, vector<2x8x8xf32> -> vector<2x8x8xf32>
    "tpu.trace_stop"() : () -> ()
    %cst_37 = arith.constant dense<0xFF800000> : vector<2x8xf32>
    %94 = vector.multi_reduction <maximumf>, %93, %cst_37 [2] : vector<2x8x8xf32> to vector<2x8xf32>
    %95 = vector.shape_cast %94 : vector<2x8xf32> to vector<2x8x1xf32>
    %96 = vector.broadcast %95 : vector<2x8x1xf32> to vector<2x8x8xf32>
    %97 = arith.subf %93, %96 : vector<2x8x8xf32>
    %98 = math.exp %97 : vector<2x8x8xf32>
    %cst_38 = arith.constant dense<0.000000e+00> : vector<2x8xf32>
    %99 = vector.multi_reduction <add>, %98, %cst_38 [2] : vector<2x8x8xf32> to vector<2x8xf32>
    %100 = vector.shape_cast %99 : vector<2x8xf32> to vector<2x8x1xf32>
    %101 = vector.broadcast %100 : vector<2x8x1xf32> to vector<2x8x8xf32>
    %102 = arith.divf %98, %101 : vector<2x8x8xf32>
    "tpu.trace_start"() <{level = 10 : i32, message = "bqk,bkd->bqd"}> : () -> ()
    %cst_39 = arith.constant dense<0.000000e+00> : vector<2x8x16xf32>
    %103 = tpu.matmul %102, %92, %cst_39 {dimension_numbers = #tpu.dot_dimension_numbers<[2], [1], [1], [2], [0, 0, 0, 1, 1, 2], [0], [0]>} : vector<2x8x8xf32>, vector<2x8x16xf32>, vector<2x8x16xf32> -> vector<2x8x16xf32>
    "tpu.trace_stop"() : () -> ()
    %104 = vector.shape_cast %103 : vector<2x8x16xf32> to vector<16x16xf32>
    %c0_40 = arith.constant 0 : index
    %c64 = arith.constant 64 : index
    %105 = vector.load %arg18[%c0_40, %c64] : memref<16x128xf32, #tpu.memory_space<vmem>>, vector<16x16xf32>
    tpu.vector_store %arg18[%c0_40, %c64], %104 {strides = array<i32>} : memref<16x128xf32, #tpu.memory_space<vmem>>, vector<16x16xf32>,
    %106 = vector.extract_strided_slice %21 {offsets = [0, 0, 80], sizes = [2, 8, 16], strides = [1, 1, 1]} : vector<2x8x128xf32> to vector<2x8x16xf32>
    %107 = vector.extract_strided_slice %23 {offsets = [0, 0, 80], sizes = [2, 8, 16], strides = [1, 1, 1]} : vector<2x8x128xf32> to vector<2x8x16xf32>
    %108 = vector.extract_strided_slice %25 {offsets = [0, 0, 80], sizes = [2, 8, 16], strides = [1, 1, 1]} : vector<2x8x128xf32> to vector<2x8x16xf32>
    "tpu.trace_start"() <{level = 10 : i32, message = "bqd,bkd->bqk"}> : () -> ()
    %cst_41 = arith.constant dense<0.000000e+00> : vector<2x8x8xf32>
    %109 = tpu.matmul %106, %107, %cst_41 {dimension_numbers = #tpu.dot_dimension_numbers<[2], [2], [1], [1], [0, 0, 0, 1, 1, 1], [0], [0]>} : vector<2x8x16xf32>, vector<2x8x16xf32>, vector<2x8x8xf32> -> vector<2x8x8xf32>
    "tpu.trace_stop"() : () -> ()
    %cst_42 = arith.constant dense<0xFF800000> : vector<2x8xf32>
    %110 = vector.multi_reduction <maximumf>, %109, %cst_42 [2] : vector<2x8x8xf32> to vector<2x8xf32>
    %111 = vector.shape_cast %110 : vector<2x8xf32> to vector<2x8x1xf32>
    %112 = vector.broadcast %111 : vector<2x8x1xf32> to vector<2x8x8xf32>
    %113 = arith.subf %109, %112 : vector<2x8x8xf32>
    %114 = math.exp %113 : vector<2x8x8xf32>
    %cst_43 = arith.constant dense<0.000000e+00> : vector<2x8xf32>
    %115 = vector.multi_reduction <add>, %114, %cst_43 [2] : vector<2x8x8xf32> to vector<2x8xf32>
    %116 = vector.shape_cast %115 : vector<2x8xf32> to vector<2x8x1xf32>
    %117 = vector.broadcast %116 : vector<2x8x1xf32> to vector<2x8x8xf32>
    %118 = arith.divf %114, %117 : vector<2x8x8xf32>
    "tpu.trace_start"() <{level = 10 : i32, message = "bqk,bkd->bqd"}> : () -> ()
    %cst_44 = arith.constant dense<0.000000e+00> : vector<2x8x16xf32>
    %119 = tpu.matmul %118, %108, %cst_44 {dimension_numbers = #tpu.dot_dimension_numbers<[2], [1], [1], [2], [0, 0, 0, 1, 1, 2], [0], [0]>} : vector<2x8x8xf32>, vector<2x8x16xf32>, vector<2x8x16xf32> -> vector<2x8x16xf32>
    "tpu.trace_stop"() : () -> ()
    %120 = vector.shape_cast %119 : vector<2x8x16xf32> to vector<16x16xf32>
    %c0_45 = arith.constant 0 : index
    %c80 = arith.constant 80 : index
    %121 = vector.load %arg18[%c0_45, %c80] : memref<16x128xf32, #tpu.memory_space<vmem>>, vector<16x16xf32>
    tpu.vector_store %arg18[%c0_45, %c80], %120 {strides = array<i32>} : memref<16x128xf32, #tpu.memory_space<vmem>>, vector<16x16xf32>,
    %122 = vector.extract_strided_slice %21 {offsets = [0, 0, 96], sizes = [2, 8, 16], strides = [1, 1, 1]} : vector<2x8x128xf32> to vector<2x8x16xf32>
    %123 = vector.extract_strided_slice %23 {offsets = [0, 0, 96], sizes = [2, 8, 16], strides = [1, 1, 1]} : vector<2x8x128xf32> to vector<2x8x16xf32>
    %124 = vector.extract_strided_slice %25 {offsets = [0, 0, 96], sizes = [2, 8, 16], strides = [1, 1, 1]} : vector<2x8x128xf32> to vector<2x8x16xf32>
    "tpu.trace_start"() <{level = 10 : i32, message = "bqd,bkd->bqk"}> : () -> ()
    %cst_46 = arith.constant dense<0.000000e+00> : vector<2x8x8xf32>
    %125 = tpu.matmul %122, %123, %cst_46 {dimension_numbers = #tpu.dot_dimension_numbers<[2], [2], [1], [1], [0, 0, 0, 1, 1, 1], [0], [0]>} : vector<2x8x16xf32>, vector<2x8x16xf32>, vector<2x8x8xf32> -> vector<2x8x8xf32>
    "tpu.trace_stop"() : () -> ()
    %cst_47 = arith.constant dense<0xFF800000> : vector<2x8xf32>
    %126 = vector.multi_reduction <maximumf>, %125, %cst_47 [2] : vector<2x8x8xf32> to vector<2x8xf32>
    %127 = vector.shape_cast %126 : vector<2x8xf32> to vector<2x8x1xf32>
    %128 = vector.broadcast %127 : vector<2x8x1xf32> to vector<2x8x8xf32>
    %129 = arith.subf %125, %128 : vector<2x8x8xf32>
    %130 = math.exp %129 : vector<2x8x8xf32>
    %cst_48 = arith.constant dense<0.000000e+00> : vector<2x8xf32>
    %131 = vector.multi_reduction <add>, %130, %cst_48 [2] : vector<2x8x8xf32> to vector<2x8xf32>
    %132 = vector.shape_cast %131 : vector<2x8xf32> to vector<2x8x1xf32>
    %133 = vector.broadcast %132 : vector<2x8x1xf32> to vector<2x8x8xf32>
    %134 = arith.divf %130, %133 : vector<2x8x8xf32>
    "tpu.trace_start"() <{level = 10 : i32, message = "bqk,bkd->bqd"}> : () -> ()
    %cst_49 = arith.constant dense<0.000000e+00> : vector<2x8x16xf32>
    %135 = tpu.matmul %134, %124, %cst_49 {dimension_numbers = #tpu.dot_dimension_numbers<[2], [1], [1], [2], [0, 0, 0, 1, 1, 2], [0], [0]>} : vector<2x8x8xf32>, vector<2x8x16xf32>, vector<2x8x16xf32> -> vector<2x8x16xf32>
    "tpu.trace_stop"() : () -> ()
    %136 = vector.shape_cast %135 : vector<2x8x16xf32> to vector<16x16xf32>
    %c0_50 = arith.constant 0 : index
    %c96 = arith.constant 96 : index
    %137 = vector.load %arg18[%c0_50, %c96] : memref<16x128xf32, #tpu.memory_space<vmem>>, vector<16x16xf32>
    tpu.vector_store %arg18[%c0_50, %c96], %136 {strides = array<i32>} : memref<16x128xf32, #tpu.memory_space<vmem>>, vector<16x16xf32>,
    %138 = vector.extract_strided_slice %21 {offsets = [0, 0, 112], sizes = [2, 8, 16], strides = [1, 1, 1]} : vector<2x8x128xf32> to vector<2x8x16xf32>
    %139 = vector.extract_strided_slice %23 {offsets = [0, 0, 112], sizes = [2, 8, 16], strides = [1, 1, 1]} : vector<2x8x128xf32> to vector<2x8x16xf32>
    %140 = vector.extract_strided_slice %25 {offsets = [0, 0, 112], sizes = [2, 8, 16], strides = [1, 1, 1]} : vector<2x8x128xf32> to vector<2x8x16xf32>
    "tpu.trace_start"() <{level = 10 : i32, message = "bqd,bkd->bqk"}> : () -> ()
    %cst_51 = arith.constant dense<0.000000e+00> : vector<2x8x8xf32>
    %141 = tpu.matmul %138, %139, %cst_51 {dimension_numbers = #tpu.dot_dimension_numbers<[2], [2], [1], [1], [0, 0, 0, 1, 1, 1], [0], [0]>} : vector<2x8x16xf32>, vector<2x8x16xf32>, vector<2x8x8xf32> -> vector<2x8x8xf32>
    "tpu.trace_stop"() : () -> ()
    %cst_52 = arith.constant dense<0xFF800000> : vector<2x8xf32>
    %142 = vector.multi_reduction <maximumf>, %141, %cst_52 [2] : vector<2x8x8xf32> to vector<2x8xf32>
    %143 = vector.shape_cast %142 : vector<2x8xf32> to vector<2x8x1xf32>
    %144 = vector.broadcast %143 : vector<2x8x1xf32> to vector<2x8x8xf32>
    %145 = arith.subf %141, %144 : vector<2x8x8xf32>
    %146 = math.exp %145 : vector<2x8x8xf32>
    %cst_53 = arith.constant dense<0.000000e+00> : vector<2x8xf32>
    %147 = vector.multi_reduction <add>, %146, %cst_53 [2] : vector<2x8x8xf32> to vector<2x8xf32>
    %148 = vector.shape_cast %147 : vector<2x8xf32> to vector<2x8x1xf32>
    %149 = vector.broadcast %148 : vector<2x8x1xf32> to vector<2x8x8xf32>
    %150 = arith.divf %146, %149 : vector<2x8x8xf32>
    "tpu.trace_start"() <{level = 10 : i32, message = "bqk,bkd->bqd"}> : () -> ()
    %cst_54 = arith.constant dense<0.000000e+00> : vector<2x8x16xf32>
    %151 = tpu.matmul %150, %140, %cst_54 {dimension_numbers = #tpu.dot_dimension_numbers<[2], [1], [1], [2], [0, 0, 0, 1, 1, 2], [0], [0]>} : vector<2x8x8xf32>, vector<2x8x16xf32>, vector<2x8x16xf32> -> vector<2x8x16xf32>
    "tpu.trace_stop"() : () -> ()
    %152 = vector.shape_cast %151 : vector<2x8x16xf32> to vector<16x16xf32>
    %c0_55 = arith.constant 0 : index
    %c112 = arith.constant 112 : index
    %153 = vector.load %arg18[%c0_55, %c112] : memref<16x128xf32, #tpu.memory_space<vmem>>, vector<16x16xf32>
    tpu.vector_store %arg18[%c0_55, %c112], %152 {strides = array<i32>} : memref<16x128xf32, #tpu.memory_space<vmem>>, vector<16x16xf32>,
    %c0_56 = arith.constant 0 : index
    %c0_57 = arith.constant 0 : index
    %154 = vector.load %arg18[%c0_56, %c0_57] : memref<16x128xf32, #tpu.memory_space<vmem>>, vector<16x128xf32>
    %c0_58 = arith.constant 0 : index
    %c0_59 = arith.constant 0 : index
    %c0_60 = arith.constant 0 : index
    %155 = vector.load %arg7[%c0_58, %c0_59, %c0_60] : memref<2x128x128xf32, #tpu.memory_space<vmem>>, vector<1x128x128xf32>
    %156 = vector.shape_cast %155 : vector<1x128x128xf32> to vector<128x128xf32>
    %cst_61 = arith.constant dense<0.000000e+00> : vector<16x128xf32>
    %157 = tpu.matmul %154, %156, %cst_61 {dimension_numbers = #tpu.dot_dimension_numbers<[1], [0], [0], [1], [0, 0, 1, 1], [], []>} : vector<16x128xf32>, vector<128x128xf32>, vector<16x128xf32> -> vector<16x128xf32>
    %c0_62 = arith.constant 0 : index
    %c0_63 = arith.constant 0 : index
    %c0_64 = arith.constant 0 : index
    %158 = vector.load %arg8[%c0_62, %c0_63, %c0_64] : memref<2x1x128xf32, #tpu.memory_space<vmem>>, vector<1x1x128xf32>
    %159 = vector.shape_cast %158 : vector<1x1x128xf32> to vector<1x128xf32>
    %160 = vector.broadcast %159 : vector<1x128xf32> to vector<16x128xf32>
    %161 = arith.addf %157, %160 : vector<16x128xf32>
    %162 = arith.addf %12, %161 : vector<16x128xf32>
    %c0_65 = arith.constant 0 : index
    %c0_66 = arith.constant 0 : index
    %c0_67 = arith.constant 0 : index
    %163 = vector.load %arg13[%c0_65, %c0_66, %c0_67] : memref<2x1x128xf32, #tpu.memory_space<vmem>>, vector<1x1x128xf32>
    %164 = vector.shape_cast %163 : vector<1x1x128xf32> to vector<1x128xf32>
    %c0_68 = arith.constant 0 : index
    %c0_69 = arith.constant 0 : index
    %c0_70 = arith.constant 0 : index
    %165 = vector.load %arg14[%c0_68, %c0_69, %c0_70] : memref<2x1x128xf32, #tpu.memory_space<vmem>>, vector<1x1x128xf32>
    %166 = vector.shape_cast %165 : vector<1x1x128xf32> to vector<1x128xf32>
    %cst_71 = arith.constant dense<0.000000e+00> : vector<16xf32>
    %167 = vector.multi_reduction <add>, %162, %cst_71 [1] : vector<16x128xf32> to vector<16xf32>
    %168 = vector.shape_cast %167 : vector<16xf32> to vector<16x1xf32>
    %cst_72 = arith.constant 1.280000e+02 : f32
    %169 = vector.broadcast %cst_72 : f32 to vector<16x1xf32>
    %170 = arith.divf %168, %169 : vector<16x1xf32>
    %171 = vector.broadcast %170 : vector<16x1xf32> to vector<16x128xf32>
    %172 = arith.subf %162, %171 : vector<16x128xf32>
    %173 = arith.mulf %172, %172 : vector<16x128xf32>
    %cst_73 = arith.constant dense<0.000000e+00> : vector<16xf32>
    %174 = vector.multi_reduction <add>, %173, %cst_73 [1] : vector<16x128xf32> to vector<16xf32>
    %175 = vector.shape_cast %174 : vector<16xf32> to vector<16x1xf32>
    %cst_74 = arith.constant 1.280000e+02 : f32
    %176 = vector.broadcast %cst_74 : f32 to vector<16x1xf32>
    %177 = arith.divf %175, %176 : vector<16x1xf32>
    %178 = vector.broadcast %170 : vector<16x1xf32> to vector<16x128xf32>
    %179 = arith.subf %162, %178 : vector<16x128xf32>
    %cst_75 = arith.constant 9.99999974E-6 : f32
    %180 = vector.broadcast %cst_75 : f32 to vector<16x1xf32>
    %181 = arith.addf %177, %180 : vector<16x1xf32>
    %182 = math.rsqrt %181 : vector<16x1xf32>
    %183 = vector.broadcast %182 : vector<16x1xf32> to vector<16x128xf32>
    %184 = arith.mulf %179, %183 : vector<16x128xf32>
    %185 = vector.broadcast %164 : vector<1x128xf32> to vector<16x128xf32>
    %186 = arith.mulf %184, %185 : vector<16x128xf32>
    %187 = vector.broadcast %166 : vector<1x128xf32> to vector<16x128xf32>
    %188 = arith.addf %186, %187 : vector<16x128xf32>
    %c0_76 = arith.constant 0 : index
    %c0_77 = arith.constant 0 : index
    %c0_78 = arith.constant 0 : index
    %189 = vector.load %arg9[%c0_76, %c0_77, %c0_78] : memref<2x128x256xf32, #tpu.memory_space<vmem>>, vector<1x128x256xf32>
    %190 = vector.shape_cast %189 : vector<1x128x256xf32> to vector<128x256xf32>
    %cst_79 = arith.constant dense<0.000000e+00> : vector<16x256xf32>
    %191 = tpu.matmul %188, %190, %cst_79 {dimension_numbers = #tpu.dot_dimension_numbers<[1], [0], [0], [1], [0, 0, 1, 1], [], []>} : vector<16x128xf32>, vector<128x256xf32>, vector<16x256xf32> -> vector<16x256xf32>
    %c0_80 = arith.constant 0 : index
    %c0_81 = arith.constant 0 : index
    %c0_82 = arith.constant 0 : index
    %192 = vector.load %arg10[%c0_80, %c0_81, %c0_82] : memref<2x1x256xf32, #tpu.memory_space<vmem>>, vector<1x1x256xf32>
    %193 = vector.shape_cast %192 : vector<1x1x256xf32> to vector<1x256xf32>
    %194 = vector.broadcast %193 : vector<1x256xf32> to vector<16x256xf32>
    %195 = arith.addf %191, %194 : vector<16x256xf32>
    %cst_83 = arith.constant 0.000000e+00 : f32
    %196 = vector.broadcast %cst_83 : f32 to vector<16x256xf32>
    %197 = arith.maximumf %195, %196 : vector<16x256xf32>
    %c0_84 = arith.constant 0 : index
    %c0_85 = arith.constant 0 : index
    %c0_86 = arith.constant 0 : index
    %198 = vector.load %arg11[%c0_84, %c0_85, %c0_86] : memref<2x256x128xf32, #tpu.memory_space<vmem>>, vector<1x256x128xf32>
    %199 = vector.shape_cast %198 : vector<1x256x128xf32> to vector<256x128xf32>
    %cst_87 = arith.constant dense<0.000000e+00> : vector<16x128xf32>
    %200 = tpu.matmul %197, %199, %cst_87 {dimension_numbers = #tpu.dot_dimension_numbers<[1], [0], [0], [1], [0, 0, 1, 1], [], []>} : vector<16x256xf32>, vector<256x128xf32>, vector<16x128xf32> -> vector<16x128xf32>
    %c0_88 = arith.constant 0 : index
    %c0_89 = arith.constant 0 : index
    %c0_90 = arith.constant 0 : index
    %201 = vector.load %arg12[%c0_88, %c0_89, %c0_90] : memref<2x1x128xf32, #tpu.memory_space<vmem>>, vector<1x1x128xf32>
    %202 = vector.shape_cast %201 : vector<1x1x128xf32> to vector<1x128xf32>
    %203 = vector.broadcast %202 : vector<1x128xf32> to vector<16x128xf32>
    %204 = arith.addf %200, %203 : vector<16x128xf32>
    %205 = arith.addf %188, %204 : vector<16x128xf32>
    %c0_91 = arith.constant 0 : index
    %c0_92 = arith.constant 0 : index
    %c0_93 = arith.constant 0 : index
    %206 = vector.load %arg15[%c0_91, %c0_92, %c0_93] : memref<2x1x128xf32, #tpu.memory_space<vmem>>, vector<1x1x128xf32>
    %207 = vector.shape_cast %206 : vector<1x1x128xf32> to vector<1x128xf32>
    %c0_94 = arith.constant 0 : index
    %c0_95 = arith.constant 0 : index
    %c0_96 = arith.constant 0 : index
    %208 = vector.load %arg16[%c0_94, %c0_95, %c0_96] : memref<2x1x128xf32, #tpu.memory_space<vmem>>, vector<1x1x128xf32>
    %209 = vector.shape_cast %208 : vector<1x1x128xf32> to vector<1x128xf32>
    %cst_97 = arith.constant dense<0.000000e+00> : vector<16xf32>
    %210 = vector.multi_reduction <add>, %205, %cst_97 [1] : vector<16x128xf32> to vector<16xf32>
    %211 = vector.shape_cast %210 : vector<16xf32> to vector<16x1xf32>
    %cst_98 = arith.constant 1.280000e+02 : f32
    %212 = vector.broadcast %cst_98 : f32 to vector<16x1xf32>
    %213 = arith.divf %211, %212 : vector<16x1xf32>
    %214 = vector.broadcast %213 : vector<16x1xf32> to vector<16x128xf32>
    %215 = arith.subf %205, %214 : vector<16x128xf32>
    %216 = arith.mulf %215, %215 : vector<16x128xf32>
    %cst_99 = arith.constant dense<0.000000e+00> : vector<16xf32>
    %217 = vector.multi_reduction <add>, %216, %cst_99 [1] : vector<16x128xf32> to vector<16xf32>
    %218 = vector.shape_cast %217 : vector<16xf32> to vector<16x1xf32>
    %cst_100 = arith.constant 1.280000e+02 : f32
    %219 = vector.broadcast %cst_100 : f32 to vector<16x1xf32>
    %220 = arith.divf %218, %219 : vector<16x1xf32>
    %221 = vector.broadcast %213 : vector<16x1xf32> to vector<16x128xf32>
    %222 = arith.subf %205, %221 : vector<16x128xf32>
    %cst_101 = arith.constant 9.99999974E-6 : f32
    %223 = vector.broadcast %cst_101 : f32 to vector<16x1xf32>
    %224 = arith.addf %220, %223 : vector<16x1xf32>
    %225 = math.rsqrt %224 : vector<16x1xf32>
    %226 = vector.broadcast %225 : vector<16x1xf32> to vector<16x128xf32>
    %227 = arith.mulf %222, %226 : vector<16x128xf32>
    %228 = vector.broadcast %207 : vector<1x128xf32> to vector<16x128xf32>
    %229 = arith.mulf %227, %228 : vector<16x128xf32>
    %230 = vector.broadcast %209 : vector<1x128xf32> to vector<16x128xf32>
    %231 = arith.addf %229, %230 : vector<16x128xf32>
    %c1 = arith.constant 1 : index
    %c0_102 = arith.constant 0 : index
    %c0_103 = arith.constant 0 : index
    %232 = vector.load %arg5[%c1, %c0_102, %c0_103] : memref<2x128x384xf32, #tpu.memory_space<vmem>>, vector<1x128x384xf32>
    %233 = vector.shape_cast %232 : vector<1x128x384xf32> to vector<128x384xf32>
    %cst_104 = arith.constant dense<0.000000e+00> : vector<16x384xf32>
    %234 = tpu.matmul %231, %233, %cst_104 {dimension_numbers = #tpu.dot_dimension_numbers<[1], [0], [0], [1], [0, 0, 1, 1], [], []>} : vector<16x128xf32>, vector<128x384xf32>, vector<16x384xf32> -> vector<16x384xf32>
    %c1_105 = arith.constant 1 : index
    %c0_106 = arith.constant 0 : index
    %c0_107 = arith.constant 0 : index
    %235 = vector.load %arg6[%c1_105, %c0_106, %c0_107] : memref<2x1x384xf32, #tpu.memory_space<vmem>>, vector<1x1x384xf32>
    %236 = vector.shape_cast %235 : vector<1x1x384xf32> to vector<1x384xf32>
    %237 = vector.broadcast %236 : vector<1x384xf32> to vector<16x384xf32>
    %238 = arith.addf %234, %237 : vector<16x384xf32>
    %239 = vector.extract_strided_slice %238 {offsets = [0, 0], sizes = [16, 128], strides = [1, 1]} : vector<16x384xf32> to vector<16x128xf32>
    %240 = vector.shape_cast %239 : vector<16x128xf32> to vector<2x8x128xf32>
    %241 = vector.extract_strided_slice %238 {offsets = [0, 128], sizes = [16, 128], strides = [1, 1]} : vector<16x384xf32> to vector<16x128xf32>
    %242 = vector.shape_cast %241 : vector<16x128xf32> to vector<2x8x128xf32>
    %243 = vector.extract_strided_slice %238 {offsets = [0, 256], sizes = [16, 128], strides = [1, 1]} : vector<16x384xf32> to vector<16x128xf32>
    %244 = vector.shape_cast %243 : vector<16x128xf32> to vector<2x8x128xf32>
    %245 = vector.extract_strided_slice %240 {offsets = [0, 0, 0], sizes = [2, 8, 16], strides = [1, 1, 1]} : vector<2x8x128xf32> to vector<2x8x16xf32>
    %246 = vector.extract_strided_slice %242 {offsets = [0, 0, 0], sizes = [2, 8, 16], strides = [1, 1, 1]} : vector<2x8x128xf32> to vector<2x8x16xf32>
    %247 = vector.extract_strided_slice %244 {offsets = [0, 0, 0], sizes = [2, 8, 16], strides = [1, 1, 1]} : vector<2x8x128xf32> to vector<2x8x16xf32>
    "tpu.trace_start"() <{level = 10 : i32, message = "bqd,bkd->bqk"}> : () -> ()
    %cst_108 = arith.constant dense<0.000000e+00> : vector<2x8x8xf32>
    %248 = tpu.matmul %245, %246, %cst_108 {dimension_numbers = #tpu.dot_dimension_numbers<[2], [2], [1], [1], [0, 0, 0, 1, 1, 1], [0], [0]>} : vector<2x8x16xf32>, vector<2x8x16xf32>, vector<2x8x8xf32> -> vector<2x8x8xf32>
    "tpu.trace_stop"() : () -> ()
    %cst_109 = arith.constant dense<0xFF800000> : vector<2x8xf32>
    %249 = vector.multi_reduction <maximumf>, %248, %cst_109 [2] : vector<2x8x8xf32> to vector<2x8xf32>
    %250 = vector.shape_cast %249 : vector<2x8xf32> to vector<2x8x1xf32>
    %251 = vector.broadcast %250 : vector<2x8x1xf32> to vector<2x8x8xf32>
    %252 = arith.subf %248, %251 : vector<2x8x8xf32>
    %253 = math.exp %252 : vector<2x8x8xf32>
    %cst_110 = arith.constant dense<0.000000e+00> : vector<2x8xf32>
    %254 = vector.multi_reduction <add>, %253, %cst_110 [2] : vector<2x8x8xf32> to vector<2x8xf32>
    %255 = vector.shape_cast %254 : vector<2x8xf32> to vector<2x8x1xf32>
    %256 = vector.broadcast %255 : vector<2x8x1xf32> to vector<2x8x8xf32>
    %257 = arith.divf %253, %256 : vector<2x8x8xf32>
    "tpu.trace_start"() <{level = 10 : i32, message = "bqk,bkd->bqd"}> : () -> ()
    %cst_111 = arith.constant dense<0.000000e+00> : vector<2x8x16xf32>
    %258 = tpu.matmul %257, %247, %cst_111 {dimension_numbers = #tpu.dot_dimension_numbers<[2], [1], [1], [2], [0, 0, 0, 1, 1, 2], [0], [0]>} : vector<2x8x8xf32>, vector<2x8x16xf32>, vector<2x8x16xf32> -> vector<2x8x16xf32>
    "tpu.trace_stop"() : () -> ()
    %259 = vector.shape_cast %258 : vector<2x8x16xf32> to vector<16x16xf32>
    %c0_112 = arith.constant 0 : index
    %c0_113 = arith.constant 0 : index
    %260 = vector.load %arg18[%c0_112, %c0_113] : memref<16x128xf32, #tpu.memory_space<vmem>>, vector<16x16xf32>
    tpu.vector_store %arg18[%c0_112, %c0_113], %259 {strides = array<i32>} : memref<16x128xf32, #tpu.memory_space<vmem>>, vector<16x16xf32>,
    %261 = vector.extract_strided_slice %240 {offsets = [0, 0, 16], sizes = [2, 8, 16], strides = [1, 1, 1]} : vector<2x8x128xf32> to vector<2x8x16xf32>
    %262 = vector.extract_strided_slice %242 {offsets = [0, 0, 16], sizes = [2, 8, 16], strides = [1, 1, 1]} : vector<2x8x128xf32> to vector<2x8x16xf32>
    %263 = vector.extract_strided_slice %244 {offsets = [0, 0, 16], sizes = [2, 8, 16], strides = [1, 1, 1]} : vector<2x8x128xf32> to vector<2x8x16xf32>
    "tpu.trace_start"() <{level = 10 : i32, message = "bqd,bkd->bqk"}> : () -> ()
    %cst_114 = arith.constant dense<0.000000e+00> : vector<2x8x8xf32>
    %264 = tpu.matmul %261, %262, %cst_114 {dimension_numbers = #tpu.dot_dimension_numbers<[2], [2], [1], [1], [0, 0, 0, 1, 1, 1], [0], [0]>} : vector<2x8x16xf32>, vector<2x8x16xf32>, vector<2x8x8xf32> -> vector<2x8x8xf32>
    "tpu.trace_stop"() : () -> ()
    %cst_115 = arith.constant dense<0xFF800000> : vector<2x8xf32>
    %265 = vector.multi_reduction <maximumf>, %264, %cst_115 [2] : vector<2x8x8xf32> to vector<2x8xf32>
    %266 = vector.shape_cast %265 : vector<2x8xf32> to vector<2x8x1xf32>
    %267 = vector.broadcast %266 : vector<2x8x1xf32> to vector<2x8x8xf32>
    %268 = arith.subf %264, %267 : vector<2x8x8xf32>
    %269 = math.exp %268 : vector<2x8x8xf32>
    %cst_116 = arith.constant dense<0.000000e+00> : vector<2x8xf32>
    %270 = vector.multi_reduction <add>, %269, %cst_116 [2] : vector<2x8x8xf32> to vector<2x8xf32>
    %271 = vector.shape_cast %270 : vector<2x8xf32> to vector<2x8x1xf32>
    %272 = vector.broadcast %271 : vector<2x8x1xf32> to vector<2x8x8xf32>
    %273 = arith.divf %269, %272 : vector<2x8x8xf32>
    "tpu.trace_start"() <{level = 10 : i32, message = "bqk,bkd->bqd"}> : () -> ()
    %cst_117 = arith.constant dense<0.000000e+00> : vector<2x8x16xf32>
    %274 = tpu.matmul %273, %263, %cst_117 {dimension_numbers = #tpu.dot_dimension_numbers<[2], [1], [1], [2], [0, 0, 0, 1, 1, 2], [0], [0]>} : vector<2x8x8xf32>, vector<2x8x16xf32>, vector<2x8x16xf32> -> vector<2x8x16xf32>
    "tpu.trace_stop"() : () -> ()
    %275 = vector.shape_cast %274 : vector<2x8x16xf32> to vector<16x16xf32>
    %c0_118 = arith.constant 0 : index
    %c16_119 = arith.constant 16 : index
    %276 = vector.load %arg18[%c0_118, %c16_119] : memref<16x128xf32, #tpu.memory_space<vmem>>, vector<16x16xf32>
    tpu.vector_store %arg18[%c0_118, %c16_119], %275 {strides = array<i32>} : memref<16x128xf32, #tpu.memory_space<vmem>>, vector<16x16xf32>,
    %277 = vector.extract_strided_slice %240 {offsets = [0, 0, 32], sizes = [2, 8, 16], strides = [1, 1, 1]} : vector<2x8x128xf32> to vector<2x8x16xf32>
    %278 = vector.extract_strided_slice %242 {offsets = [0, 0, 32], sizes = [2, 8, 16], strides = [1, 1, 1]} : vector<2x8x128xf32> to vector<2x8x16xf32>
    %279 = vector.extract_strided_slice %244 {offsets = [0, 0, 32], sizes = [2, 8, 16], strides = [1, 1, 1]} : vector<2x8x128xf32> to vector<2x8x16xf32>
    "tpu.trace_start"() <{level = 10 : i32, message = "bqd,bkd->bqk"}> : () -> ()
    %cst_120 = arith.constant dense<0.000000e+00> : vector<2x8x8xf32>
    %280 = tpu.matmul %277, %278, %cst_120 {dimension_numbers = #tpu.dot_dimension_numbers<[2], [2], [1], [1], [0, 0, 0, 1, 1, 1], [0], [0]>} : vector<2x8x16xf32>, vector<2x8x16xf32>, vector<2x8x8xf32> -> vector<2x8x8xf32>
    "tpu.trace_stop"() : () -> ()
    %cst_121 = arith.constant dense<0xFF800000> : vector<2x8xf32>
    %281 = vector.multi_reduction <maximumf>, %280, %cst_121 [2] : vector<2x8x8xf32> to vector<2x8xf32>
    %282 = vector.shape_cast %281 : vector<2x8xf32> to vector<2x8x1xf32>
    %283 = vector.broadcast %282 : vector<2x8x1xf32> to vector<2x8x8xf32>
    %284 = arith.subf %280, %283 : vector<2x8x8xf32>
    %285 = math.exp %284 : vector<2x8x8xf32>
    %cst_122 = arith.constant dense<0.000000e+00> : vector<2x8xf32>
    %286 = vector.multi_reduction <add>, %285, %cst_122 [2] : vector<2x8x8xf32> to vector<2x8xf32>
    %287 = vector.shape_cast %286 : vector<2x8xf32> to vector<2x8x1xf32>
    %288 = vector.broadcast %287 : vector<2x8x1xf32> to vector<2x8x8xf32>
    %289 = arith.divf %285, %288 : vector<2x8x8xf32>
    "tpu.trace_start"() <{level = 10 : i32, message = "bqk,bkd->bqd"}> : () -> ()
    %cst_123 = arith.constant dense<0.000000e+00> : vector<2x8x16xf32>
    %290 = tpu.matmul %289, %279, %cst_123 {dimension_numbers = #tpu.dot_dimension_numbers<[2], [1], [1], [2], [0, 0, 0, 1, 1, 2], [0], [0]>} : vector<2x8x8xf32>, vector<2x8x16xf32>, vector<2x8x16xf32> -> vector<2x8x16xf32>
    "tpu.trace_stop"() : () -> ()
    %291 = vector.shape_cast %290 : vector<2x8x16xf32> to vector<16x16xf32>
    %c0_124 = arith.constant 0 : index
    %c32_125 = arith.constant 32 : index
    %292 = vector.load %arg18[%c0_124, %c32_125] : memref<16x128xf32, #tpu.memory_space<vmem>>, vector<16x16xf32>
    tpu.vector_store %arg18[%c0_124, %c32_125], %291 {strides = array<i32>} : memref<16x128xf32, #tpu.memory_space<vmem>>, vector<16x16xf32>,
    %293 = vector.extract_strided_slice %240 {offsets = [0, 0, 48], sizes = [2, 8, 16], strides = [1, 1, 1]} : vector<2x8x128xf32> to vector<2x8x16xf32>
    %294 = vector.extract_strided_slice %242 {offsets = [0, 0, 48], sizes = [2, 8, 16], strides = [1, 1, 1]} : vector<2x8x128xf32> to vector<2x8x16xf32>
    %295 = vector.extract_strided_slice %244 {offsets = [0, 0, 48], sizes = [2, 8, 16], strides = [1, 1, 1]} : vector<2x8x128xf32> to vector<2x8x16xf32>
    "tpu.trace_start"() <{level = 10 : i32, message = "bqd,bkd->bqk"}> : () -> ()
    %cst_126 = arith.constant dense<0.000000e+00> : vector<2x8x8xf32>
    %296 = tpu.matmul %293, %294, %cst_126 {dimension_numbers = #tpu.dot_dimension_numbers<[2], [2], [1], [1], [0, 0, 0, 1, 1, 1], [0], [0]>} : vector<2x8x16xf32>, vector<2x8x16xf32>, vector<2x8x8xf32> -> vector<2x8x8xf32>
    "tpu.trace_stop"() : () -> ()
    %cst_127 = arith.constant dense<0xFF800000> : vector<2x8xf32>
    %297 = vector.multi_reduction <maximumf>, %296, %cst_127 [2] : vector<2x8x8xf32> to vector<2x8xf32>
    %298 = vector.shape_cast %297 : vector<2x8xf32> to vector<2x8x1xf32>
    %299 = vector.broadcast %298 : vector<2x8x1xf32> to vector<2x8x8xf32>
    %300 = arith.subf %296, %299 : vector<2x8x8xf32>
    %301 = math.exp %300 : vector<2x8x8xf32>
    %cst_128 = arith.constant dense<0.000000e+00> : vector<2x8xf32>
    %302 = vector.multi_reduction <add>, %301, %cst_128 [2] : vector<2x8x8xf32> to vector<2x8xf32>
    %303 = vector.shape_cast %302 : vector<2x8xf32> to vector<2x8x1xf32>
    %304 = vector.broadcast %303 : vector<2x8x1xf32> to vector<2x8x8xf32>
    %305 = arith.divf %301, %304 : vector<2x8x8xf32>
    "tpu.trace_start"() <{level = 10 : i32, message = "bqk,bkd->bqd"}> : () -> ()
    %cst_129 = arith.constant dense<0.000000e+00> : vector<2x8x16xf32>
    %306 = tpu.matmul %305, %295, %cst_129 {dimension_numbers = #tpu.dot_dimension_numbers<[2], [1], [1], [2], [0, 0, 0, 1, 1, 2], [0], [0]>} : vector<2x8x8xf32>, vector<2x8x16xf32>, vector<2x8x16xf32> -> vector<2x8x16xf32>
    "tpu.trace_stop"() : () -> ()
    %307 = vector.shape_cast %306 : vector<2x8x16xf32> to vector<16x16xf32>
    %c0_130 = arith.constant 0 : index
    %c48_131 = arith.constant 48 : index
    %308 = vector.load %arg18[%c0_130, %c48_131] : memref<16x128xf32, #tpu.memory_space<vmem>>, vector<16x16xf32>
    tpu.vector_store %arg18[%c0_130, %c48_131], %307 {strides = array<i32>} : memref<16x128xf32, #tpu.memory_space<vmem>>, vector<16x16xf32>,
    %309 = vector.extract_strided_slice %240 {offsets = [0, 0, 64], sizes = [2, 8, 16], strides = [1, 1, 1]} : vector<2x8x128xf32> to vector<2x8x16xf32>
    %310 = vector.extract_strided_slice %242 {offsets = [0, 0, 64], sizes = [2, 8, 16], strides = [1, 1, 1]} : vector<2x8x128xf32> to vector<2x8x16xf32>
    %311 = vector.extract_strided_slice %244 {offsets = [0, 0, 64], sizes = [2, 8, 16], strides = [1, 1, 1]} : vector<2x8x128xf32> to vector<2x8x16xf32>
    "tpu.trace_start"() <{level = 10 : i32, message = "bqd,bkd->bqk"}> : () -> ()
    %cst_132 = arith.constant dense<0.000000e+00> : vector<2x8x8xf32>
    %312 = tpu.matmul %309, %310, %cst_132 {dimension_numbers = #tpu.dot_dimension_numbers<[2], [2], [1], [1], [0, 0, 0, 1, 1, 1], [0], [0]>} : vector<2x8x16xf32>, vector<2x8x16xf32>, vector<2x8x8xf32> -> vector<2x8x8xf32>
    "tpu.trace_stop"() : () -> ()
    %cst_133 = arith.constant dense<0xFF800000> : vector<2x8xf32>
    %313 = vector.multi_reduction <maximumf>, %312, %cst_133 [2] : vector<2x8x8xf32> to vector<2x8xf32>
    %314 = vector.shape_cast %313 : vector<2x8xf32> to vector<2x8x1xf32>
    %315 = vector.broadcast %314 : vector<2x8x1xf32> to vector<2x8x8xf32>
    %316 = arith.subf %312, %315 : vector<2x8x8xf32>
    %317 = math.exp %316 : vector<2x8x8xf32>
    %cst_134 = arith.constant dense<0.000000e+00> : vector<2x8xf32>
    %318 = vector.multi_reduction <add>, %317, %cst_134 [2] : vector<2x8x8xf32> to vector<2x8xf32>
    %319 = vector.shape_cast %318 : vector<2x8xf32> to vector<2x8x1xf32>
    %320 = vector.broadcast %319 : vector<2x8x1xf32> to vector<2x8x8xf32>
    %321 = arith.divf %317, %320 : vector<2x8x8xf32>
    "tpu.trace_start"() <{level = 10 : i32, message = "bqk,bkd->bqd"}> : () -> ()
    %cst_135 = arith.constant dense<0.000000e+00> : vector<2x8x16xf32>
    %322 = tpu.matmul %321, %311, %cst_135 {dimension_numbers = #tpu.dot_dimension_numbers<[2], [1], [1], [2], [0, 0, 0, 1, 1, 2], [0], [0]>} : vector<2x8x8xf32>, vector<2x8x16xf32>, vector<2x8x16xf32> -> vector<2x8x16xf32>
    "tpu.trace_stop"() : () -> ()
    %323 = vector.shape_cast %322 : vector<2x8x16xf32> to vector<16x16xf32>
    %c0_136 = arith.constant 0 : index
    %c64_137 = arith.constant 64 : index
    %324 = vector.load %arg18[%c0_136, %c64_137] : memref<16x128xf32, #tpu.memory_space<vmem>>, vector<16x16xf32>
    tpu.vector_store %arg18[%c0_136, %c64_137], %323 {strides = array<i32>} : memref<16x128xf32, #tpu.memory_space<vmem>>, vector<16x16xf32>,
    %325 = vector.extract_strided_slice %240 {offsets = [0, 0, 80], sizes = [2, 8, 16], strides = [1, 1, 1]} : vector<2x8x128xf32> to vector<2x8x16xf32>
    %326 = vector.extract_strided_slice %242 {offsets = [0, 0, 80], sizes = [2, 8, 16], strides = [1, 1, 1]} : vector<2x8x128xf32> to vector<2x8x16xf32>
    %327 = vector.extract_strided_slice %244 {offsets = [0, 0, 80], sizes = [2, 8, 16], strides = [1, 1, 1]} : vector<2x8x128xf32> to vector<2x8x16xf32>
    "tpu.trace_start"() <{level = 10 : i32, message = "bqd,bkd->bqk"}> : () -> ()
    %cst_138 = arith.constant dense<0.000000e+00> : vector<2x8x8xf32>
    %328 = tpu.matmul %325, %326, %cst_138 {dimension_numbers = #tpu.dot_dimension_numbers<[2], [2], [1], [1], [0, 0, 0, 1, 1, 1], [0], [0]>} : vector<2x8x16xf32>, vector<2x8x16xf32>, vector<2x8x8xf32> -> vector<2x8x8xf32>
    "tpu.trace_stop"() : () -> ()
    %cst_139 = arith.constant dense<0xFF800000> : vector<2x8xf32>
    %329 = vector.multi_reduction <maximumf>, %328, %cst_139 [2] : vector<2x8x8xf32> to vector<2x8xf32>
    %330 = vector.shape_cast %329 : vector<2x8xf32> to vector<2x8x1xf32>
    %331 = vector.broadcast %330 : vector<2x8x1xf32> to vector<2x8x8xf32>
    %332 = arith.subf %328, %331 : vector<2x8x8xf32>
    %333 = math.exp %332 : vector<2x8x8xf32>
    %cst_140 = arith.constant dense<0.000000e+00> : vector<2x8xf32>
    %334 = vector.multi_reduction <add>, %333, %cst_140 [2] : vector<2x8x8xf32> to vector<2x8xf32>
    %335 = vector.shape_cast %334 : vector<2x8xf32> to vector<2x8x1xf32>
    %336 = vector.broadcast %335 : vector<2x8x1xf32> to vector<2x8x8xf32>
    %337 = arith.divf %333, %336 : vector<2x8x8xf32>
    "tpu.trace_start"() <{level = 10 : i32, message = "bqk,bkd->bqd"}> : () -> ()
    %cst_141 = arith.constant dense<0.000000e+00> : vector<2x8x16xf32>
    %338 = tpu.matmul %337, %327, %cst_141 {dimension_numbers = #tpu.dot_dimension_numbers<[2], [1], [1], [2], [0, 0, 0, 1, 1, 2], [0], [0]>} : vector<2x8x8xf32>, vector<2x8x16xf32>, vector<2x8x16xf32> -> vector<2x8x16xf32>
    "tpu.trace_stop"() : () -> ()
    %339 = vector.shape_cast %338 : vector<2x8x16xf32> to vector<16x16xf32>
    %c0_142 = arith.constant 0 : index
    %c80_143 = arith.constant 80 : index
    %340 = vector.load %arg18[%c0_142, %c80_143] : memref<16x128xf32, #tpu.memory_space<vmem>>, vector<16x16xf32>
    tpu.vector_store %arg18[%c0_142, %c80_143], %339 {strides = array<i32>} : memref<16x128xf32, #tpu.memory_space<vmem>>, vector<16x16xf32>,
    %341 = vector.extract_strided_slice %240 {offsets = [0, 0, 96], sizes = [2, 8, 16], strides = [1, 1, 1]} : vector<2x8x128xf32> to vector<2x8x16xf32>
    %342 = vector.extract_strided_slice %242 {offsets = [0, 0, 96], sizes = [2, 8, 16], strides = [1, 1, 1]} : vector<2x8x128xf32> to vector<2x8x16xf32>
    %343 = vector.extract_strided_slice %244 {offsets = [0, 0, 96], sizes = [2, 8, 16], strides = [1, 1, 1]} : vector<2x8x128xf32> to vector<2x8x16xf32>
    "tpu.trace_start"() <{level = 10 : i32, message = "bqd,bkd->bqk"}> : () -> ()
    %cst_144 = arith.constant dense<0.000000e+00> : vector<2x8x8xf32>
    %344 = tpu.matmul %341, %342, %cst_144 {dimension_numbers = #tpu.dot_dimension_numbers<[2], [2], [1], [1], [0, 0, 0, 1, 1, 1], [0], [0]>} : vector<2x8x16xf32>, vector<2x8x16xf32>, vector<2x8x8xf32> -> vector<2x8x8xf32>
    "tpu.trace_stop"() : () -> ()
    %cst_145 = arith.constant dense<0xFF800000> : vector<2x8xf32>
    %345 = vector.multi_reduction <maximumf>, %344, %cst_145 [2] : vector<2x8x8xf32> to vector<2x8xf32>
    %346 = vector.shape_cast %345 : vector<2x8xf32> to vector<2x8x1xf32>
    %347 = vector.broadcast %346 : vector<2x8x1xf32> to vector<2x8x8xf32>
    %348 = arith.subf %344, %347 : vector<2x8x8xf32>
    %349 = math.exp %348 : vector<2x8x8xf32>
    %cst_146 = arith.constant dense<0.000000e+00> : vector<2x8xf32>
    %350 = vector.multi_reduction <add>, %349, %cst_146 [2] : vector<2x8x8xf32> to vector<2x8xf32>
    %351 = vector.shape_cast %350 : vector<2x8xf32> to vector<2x8x1xf32>
    %352 = vector.broadcast %351 : vector<2x8x1xf32> to vector<2x8x8xf32>
    %353 = arith.divf %349, %352 : vector<2x8x8xf32>
    "tpu.trace_start"() <{level = 10 : i32, message = "bqk,bkd->bqd"}> : () -> ()
    %cst_147 = arith.constant dense<0.000000e+00> : vector<2x8x16xf32>
    %354 = tpu.matmul %353, %343, %cst_147 {dimension_numbers = #tpu.dot_dimension_numbers<[2], [1], [1], [2], [0, 0, 0, 1, 1, 2], [0], [0]>} : vector<2x8x8xf32>, vector<2x8x16xf32>, vector<2x8x16xf32> -> vector<2x8x16xf32>
    "tpu.trace_stop"() : () -> ()
    %355 = vector.shape_cast %354 : vector<2x8x16xf32> to vector<16x16xf32>
    %c0_148 = arith.constant 0 : index
    %c96_149 = arith.constant 96 : index
    %356 = vector.load %arg18[%c0_148, %c96_149] : memref<16x128xf32, #tpu.memory_space<vmem>>, vector<16x16xf32>
    tpu.vector_store %arg18[%c0_148, %c96_149], %355 {strides = array<i32>} : memref<16x128xf32, #tpu.memory_space<vmem>>, vector<16x16xf32>,
    %357 = vector.extract_strided_slice %240 {offsets = [0, 0, 112], sizes = [2, 8, 16], strides = [1, 1, 1]} : vector<2x8x128xf32> to vector<2x8x16xf32>
    %358 = vector.extract_strided_slice %242 {offsets = [0, 0, 112], sizes = [2, 8, 16], strides = [1, 1, 1]} : vector<2x8x128xf32> to vector<2x8x16xf32>
    %359 = vector.extract_strided_slice %244 {offsets = [0, 0, 112], sizes = [2, 8, 16], strides = [1, 1, 1]} : vector<2x8x128xf32> to vector<2x8x16xf32>
    "tpu.trace_start"() <{level = 10 : i32, message = "bqd,bkd->bqk"}> : () -> ()
    %cst_150 = arith.constant dense<0.000000e+00> : vector<2x8x8xf32>
    %360 = tpu.matmul %357, %358, %cst_150 {dimension_numbers = #tpu.dot_dimension_numbers<[2], [2], [1], [1], [0, 0, 0, 1, 1, 1], [0], [0]>} : vector<2x8x16xf32>, vector<2x8x16xf32>, vector<2x8x8xf32> -> vector<2x8x8xf32>
    "tpu.trace_stop"() : () -> ()
    %cst_151 = arith.constant dense<0xFF800000> : vector<2x8xf32>
    %361 = vector.multi_reduction <maximumf>, %360, %cst_151 [2] : vector<2x8x8xf32> to vector<2x8xf32>
    %362 = vector.shape_cast %361 : vector<2x8xf32> to vector<2x8x1xf32>
    %363 = vector.broadcast %362 : vector<2x8x1xf32> to vector<2x8x8xf32>
    %364 = arith.subf %360, %363 : vector<2x8x8xf32>
    %365 = math.exp %364 : vector<2x8x8xf32>
    %cst_152 = arith.constant dense<0.000000e+00> : vector<2x8xf32>
    %366 = vector.multi_reduction <add>, %365, %cst_152 [2] : vector<2x8x8xf32> to vector<2x8xf32>
    %367 = vector.shape_cast %366 : vector<2x8xf32> to vector<2x8x1xf32>
    %368 = vector.broadcast %367 : vector<2x8x1xf32> to vector<2x8x8xf32>
    %369 = arith.divf %365, %368 : vector<2x8x8xf32>
    "tpu.trace_start"() <{level = 10 : i32, message = "bqk,bkd->bqd"}> : () -> ()
    %cst_153 = arith.constant dense<0.000000e+00> : vector<2x8x16xf32>
    %370 = tpu.matmul %369, %359, %cst_153 {dimension_numbers = #tpu.dot_dimension_numbers<[2], [1], [1], [2], [0, 0, 0, 1, 1, 2], [0], [0]>} : vector<2x8x8xf32>, vector<2x8x16xf32>, vector<2x8x16xf32> -> vector<2x8x16xf32>
    "tpu.trace_stop"() : () -> ()
    %371 = vector.shape_cast %370 : vector<2x8x16xf32> to vector<16x16xf32>
    %c0_154 = arith.constant 0 : index
    %c112_155 = arith.constant 112 : index
    %372 = vector.load %arg18[%c0_154, %c112_155] : memref<16x128xf32, #tpu.memory_space<vmem>>, vector<16x16xf32>
    tpu.vector_store %arg18[%c0_154, %c112_155], %371 {strides = array<i32>} : memref<16x128xf32, #tpu.memory_space<vmem>>, vector<16x16xf32>,
    %c0_156 = arith.constant 0 : index
    %c0_157 = arith.constant 0 : index
    %373 = vector.load %arg18[%c0_156, %c0_157] : memref<16x128xf32, #tpu.memory_space<vmem>>, vector<16x128xf32>
    %c1_158 = arith.constant 1 : index
    %c0_159 = arith.constant 0 : index
    %c0_160 = arith.constant 0 : index
    %374 = vector.load %arg7[%c1_158, %c0_159, %c0_160] : memref<2x128x128xf32, #tpu.memory_space<vmem>>, vector<1x128x128xf32>
    %375 = vector.shape_cast %374 : vector<1x128x128xf32> to vector<128x128xf32>
    %cst_161 = arith.constant dense<0.000000e+00> : vector<16x128xf32>
    %376 = tpu.matmul %373, %375, %cst_161 {dimension_numbers = #tpu.dot_dimension_numbers<[1], [0], [0], [1], [0, 0, 1, 1], [], []>} : vector<16x128xf32>, vector<128x128xf32>, vector<16x128xf32> -> vector<16x128xf32>
    %c1_162 = arith.constant 1 : index
    %c0_163 = arith.constant 0 : index
    %c0_164 = arith.constant 0 : index
    %377 = vector.load %arg8[%c1_162, %c0_163, %c0_164] : memref<2x1x128xf32, #tpu.memory_space<vmem>>, vector<1x1x128xf32>
    %378 = vector.shape_cast %377 : vector<1x1x128xf32> to vector<1x128xf32>
    %379 = vector.broadcast %378 : vector<1x128xf32> to vector<16x128xf32>
    %380 = arith.addf %376, %379 : vector<16x128xf32>
    %381 = arith.addf %231, %380 : vector<16x128xf32>
    %c1_165 = arith.constant 1 : index
    %c0_166 = arith.constant 0 : index
    %c0_167 = arith.constant 0 : index
    %382 = vector.load %arg13[%c1_165, %c0_166, %c0_167] : memref<2x1x128xf32, #tpu.memory_space<vmem>>, vector<1x1x128xf32>
    %383 = vector.shape_cast %382 : vector<1x1x128xf32> to vector<1x128xf32>
    %c1_168 = arith.constant 1 : index
    %c0_169 = arith.constant 0 : index
    %c0_170 = arith.constant 0 : index
    %384 = vector.load %arg14[%c1_168, %c0_169, %c0_170] : memref<2x1x128xf32, #tpu.memory_space<vmem>>, vector<1x1x128xf32>
    %385 = vector.shape_cast %384 : vector<1x1x128xf32> to vector<1x128xf32>
    %cst_171 = arith.constant dense<0.000000e+00> : vector<16xf32>
    %386 = vector.multi_reduction <add>, %381, %cst_171 [1] : vector<16x128xf32> to vector<16xf32>
    %387 = vector.shape_cast %386 : vector<16xf32> to vector<16x1xf32>
    %cst_172 = arith.constant 1.280000e+02 : f32
    %388 = vector.broadcast %cst_172 : f32 to vector<16x1xf32>
    %389 = arith.divf %387, %388 : vector<16x1xf32>
    %390 = vector.broadcast %389 : vector<16x1xf32> to vector<16x128xf32>
    %391 = arith.subf %381, %390 : vector<16x128xf32>
    %392 = arith.mulf %391, %391 : vector<16x128xf32>
    %cst_173 = arith.constant dense<0.000000e+00> : vector<16xf32>
    %393 = vector.multi_reduction <add>, %392, %cst_173 [1] : vector<16x128xf32> to vector<16xf32>
    %394 = vector.shape_cast %393 : vector<16xf32> to vector<16x1xf32>
    %cst_174 = arith.constant 1.280000e+02 : f32
    %395 = vector.broadcast %cst_174 : f32 to vector<16x1xf32>
    %396 = arith.divf %394, %395 : vector<16x1xf32>
    %397 = vector.broadcast %389 : vector<16x1xf32> to vector<16x128xf32>
    %398 = arith.subf %381, %397 : vector<16x128xf32>
    %cst_175 = arith.constant 9.99999974E-6 : f32
    %399 = vector.broadcast %cst_175 : f32 to vector<16x1xf32>
    %400 = arith.addf %396, %399 : vector<16x1xf32>
    %401 = math.rsqrt %400 : vector<16x1xf32>
    %402 = vector.broadcast %401 : vector<16x1xf32> to vector<16x128xf32>
    %403 = arith.mulf %398, %402 : vector<16x128xf32>
    %404 = vector.broadcast %383 : vector<1x128xf32> to vector<16x128xf32>
    %405 = arith.mulf %403, %404 : vector<16x128xf32>
    %406 = vector.broadcast %385 : vector<1x128xf32> to vector<16x128xf32>
    %407 = arith.addf %405, %406 : vector<16x128xf32>
    %c1_176 = arith.constant 1 : index
    %c0_177 = arith.constant 0 : index
    %c0_178 = arith.constant 0 : index
    %408 = vector.load %arg9[%c1_176, %c0_177, %c0_178] : memref<2x128x256xf32, #tpu.memory_space<vmem>>, vector<1x128x256xf32>
    %409 = vector.shape_cast %408 : vector<1x128x256xf32> to vector<128x256xf32>
    %cst_179 = arith.constant dense<0.000000e+00> : vector<16x256xf32>
    %410 = tpu.matmul %407, %409, %cst_179 {dimension_numbers = #tpu.dot_dimension_numbers<[1], [0], [0], [1], [0, 0, 1, 1], [], []>} : vector<16x128xf32>, vector<128x256xf32>, vector<16x256xf32> -> vector<16x256xf32>
    %c1_180 = arith.constant 1 : index
    %c0_181 = arith.constant 0 : index
    %c0_182 = arith.constant 0 : index
    %411 = vector.load %arg10[%c1_180, %c0_181, %c0_182] : memref<2x1x256xf32, #tpu.memory_space<vmem>>, vector<1x1x256xf32>
    %412 = vector.shape_cast %411 : vector<1x1x256xf32> to vector<1x256xf32>
    %413 = vector.broadcast %412 : vector<1x256xf32> to vector<16x256xf32>
    %414 = arith.addf %410, %413 : vector<16x256xf32>
    %cst_183 = arith.constant 0.000000e+00 : f32
    %415 = vector.broadcast %cst_183 : f32 to vector<16x256xf32>
    %416 = arith.maximumf %414, %415 : vector<16x256xf32>
    %c1_184 = arith.constant 1 : index
    %c0_185 = arith.constant 0 : index
    %c0_186 = arith.constant 0 : index
    %417 = vector.load %arg11[%c1_184, %c0_185, %c0_186] : memref<2x256x128xf32, #tpu.memory_space<vmem>>, vector<1x256x128xf32>
    %418 = vector.shape_cast %417 : vector<1x256x128xf32> to vector<256x128xf32>
    %cst_187 = arith.constant dense<0.000000e+00> : vector<16x128xf32>
    %419 = tpu.matmul %416, %418, %cst_187 {dimension_numbers = #tpu.dot_dimension_numbers<[1], [0], [0], [1], [0, 0, 1, 1], [], []>} : vector<16x256xf32>, vector<256x128xf32>, vector<16x128xf32> -> vector<16x128xf32>
    %c1_188 = arith.constant 1 : index
    %c0_189 = arith.constant 0 : index
    %c0_190 = arith.constant 0 : index
    %420 = vector.load %arg12[%c1_188, %c0_189, %c0_190] : memref<2x1x128xf32, #tpu.memory_space<vmem>>, vector<1x1x128xf32>
    %421 = vector.shape_cast %420 : vector<1x1x128xf32> to vector<1x128xf32>
    %422 = vector.broadcast %421 : vector<1x128xf32> to vector<16x128xf32>
    %423 = arith.addf %419, %422 : vector<16x128xf32>
    %424 = arith.addf %407, %423 : vector<16x128xf32>
    %c1_191 = arith.constant 1 : index
    %c0_192 = arith.constant 0 : index
    %c0_193 = arith.constant 0 : index
    %425 = vector.load %arg15[%c1_191, %c0_192, %c0_193] : memref<2x1x128xf32, #tpu.memory_space<vmem>>, vector<1x1x128xf32>
    %426 = vector.shape_cast %425 : vector<1x1x128xf32> to vector<1x128xf32>
    %c1_194 = arith.constant 1 : index
    %c0_195 = arith.constant 0 : index
    %c0_196 = arith.constant 0 : index
    %427 = vector.load %arg16[%c1_194, %c0_195, %c0_196] : memref<2x1x128xf32, #tpu.memory_space<vmem>>, vector<1x1x128xf32>
    %428 = vector.shape_cast %427 : vector<1x1x128xf32> to vector<1x128xf32>
    %cst_197 = arith.constant dense<0.000000e+00> : vector<16xf32>
    %429 = vector.multi_reduction <add>, %424, %cst_197 [1] : vector<16x128xf32> to vector<16xf32>
    %430 = vector.shape_cast %429 : vector<16xf32> to vector<16x1xf32>
    %cst_198 = arith.constant 1.280000e+02 : f32
    %431 = vector.broadcast %cst_198 : f32 to vector<16x1xf32>
    %432 = arith.divf %430, %431 : vector<16x1xf32>
    %433 = vector.broadcast %432 : vector<16x1xf32> to vector<16x128xf32>
    %434 = arith.subf %424, %433 : vector<16x128xf32>
    %435 = arith.mulf %434, %434 : vector<16x128xf32>
    %cst_199 = arith.constant dense<0.000000e+00> : vector<16xf32>
    %436 = vector.multi_reduction <add>, %435, %cst_199 [1] : vector<16x128xf32> to vector<16xf32>
    %437 = vector.shape_cast %436 : vector<16xf32> to vector<16x1xf32>
    %cst_200 = arith.constant 1.280000e+02 : f32
    %438 = vector.broadcast %cst_200 : f32 to vector<16x1xf32>
    %439 = arith.divf %437, %438 : vector<16x1xf32>
    %440 = vector.broadcast %432 : vector<16x1xf32> to vector<16x128xf32>
    %441 = arith.subf %424, %440 : vector<16x128xf32>
    %cst_201 = arith.constant 9.99999974E-6 : f32
    %442 = vector.broadcast %cst_201 : f32 to vector<16x1xf32>
    %443 = arith.addf %439, %442 : vector<16x1xf32>
    %444 = math.rsqrt %443 : vector<16x1xf32>
    %445 = vector.broadcast %444 : vector<16x1xf32> to vector<16x128xf32>
    %446 = arith.mulf %441, %445 : vector<16x128xf32>
    %447 = vector.broadcast %426 : vector<1x128xf32> to vector<16x128xf32>
    %448 = arith.mulf %446, %447 : vector<16x128xf32>
    %449 = vector.broadcast %428 : vector<1x128xf32> to vector<16x128xf32>
    %450 = arith.addf %448, %449 : vector<16x128xf32>
    %451 = vector.shape_cast %450 : vector<16x128xf32> to vector<2x8x128xf32>
    %c0_202 = arith.constant 0 : index
    %c0_203 = arith.constant 0 : index
    %c0_204 = arith.constant 0 : index
    %452 = vector.load %arg17[%c0_202, %c0_203, %c0_204] : memref<2x8x128xf32, #tpu.memory_space<vmem>>, vector<2x8x128xf32>
    tpu.vector_store %arg17[%c0_202, %c0_203, %c0_204], %451 {strides = array<i32>} : memref<2x8x128xf32, #tpu.memory_space<vmem>>, vector<2x8x128xf32>,
    return
  }
  func.func @transform_0(%arg0: i32) -> (i32, i32, i32) {
    %c0_i32 = arith.constant 0 : i32
    %c0_i32_0 = arith.constant 0 : i32
    %c0_i32_1 = arith.constant 0 : i32
    return %arg0, %c0_i32, %c0_i32_0 : i32, i32, i32
  }
  func.func @transform_1(%arg0: i32) -> (i32, i32) {
    %c0_i32 = arith.constant 0 : i32
    %c0_i32_0 = arith.constant 0 : i32
    %c0_i32_1 = arith.constant 0 : i32
    return %c0_i32, %c0_i32_0 : i32, i32
  }
  func.func @transform_2(%arg0: i32) -> (i32, i32) {
    %c0_i32 = arith.constant 0 : i32
    %c0_i32_0 = arith.constant 0 : i32
    %c0_i32_1 = arith.constant 0 : i32
    return %c0_i32, %c0_i32_0 : i32, i32
  }
  func.func @transform_3(%arg0: i32) -> (i32, i32) {
    %c0_i32 = arith.constant 0 : i32
    %c0_i32_0 = arith.constant 0 : i32
    %c0_i32_1 = arith.constant 0 : i32
    return %c0_i32, %c0_i32_0 : i32, i32
  }
  func.func @transform_4(%arg0: i32) -> (i32, i32, i32) {
    %c0_i32 = arith.constant 0 : i32
    %c0_i32_0 = arith.constant 0 : i32
    %c0_i32_1 = arith.constant 0 : i32
    %c0_i32_2 = arith.constant 0 : i32
    return %c0_i32, %c0_i32_0, %c0_i32_1 : i32, i32, i32
  }
  func.func @transform_5(%arg0: i32) -> (i32, i32, i32) {
    %c0_i32 = arith.constant 0 : i32
    %c0_i32_0 = arith.constant 0 : i32
    %c0_i32_1 = arith.constant 0 : i32
    %c0_i32_2 = arith.constant 0 : i32
    return %c0_i32, %c0_i32_0, %c0_i32_1 : i32, i32, i32
  }
  func.func @transform_6(%arg0: i32) -> (i32, i32, i32) {
    %c0_i32 = arith.constant 0 : i32
    %c0_i32_0 = arith.constant 0 : i32
    %c0_i32_1 = arith.constant 0 : i32
    %c0_i32_2 = arith.constant 0 : i32
    return %c0_i32, %c0_i32_0, %c0_i32_1 : i32, i32, i32
  }
  func.func @transform_7(%arg0: i32) -> (i32, i32, i32) {
    %c0_i32 = arith.constant 0 : i32
    %c0_i32_0 = arith.constant 0 : i32
    %c0_i32_1 = arith.constant 0 : i32
    %c0_i32_2 = arith.constant 0 : i32
    return %c0_i32, %c0_i32_0, %c0_i32_1 : i32, i32, i32
  }
  func.func @transform_8(%arg0: i32) -> (i32, i32, i32) {
    %c0_i32 = arith.constant 0 : i32
    %c0_i32_0 = arith.constant 0 : i32
    %c0_i32_1 = arith.constant 0 : i32
    %c0_i32_2 = arith.constant 0 : i32
    return %c0_i32, %c0_i32_0, %c0_i32_1 : i32, i32, i32
  }
  func.func @transform_9(%arg0: i32) -> (i32, i32, i32) {
    %c0_i32 = arith.constant 0 : i32
    %c0_i32_0 = arith.constant 0 : i32
    %c0_i32_1 = arith.constant 0 : i32
    %c0_i32_2 = arith.constant 0 : i32
    return %c0_i32, %c0_i32_0, %c0_i32_1 : i32, i32, i32
  }
  func.func @transform_10(%arg0: i32) -> (i32, i32, i32) {
    %c0_i32 = arith.constant 0 : i32
    %c0_i32_0 = arith.constant 0 : i32
    %c0_i32_1 = arith.constant 0 : i32
    %c0_i32_2 = arith.constant 0 : i32
    return %c0_i32, %c0_i32_0, %c0_i32_1 : i32, i32, i32
  }
  func.func @transform_11(%arg0: i32) -> (i32, i32, i32) {
    %c0_i32 = arith.constant 0 : i32
    %c0_i32_0 = arith.constant 0 : i32
    %c0_i32_1 = arith.constant 0 : i32
    %c0_i32_2 = arith.constant 0 : i32
    return %c0_i32, %c0_i32_0, %c0_i32_1 : i32, i32, i32
  }
  func.func @transform_12(%arg0: i32) -> (i32, i32, i32) {
    %c0_i32 = arith.constant 0 : i32
    %c0_i32_0 = arith.constant 0 : i32
    %c0_i32_1 = arith.constant 0 : i32
    %c0_i32_2 = arith.constant 0 : i32
    return %c0_i32, %c0_i32_0, %c0_i32_1 : i32, i32, i32
  }
  func.func @transform_13(%arg0: i32) -> (i32, i32, i32) {
    %c0_i32 = arith.constant 0 : i32
    %c0_i32_0 = arith.constant 0 : i32
    %c0_i32_1 = arith.constant 0 : i32
    %c0_i32_2 = arith.constant 0 : i32
    return %c0_i32, %c0_i32_0, %c0_i32_1 : i32, i32, i32
  }
  func.func @transform_14(%arg0: i32) -> (i32, i32, i32) {
    %c0_i32 = arith.constant 0 : i32
    %c0_i32_0 = arith.constant 0 : i32
    %c0_i32_1 = arith.constant 0 : i32
    %c0_i32_2 = arith.constant 0 : i32
    return %c0_i32, %c0_i32_0, %c0_i32_1 : i32, i32, i32
  }
  func.func @transform_15(%arg0: i32) -> (i32, i32, i32) {
    %c0_i32 = arith.constant 0 : i32
    %c0_i32_0 = arith.constant 0 : i32
    %c0_i32_1 = arith.constant 0 : i32
    %c0_i32_2 = arith.constant 0 : i32
    return %c0_i32, %c0_i32_0, %c0_i32_1 : i32, i32, i32
  }
  func.func @transform_16(%arg0: i32) -> (i32, i32, i32) {
    %c0_i32 = arith.constant 0 : i32
    %c0_i32_0 = arith.constant 0 : i32
    %c0_i32_1 = arith.constant 0 : i32
    return %arg0, %c0_i32, %c0_i32_0 : i32, i32, i32
  }
}

</mosaic_0001>

<bundles_post_ra>
// kernel: transformer_forward.1
= control target key start
LH: loop header
LB: loop body
LE: loop exit
PB: predicated region body
PF: predicated region fallthrough
CT: control target
= control target key end

     0   :  { %s9610_s0 = inlined_call_operand.hbm [shape: f32[2,8,16], index: 0, kind: input, shape index: {}]   ;;  %s9611_s1 = inlined_call_operand.hbm [shape: f32[8,128], index: 1, kind: input, shape index: {}]   ;;  %s9612_s2 = inlined_call_operand.vmem [shape: f32[16,128], index: 2, kind: input, shape index: {}]   ;;  %s9613_s3 = inlined_call_operand.hbm [shape: f32[1,128], index: 3, kind: input, shape index: {}]   ;;  %s9614_s4 = inlined_call_operand.hbm [shape: f32[2,128,384], index: 4, kind: input, shape index: {}]   ;;  %s9615_s5 = inlined_call_operand.vmem [shape: f32[2,1,384], index: 5, kind: input, shape index: {}]   ;;  %s9616_s6 = inlined_call_operand.hbm [shape: f32[2,128,128], index: 6, kind: input, shape index: {}]   ;;  %s9617_s7 = inlined_call_operand.vmem [shape: f32[2,1,128], index: 7, kind: input, shape index: {}]   ;;  %s9618_s8 = inlined_call_operand.hbm [shape: f32[2,128,256], index: 8, kind: input, shape index: {}]   ;;  %s9619_s9 = inlined_call_operand.vmem [shape: f32[2,1,256], index: 9, kind: input, shape index: {}]   ;;  %s9620_s10 = inlined_call_operand.hbm [shape: f32[2,256,128], index: 10, kind: input, shape index: {}]   ;;  %s9621_s11 = inlined_call_operand.vmem [shape: f32[2,1,128], index: 11, kind: input, shape index: {}]   ;;  %s9622_s12 = inlined_call_operand.vmem [shape: f32[2,1,128], index: 12, kind: input, shape index: {}]   ;;  %s9623_s13 = inlined_call_operand.hbm [shape: f32[2,1,128], index: 13, kind: input, shape index: {}]   ;;  %s9624_s14 = inlined_call_operand.vmem [shape: f32[2,1,128], index: 14, kind: input, shape index: {}]   ;;  %s9625_s15 = inlined_call_operand.hbm [shape: f32[2,1,128], index: 15, kind: input, shape index: {}]   ;;  %s9626_s16 = inlined_call_operand.vmem [shape: f32[2,8,128], index: 16, kind: output, shape index: {}]  }
   0x1   :  { %9628 = sst [smem:[#allocation22_spill]] %s9610_s0 }
   0x2   :  { %21 = vsyncpa [#allocation4], 0 }
   0x3   :  { %22 = vsyncpa [#allocation6], 0 }
   0x4   :  { %23 = vsyncpa [#allocation9], 0 }
   0x5   :  { %24 = vsyncpa [#allocation12], 0 }
   0x6   :  { %25 = vsyncpa [#allocation15], 0  ;;  %s8551_s21 = smov [#allocation5]   ;;  %s8552_s23 = smov [#allocation8]  }
   0x7   :  { %s44_s22 = sshll.u32 %s8551_s21, 4  ;;  %s65_s24 = sshll.u32 %s8552_s23, 4  ;;  %s45_s22 = int_to_ptr.vmem [resolvable:$true] %s44_s22  ;;  %s8660_s24 = int_to_ptr.vmem [resolvable:$true] %s65_s24 }
   0x8   :  { %s8343_s27 = scalar_lea.hbm %s9611_s1, 128 }
   0x9   :  { %p8344_p0 = scmp.ne.s32.totalorder %s9611_s1, %s8343_s27  ;;  %p8347_p1 = scmp.lt.u32.totalorder %s8343_s27, %s9611_s1 }
   0xb   :  { %p8349_p2 = pnand %p8347_p1, %p8344_p0 }
   0xd   :  { %8352 = shalt.err (!%p8349_p2)
}
   0xe   :  { %s8353_s17 = scalar_lea.vmem %s45_s22, 128  ;;  %p8358_p4 = scmp.lt.s32.totalorder %s45_s22, %s45_s22 }
   0xf   :  { %p8354_p3 = scmp.ne.s32.totalorder %s45_s22, %s8353_s17  ;;  %p8359_p5 = scmp.lt.s32.totalorder %s8353_s17, %s8353_s17 }
  0x11   :  { %p8360_p6 = por %p8359_p5, %p8358_p4 }
  0x13   :  { %p8361_p7 = pnand %p8360_p6, %p8354_p3 }
  0x15   :  { %8364 = shalt.err (!%p8361_p7)
}
  0x16   :  { %47 = dma.hbm_to_vmem [thread:$0]  %s9611_s1, 128, %s45_s22, [#allocation6]  }
  0x17   :  { %s8365_s23 = scalar_lea.hbm %s9614_s4, 12288 }
  0x18   :  { %p8366_p8 = scmp.ne.s32.totalorder %s9614_s4, %s8365_s23  ;;  %p8369_p9 = scmp.lt.u32.totalorder %s8365_s23, %s9614_s4 }
  0x1a   :  { %p8371_p10 = pnand %p8369_p9, %p8366_p8 }
  0x1c   :  { %8374 = shalt.err (!%p8371_p10)
}
  0x1d   :  { %s8375_s29 = scalar_lea.vmem %s8660_s24, 12288  ;;  %p8380_p12 = scmp.lt.s32.totalorder %s8660_s24, %s8660_s24 }
  0x1e   :  { %p8376_p11 = scmp.ne.s32.totalorder %s8660_s24, %s8375_s29  ;;  %p8381_p13 = scmp.lt.s32.totalorder %s8375_s29, %s8375_s29 }
  0x20   :  { %p8382_p0 = por %p8381_p13, %p8380_p12 }
  0x22   :  { %p8383_p1 = pnand %p8382_p0, %p8376_p11 }
  0x24   :  { %8386 = shalt.err (!%p8383_p1)
}
  0x25   :  { %s8553_s1 = smov 384   ;;  %s8554_s22 = smov 24  }
  0x26   :  { %71 = dma.hbm_to_vmem [thread:$0]  %s9614_s4, 12288, %s8660_s24, [#allocation9], %s8553_s1, %s8553_s1, %s8554_s22  }
  0x27   :  { %s8555_s17 = smov [#allocation11]   ;;  %s8387_s21 = scalar_lea.hbm %s9618_s8, 8192 }
  0x28   :  { %s93_s18 = sshll.u32 %s8555_s17, 4  ;;  %p8388_p2 = scmp.ne.s32.totalorder %s9618_s8, %s8387_s21  ;;  %s94_s18 = int_to_ptr.vmem [resolvable:$true] %s93_s18 }
  0x29   :  { %p8391_p3 = scmp.lt.u32.totalorder %s8387_s21, %s9618_s8 }
  0x2b   :  { %p8393_p4 = pnand %p8391_p3, %p8388_p2 }
  0x2d   :  { %8396 = shalt.err (!%p8393_p4)
}
  0x2e   :  { %s8397_s28 = scalar_lea.vmem %s94_s18, 8192  ;;  %p8402_p6 = scmp.lt.s32.totalorder %s94_s18, %s94_s18 }
  0x2f   :  { %p8398_p5 = scmp.ne.s32.totalorder %s94_s18, %s8397_s28  ;;  %p8403_p7 = scmp.lt.s32.totalorder %s8397_s28, %s8397_s28 }
  0x31   :  { %p8404_p8 = por %p8403_p7, %p8402_p6 }
  0x33   :  { %p8405_p9 = pnand %p8404_p8, %p8398_p5 }
  0x35   :  { %8408 = shalt.err (!%p8405_p9)
}
  0x36   :  { %s8556_s4 = smov 256   ;;  %s8557_s24 = smov 16  }
  0x37   :  { %99 = dma.hbm_to_vmem [thread:$0]  %s9618_s8, 8192, %s94_s18, [#allocation12], %s8556_s4, %s8556_s4, %s8557_s24  }
  0x38   :  { %s8558_s22 = smov [#allocation14]   ;;  %s8409_s19 = scalar_lea.hbm %s9623_s13, 32 }
  0x39   :  { %s123_s30 = sshll.u32 %s8558_s22, 4  ;;  %p8410_p10 = scmp.ne.s32.totalorder %s9623_s13, %s8409_s19  ;;  %s124_s30 = int_to_ptr.vmem [resolvable:$true] %s123_s30 }
  0x3a   :  { %p8413_p11 = scmp.lt.u32.totalorder %s8409_s19, %s9623_s13 }
  0x3c   :  { %p8415_p12 = pnand %p8413_p11, %p8410_p10 }
  0x3e   :  { %8418 = shalt.err (!%p8415_p12)
}
  0x3f   :  { %s8419_s26 = scalar_lea.vmem %s124_s30, 32  ;;  %p8424_p0 = scmp.lt.s32.totalorder %s124_s30, %s124_s30 }
  0x40   :  { %p8420_p13 = scmp.ne.s32.totalorder %s124_s30, %s8419_s26  ;;  %p8425_p1 = scmp.lt.s32.totalorder %s8419_s26, %s8419_s26 }
  0x42   :  { %p8426_p2 = por %p8425_p1, %p8424_p0 }
  0x44   :  { %p8427_p3 = pnand %p8426_p2, %p8420_p13 }
  0x46   :  { %8430 = shalt.err (!%p8427_p3)
}
  0x47   :  { %s8559_s8 = smov 1   ;;  %s8560_s28 = smov [#allocation3]  }
  0x48   :  { %129 = dma.hbm_to_vmem [thread:$0]  %s9623_s13, 32, %s124_s30, [#allocation15], %s8557_s24, %s8557_s24, %s8559_s8  }
  0x49   :  { %s31_s4 = sshll.u32 %s8560_s28, 4  ;;  %s9629_s22 = sld [smem:[#allocation22_spill]]  ;;  %s32_s4 = int_to_ptr.vmem [resolvable:$true] %s31_s4 }
  0x4f   :  { %s8431_s0 = scalar_lea.hbm %s9629_s22, 256 }
  0x50   :  { %p8432_p4 = scmp.ne.s32.totalorder %s9629_s22, %s8431_s0  ;;  %p8435_p5 = scmp.lt.u32.totalorder %s8431_s0, %s9629_s22 }
  0x52   :  { %p8437_p6 = pnand %p8435_p5, %p8432_p4 }
  0x54   :  { %8440 = shalt.err (!%p8437_p6)
}
  0x55   :  { %s8441_s23 = scalar_lea.vmem %s32_s4, 256  ;;  %p8446_p8 = scmp.lt.s32.totalorder %s32_s4, %s32_s4 }
  0x56   :  { %p8442_p7 = scmp.ne.s32.totalorder %s32_s4, %s8441_s23  ;;  %p8447_p9 = scmp.lt.s32.totalorder %s8441_s23, %s8441_s23 }
  0x58   :  { %p8448_p10 = por %p8447_p9, %p8446_p8 }
  0x5a   :  { %p8449_p11 = pnand %p8448_p10, %p8442_p7 }
  0x5c   :  { %8452 = shalt.err (!%p8449_p11)
}
  0x5d   :  { %s8561_s13 = smov 128   ;;  %s8562_s30 = smov 8  }
  0x5e   :  { %37 = dma.hbm_to_vmem [thread:$0]  %s9629_s22, 256, %s32_s4, [#allocation4], %s8561_s13, %s8561_s13, %s8562_s30  }
  0x5f   :  { %s8563_s18 = smov [#allocation7]   ;;  %s8564_s28 = smov [#allocation10]  }
  0x60   :  { %s56_s27 = sshll.u32 %s8563_s18, 4  ;;  %s79_s29 = sshll.u32 %s8564_s28, 4  ;;  %s57_s27 = int_to_ptr.vmem [resolvable:$true] %s56_s27  ;;  %s8734_s29 = int_to_ptr.vmem [resolvable:$true] %s79_s29 }
  0x61   :  { %s8453_s17 = scalar_lea.hbm %s9613_s3, 16 }
  0x62   :  { %p8454_p12 = scmp.ne.s32.totalorder %s9613_s3, %s8453_s17  ;;  %p8457_p13 = scmp.lt.u32.totalorder %s8453_s17, %s9613_s3 }
  0x64   :  { %p8459_p0 = pnand %p8457_p13, %p8454_p12 }
  0x66   :  { %8462 = shalt.err (!%p8459_p0)
}
  0x67   :  { %s8463_s4 = scalar_lea.vmem %s57_s27, 16  ;;  %s8467_s22 = scalar_lea.vmem %s57_s27, 32 }
  0x68   :  { %p8464_p1 = scmp.ne.s32.totalorder %s57_s27, %s8463_s4  ;;  %p8468_p2 = scmp.lt.s32.totalorder %s57_s27, %s57_s27 }
  0x69   :  { %p8469_p3 = scmp.lt.s32.totalorder %s8467_s22, %s8463_s4 }
  0x6b   :  { %p8470_p4 = por %p8469_p3, %p8468_p2 }
  0x6d   :  { %p8471_p5 = pnand %p8470_p4, %p8464_p1 }
  0x6f   :  { %8474 = shalt.err (!%p8471_p5)
}
  0x70   :  { %59 = dma.hbm_to_vmem [thread:$0]  %s9613_s3, 16, %s57_s27, [#allocation6]  }
  0x71   :  { %s8475_s1 = scalar_lea.hbm %s9616_s6, 4096 }
  0x72   :  { %p8476_p6 = scmp.ne.s32.totalorder %s9616_s6, %s8475_s1  ;;  %p8479_p7 = scmp.lt.u32.totalorder %s8475_s1, %s9616_s6 }
  0x74   :  { %p8481_p8 = pnand %p8479_p7, %p8476_p6 }
  0x76   :  { %8484 = shalt.err (!%p8481_p8)
}
  0x77   :  { %s8485_s21 = scalar_lea.vmem %s8734_s29, 4096  ;;  %p8490_p10 = scmp.lt.s32.totalorder %s8734_s29, %s8734_s29 }
  0x78   :  { %p8486_p9 = scmp.ne.s32.totalorder %s8734_s29, %s8485_s21  ;;  %p8491_p11 = scmp.lt.s32.totalorder %s8485_s21, %s8485_s21 }
  0x7a   :  { %p8492_p12 = por %p8491_p11, %p8490_p10 }
  0x7c   :  { %p8493_p13 = pnand %p8492_p12, %p8486_p9 }
  0x7e   :  { %8496 = shalt.err (!%p8493_p13)
}
  0x7f   :  { %85 = dma.hbm_to_vmem [thread:$0]  %s9616_s6, 4096, %s8734_s29, [#allocation9], %s8561_s13, %s8561_s13, %s8562_s30  }
  0x80   :  { %s8565_s23 = smov [#allocation13]   ;;  %s8566_s22 = smov [#allocation16]  }
  0x81   :  { %s107_s4 = sshll.u32 %s8565_s23, 4  ;;  %s137_s25 = sshll.u32 %s8566_s22, 4  ;;  %s108_s4 = int_to_ptr.vmem [resolvable:$true] %s107_s4  ;;  %s8768_s25 = int_to_ptr.vmem [resolvable:$true] %s137_s25 }
  0x82   :  { %s8497_s28 = scalar_lea.hbm %s9620_s10, 8192 }
  0x83   :  { %p8498_p0 = scmp.ne.s32.totalorder %s9620_s10, %s8497_s28  ;;  %p8501_p1 = scmp.lt.u32.totalorder %s8497_s28, %s9620_s10 }
  0x85   :  { %p8503_p2 = pnand %p8501_p1, %p8498_p0 }
  0x87   :  { %8506 = shalt.err (!%p8503_p2)
}
  0x88   :  { %s8507_s6 = scalar_lea.vmem %s108_s4, 8192  ;;  %p8512_p4 = scmp.lt.s32.totalorder %s108_s4, %s108_s4 }
  0x89   :  { %p8508_p3 = scmp.ne.s32.totalorder %s108_s4, %s8507_s6  ;;  %p8513_p5 = scmp.lt.s32.totalorder %s8507_s6, %s8507_s6 }
  0x8b   :  { %p8514_p6 = por %p8513_p5, %p8512_p4 }
  0x8d   :  { %p8515_p7 = pnand %p8514_p6, %p8508_p3 }
  0x8f   :  { %8518 = shalt.err (!%p8515_p7)
}
  0x90   :  { %113 = dma.hbm_to_vmem [thread:$0]  %s9620_s10, 8192, %s108_s4, [#allocation12], %s8561_s13, %s8561_s13, %s8562_s30  }
  0x91   :  { %s8519_s27 = scalar_lea.hbm %s9625_s15, 32 }
  0x92   :  { %p8520_p8 = scmp.ne.s32.totalorder %s9625_s15, %s8519_s27  ;;  %p8523_p9 = scmp.lt.u32.totalorder %s8519_s27, %s9625_s15 }
  0x94   :  { %p8525_p10 = pnand %p8523_p9, %p8520_p8 }
  0x96   :  { %8528 = shalt.err (!%p8525_p10)
}
  0x97   :  { %s8529_s28 = scalar_lea.vmem %s8768_s25, 32  ;;  %p8534_p12 = scmp.lt.s32.totalorder %s8768_s25, %s8768_s25 }
  0x98   :  { %p8530_p11 = scmp.ne.s32.totalorder %s8768_s25, %s8529_s28  ;;  %p8535_p13 = scmp.lt.s32.totalorder %s8529_s28, %s8529_s28 }
  0x9a   :  { %p8536_p0 = por %p8535_p13, %p8534_p12 }
  0x9c   :  { %p8537_p1 = pnand %p8536_p0, %p8530_p11 }
  0x9e   :  { %8540 = shalt.err (!%p8537_p1)
}
  0x9f   :  { %143 = dma.hbm_to_vmem [thread:$0]  %s9625_s15, 32, %s8768_s25, [#allocation15], %s8557_s24, %s8557_s24, %s8559_s8  }
  0xa0   :  { %8541 = dma.done.wait [#allocation4], 256  }
  0xa1   :  { %8542 = vsyncadd [#allocation4], 4294967040 }
  0xa2   :  { %8543 = dma.done.wait [#allocation6], 144  }
  0xa3   :  { %8544 = vsyncadd [#allocation6], 4294967152 }
  0xa4   :  { %8545 = dma.done.wait [#allocation9], 16384  }
  0xa5   :  { %8546 = vsyncadd [#allocation9], 4294950912 }
  0xa6   :  { %8547 = dma.done.wait [#allocation12], 16384  }
  0xa7   :  { %8548 = vsyncadd [#allocation12], 4294950912 }
  0xa8   :  { %8549 = dma.done.wait [#allocation15], 64  }
  0xa9   :  { %8550 = vsyncadd [#allocation15], 4294967232  ;;  %vm182_vm0 = vcmask 130048   ;;  %v173_v0 = vld [vmem:[%s9612_s2] sm:$0xff]  ;;  %v174_v1 = vld [vmem:[%s9612_s2 + $0x8] sm:$0xff]  ;;  %vm8568_vm1 = vmmov 0  }
  0xaa   :  { %v171_v2 = vld [vmem:[#allocation3] sm:$0xff]  ;;  %v7851_v3 = vpack.c.bf16 %v174_v1, %v173_v0  ;;  %v172_v6 = vld [vmem:[#allocation3 + $0x8] sm:$0xff]  ;;  %v270_v9 = vld [vmem:[#allocation8 + $0x18] sm:$0xff]  ;;  %s8569_s8 = smov 112   ;;  %vm636_vm2 = vcmask 64512   ;;  %s8570_s25 = smov 96  }
  0xab   :  { %7388 = vmatprep.mubr.msk.f32.mxu0 %vm182_vm0, %v171_v2  ;;  %v268_v4 = vld [vmem:[#allocation8 + $0x8] sm:$0xff]  ;;  %v271_v5 = vld [vmem:[#allocation8 + $0x20] sm:$0xff]  ;;  %v269_v10 = vld [vmem:[#allocation8 + $0x10] sm:$0xff]  ;;  %s8571_s17 = smov 80   ;;  %s8572_s19 = smov 64   ;;  %vm1147_vm3 = vcmask 261248  }
  0xac   :  { %v7855_v7 = vpack.c.bf16 %v271_v5, %v268_v4  ;;  %v267_v8 = vld [vmem:[#allocation8] sm:$0xff]  ;;  %7852 = vmatprep.subr.bf16.mxu0 %v7851_v3  ;;  %v272_v12 = vld [vmem:[#allocation8 + $0x28] sm:$0xff]  ;;  %v274_v13 = vld [vmem:[#allocation8 + $0x38] sm:$0xff]  ;;  %s8573_s6 = smov 48   ;;  %s8574_s29 = smov 32   ;;  %vm1488_vm4 = vcmask 392448  }
  0xad   :  { %v7857_v11 = vpack.c.bf16 %v270_v9, %v267_v8  ;;  %v277_v14 = vld [vmem:[#allocation8 + $0x50] sm:$0xff]  ;;  %7854 = vmatpush3.bf16.msra.mxu0 %v7851_v3  ;;  %v7887_v15 = vpack.c.bf16 %v272_v12, %v269_v10  ;;  %v276_v18 = vld [vmem:[#allocation8 + $0x48] sm:$0xff]  ;;  %v275_v19 = vld [vmem:[#allocation8 + $0x40] sm:$0xff]  ;;  %vm1829_vm5 = vcmask 523648   ;;  %vm2170_vm6 = vcmask 654848  }
  0xae   :  { %7856 = vmatprep.subr.bf16.mxu1 %v7855_v7  ;;  %v7859_v16 = vpack.c.bf16 %v277_v14, %v274_v13  ;;  %v273_v17 = vld [vmem:[#allocation8 + $0x30] sm:$0xff]  ;;  %v278_v21 = vld [vmem:[#allocation8 + $0x58] sm:$0xff]  ;;  %v280_v22 = vld [vmem:[#allocation8 + $0x68] sm:$0xff]  ;;  %v8567_v13 = vmov 0.0   ;;  %vm2511_vm7 = vcmask 786048   ;;  %vm2852_vm8 = vcmask 917248  }
  0xaf   :  { %7858 = vmatpush1.bf16.msra.mxu1 %v7857_v11  ;;  %v7861_v20 = vpack.c.bf16 %v276_v18, %v273_v17  ;;  %v283_v23 = vld [vmem:[#allocation8 + $0x80] sm:$0xff]  ;;  %7888 = vmatprep.subr.bf16.mxu0 %v7887_v15  ;;  %v7891_v24 = vpack.c.bf16 %v278_v21, %v275_v19  ;;  %v282_v27 = vld [vmem:[#allocation8 + $0x78] sm:$0xff]  ;;  %v281_v28 = vld [vmem:[#allocation8 + $0x70] sm:$0xff]  ;;  %vm3193_vm9 = vcmask 1048448  }
  0xb0   :  { %7860 = vmatprep.subr.bf16.mxu1 %v7859_v16  ;;  %v7863_v25 = vpack.c.bf16 %v283_v23, %v280_v22  ;;  %v279_v26 = vld [vmem:[#allocation8 + $0x60] sm:$0xff]  ;;  %7389 = vmatmul.mubr.msk.f32.vlgmr.msra.gmra.mrb[0].mxu0 %vm182_vm0, %v172_v6  ;;  %v284_v29 = vld [vmem:[#allocation8 + $0x88] sm:$0xff]  ;;  %v286_v30 = vld [vmem:[#allocation8 + $0x98] sm:$0xff]  ;;  %v317_v22 = vlaneseq }
  0xb1   :  { %v289_v31 = vld [vmem:[#allocation8 + $0xb0] sm:$0xff]  ;;  %7890 = vmatpush3.bf16.msra.mxu0 %v7887_v15  ;;  %v7865_v32 = vpack.c.bf16 %v282_v27, %v279_v26  ;;  %v7895_v33 = vpack.c.bf16 %v284_v29, %v281_v28  ;;  %v288_v36 = vld [vmem:[#allocation8 + $0xa8] sm:$0xff]  ;;  %v287_v37 = vld [vmem:[#allocation8 + $0xa0] sm:$0xff]  ;;  %396 = vmatprep.mubr.f32.mxu1 %v8567_v13 }
  0xb2   :  { %7892 = vmatprep.subr.bf16.mxu0 %v7891_v24  ;;  %v285_v34 = vld [vmem:[#allocation8 + $0x90] sm:$0xff]  ;;  %v7867_v35 = vpack.c.bf16 %v289_v31, %v286_v30  ;;  %v290_v38 = vld [vmem:[#allocation8 + $0xb8] sm:$0xff]  ;;  %v292_v39 = vld [vmem:[#allocation8 + $0xc8] sm:$0xff]  ;;  %v8829_v23 = vshrl.u32 %v317_v22, 7 }
  0xb3   :  { %7862 = vmatpush1.bf16.msra.mxu1 %v7861_v20  ;;  %v295_v40 = vld [vmem:[#allocation8 + $0xe0] sm:$0xff]  ;;  %v7869_v41 = vpack.c.bf16 %v288_v36, %v285_v34  ;;  %v7899_v42 = vpack.c.bf16 %v290_v38, %v287_v37  ;;  %v294_v45 = vld [vmem:[#allocation8 + $0xd8] sm:$0xff]  ;;  %v293_v46 = vld [vmem:[#allocation8 + $0xd0] sm:$0xff] }
  0xb4   :  { %7864 = vmatprep.subr.bf16.mxu1 %v7863_v25  ;;  %v291_v43 = vld [vmem:[#allocation8 + $0xc0] sm:$0xff]  ;;  %v7871_v44 = vpack.c.bf16 %v295_v40, %v292_v39  ;;  %v296_v47 = vld [vmem:[#allocation8 + $0xe8] sm:$0xff]  ;;  %v298_v48 = vld [vmem:[#allocation8 + $0xf8] sm:$0xff]  ;;  %v8838_v26 = vsub.s32 1, %v8829_v23  ;;  %v327_v27 = vsub.s32 2, %v8829_v23 }
  0xb5   :  { %7894 = vmatpush3.bf16.msra.mxu0 %v7891_v24  ;;  %v301_v49 = vld [vmem:[#allocation8 + $0x110] sm:$0xff]  ;;  %v7873_v50 = vpack.c.bf16 %v294_v45, %v291_v43  ;;  %v7903_v51 = vpack.c.bf16 %v296_v47, %v293_v46  ;;  %v300_v54 = vld [vmem:[#allocation8 + $0x108] sm:$0xff]  ;;  %v299_v55 = vld [vmem:[#allocation8 + $0x100] sm:$0xff]  ;;  %v8832_v24 = vsub.s32 0, %v8829_v23 }
  0xb6   :  { %7896 = vmatprep.subr.bf16.mxu0 %v7895_v33  ;;  %v297_v52 = vld [vmem:[#allocation8 + $0xf0] sm:$0xff]  ;;  %v7875_v53 = vpack.c.bf16 %v301_v49, %v298_v48  ;;  %v302_v56 = vld [vmem:[#allocation8 + $0x118] sm:$0xff]  ;;  %v304_v57 = vld [vmem:[#allocation8 + $0x128] sm:$0xff] }
  0xb7   :  { %7866 = vmatpush1.bf16.msra.mxu1 %v7865_v32  ;;  %v307_v58 = vld [vmem:[#allocation8 + $0x140] sm:$0xff]  ;;  %v7877_v59 = vpack.c.bf16 %v300_v54, %v297_v52  ;;  %v7907_v60 = vpack.c.bf16 %v302_v56, %v299_v55  ;;  %v306_v63 = vld [vmem:[#allocation8 + $0x138] sm:$0xff]  ;;  %v305_v0 = vld [vmem:[#allocation8 + $0x130] sm:$0xff] }
  0xb8   :  { %7868 = vmatprep.subr.bf16.mxu1 %v7867_v35  ;;  %v303_v61 = vld [vmem:[#allocation8 + $0x120] sm:$0xff]  ;;  %v7879_v62 = vpack.c.bf16 %v307_v58, %v304_v57  ;;  %v308_v1 = vld [vmem:[#allocation8 + $0x148] sm:$0xff]  ;;  %v310_v4 = vld [vmem:[#allocation8 + $0x158] sm:$0xff] }
  0xb9   :  { %7898 = vmatpush3.bf16.msra.mxu0 %v7895_v33  ;;  %v7881_v2 = vpack.c.bf16 %v306_v63, %v303_v61  ;;  %v7911_v3 = vpack.c.bf16 %v308_v1, %v305_v0  ;;  %v313_v5 = vld [vmem:[#allocation8 + $0x170] sm:$0xff]  ;;  %v312_v8 = vld [vmem:[#allocation8 + $0x168] sm:$0xff]  ;;  %v311_v10 = vld [vmem:[#allocation8 + $0x160] sm:$0xff] }
  0xba   :  { %7900 = vmatprep.subr.bf16.mxu0 %v7899_v42  ;;  %v7883_v6 = vpack.c.bf16 %v313_v5, %v310_v4  ;;  %v309_v7 = vld [vmem:[#allocation8 + $0x150] sm:$0xff]  ;;  %v314_v11 = vld [vmem:[#allocation8 + $0x178] sm:$0xff] }
  0xbb   :  { %7870 = vmatpush1.bf16.msra.mxu1 %v7869_v41  ;;  %v7885_v9 = vpack.c.bf16 %v312_v8, %v309_v7  ;;  %v7915_v12 = vpack.c.bf16 %v314_v11, %v311_v10  ;;  %v6987_v14 = vld [vmem:[#allocation7] ss:$0 sm:$0xff]  ;;  %v264_v17 = vld [vmem:[#allocation5] sm:$0xff] }
  0xbc   :  { %7872 = vmatprep.subr.bf16.mxu1 %v7871_v44  ;;  %v315_v25 = vld [vmem:[%s9615_s5] sm:$0x7] }
  0xbd   :  { %7902 = vmatpush3.bf16.msra.mxu0 %v7899_v42  ;;  %v320_v28 = vrot.slane %v315_v25, %v8832_v24  ;;  %v324_v29 = vrot.slane %v315_v25, %v8838_v26  ;;  %v328_v30 = vrot.slane %v315_v25, %v327_v27 }
  0xbe   :  { %7904 = vmatprep.subr.bf16.mxu0 %v7903_v51 }
  0xbf   :  { %7874 = vmatpush1.bf16.msra.mxu1 %v7873_v50 }
  0xc0   :  { %7876 = vmatprep.subr.bf16.mxu1 %v7875_v53 }
  0xc1   :  { %7906 = vmatpush3.bf16.msra.mxu0 %v7903_v51 }
  0xc2   :  { %7908 = vmatprep.subr.bf16.mxu0 %v7907_v60 }
  0xc3   :  { %7878 = vmatpush1.bf16.msra.mxu1 %v7877_v59 }
  0xc4   :  { %7880 = vmatprep.subr.bf16.mxu1 %v7879_v62 }
  0xc5   :  { %7910 = vmatpush3.bf16.msra.mxu0 %v7907_v60 }
  0xc6   :  { %7912 = vmatprep.subr.bf16.mxu0 %v7911_v3 }
  0xc7   :  { %7882 = vmatpush1.bf16.msra.mxu1 %v7881_v2 }
  0xc8   :  { %7884 = vmatprep.subr.bf16.mxu1 %v7883_v6 }
  0xc9   :  { %7914 = vmatpush3.bf16.msra.mxu0 %v7911_v3 }
  0xca   :  { %7916 = vmatprep.subr.bf16.mxu0 %v7915_v12 }
  0xcb   :  { %7886 = vmatpush1.bf16.msra.mxu1 %v7885_v9 }
  0xcc   :  { %7461 = vmatprep.subr.mxu1 %v8567_v13 }
  0xcd   :  { %7918 = vmatpush3.bf16.msra.mxu0 %v7915_v12 }
  0xce   :  { %7426 = vmatprep.subr.mxu0 %v8567_v13 }
 0x183   :  { %v7390_v15 = vpop.f32.mrb[0].mxu0 }
 0x184   :  { %v261_v16 = vadd.f32 %v7390_v15, %v6987_v14  ;;  %v255_v18 = vpop.f32.mrb[1].mxu0 }
 0x185   :  { %v256_v19 = vadd.f32 %v6987_v14, %v255_v18 }
 0x186   :  { %v8818_v21 = vadd.f32 %v264_v17, %v261_v16 }
 0x187   :  { %v8816_v20 = vadd.f32 %v264_v17, %v256_v19 }
 0x189   :  { %397 = vmatmul.mubr.f32.vlgmr.msra.gmra.mrb[0].mxu1 %v8816_v20  ;;  %7423 = vmatprep.mubr.f32.mxu0 %v8816_v20 }
 0x18a   :  { %7424 = vmatmul.mubr.f32.vlgmr.msra.gmra.mrb[2].mxu0 %v8818_v21  ;;  %402 = vmatprep.mubr.f32.mxu1 %v8567_v13 }
 0x18b   :  { %7428 = vmatprep.mubr.msk.f32.mxu0 %vm8568_vm1, %v8567_v13 }
 0x18d   :  { %403 = vmatmul.mubr.f32.gmra.mrb[2].mxu1 %v8818_v21 }
 0x18e   :  { %7463 = vmatprep.mubr.msk.f32.mxu1 %vm8568_vm1, %v8567_v13 }
 0x25c   :  { %v398_v31 = vpop.f32.mrb[0].mxu1 }
 0x25d   :  { %v8845_v32 = vadd.f32 %v398_v31, %v320_v28  ;;  %v400_v33 = vpop.f32.mrb[1].mxu1  ;;  %v7425_v34 = vpop.f32.mrb[2].mxu0 }
 0x25e   :  { %v8847_v35 = vadd.f32 %v400_v33, %v324_v29  ;;  %v8849_v36 = vadd.f32 %v7425_v34, %v328_v30  ;;  %v475_v37 = vpop.f32.mrb[3].mxu0 }
 0x25f   :  { %807 = vrot.lane.b32.xlu1 %v8845_v32, %s8569_s8  ;;  %v8867_v42 = vadd.f32 %v475_v37, %v328_v30 }
 0x260   :  { %v404_v38 = vpop.f32.mrb[2].mxu1  ;;  %7427 = vmatpush3.xpose.msk.msra.mxu0 %vm182_vm0, %v8847_v35 }
 0x261   :  { %v406_v39 = vpop.f32.mrb[3].mxu1  ;;  %7431 = vmatprep.subr.mxu0 %v8567_v13  ;;  %v8864_v41 = vadd.f32 %v404_v38, %v320_v28 }
 0x262   :  { %v8856_v40 = vadd.f32 %v406_v39, %v324_v29 }
 0x263   :  { %7429 = vmatmul.mubr.msk.f32.vlgmr.msra.gmra.mrb[4].mxu0 %vm182_vm0, %v8845_v32 }
 0x264   :  { %7432 = vmatpush3.xpose.msk.msra.mxu0 %vm182_vm0, %v8856_v40  ;;  %7433 = vmatprep.mubr.msk.f32.mxu0 %vm8568_vm1, %v8567_v13 }
 0x265   :  { %7436 = vmatprep.subr.mxu0 %v8567_v13 }
 0x267   :  { %7434 = vmatmul.mubr.msk.f32.vlgmr.msra.gmra.mrb[6].mxu0 %vm182_vm0, %v8864_v41 }
 0x268   :  { %7437 = vmatpush3.msra.mxu0 %v8867_v42  ;;  %7438 = vmatprep.mubr.msk.f32.mxu0 %vm8568_vm1, %v8567_v13 }
 0x269   :  { %7441 = vmatprep.subr.mxu0 %v8567_v13 }
 0x2d1   :  { %v808_v59 = vpop.permute.xlu1 %807 }
 0x336   :  { %v556_v43 = vpop.f32.mrb[4].mxu0 }
 0x337   :  { %v7430_v44 = vpop.f32.mrb[5].mxu0  ;;  %v637_v45 = vsel %vm636_vm2, %v556_v43, -inf }
 0x338   :  { %638 = vmax.xlane.f32.xlu0 %v637_v45 }
 0x33a   :  { %v632_v46 = vpop.f32.mrb[6].mxu0 }
 0x33b   :  { %v7435_v47 = vpop.f32.mrb[7].mxu0  ;;  %v640_v48 = vsel %vm636_vm2, %v632_v46, -inf }
 0x33c   :  { %641 = vmax.xlane.f32.xlu0 %v640_v48 }
 0x352   :  { %809 = vrot.lane.b32.xlu0 %v8847_v35, %s8569_s8 }
 0x3c5   :  { %v639_v49 = vpop.xlane.xlu0 %638 }
 0x3c6   :  { %v643_v50 = vsub.f32 %v556_v43, %v639_v49 }
 0x3c8   :  { %v645_v51 = vmul.f32 1.442695, %v643_v50 }
 0x3c9   :  { %v642_v54 = vpop.xlane.xlu0 %641 }
 0x3ca   :  { %8199 = vpow2.f32 %v645_v51  ;;  %v644_v55 = vsub.f32 %v632_v46, %v642_v54 }
 0x3cc   :  { %v647_v56 = vmul.f32 1.442695, %v644_v55 }
 0x3cd   :  { %v810_v3 = vpop.permute.xlu0 %809 }
 0x3ce   :  { %8201 = vpow2.f32 %v647_v56 }
 0x3d4   :  { %v8200_v52 = vpop.eup %8199 }
 0x3d5   :  { %v649_v53 = vsel %vm636_vm2, %v8200_v52, 0.0 }
 0x3d6   :  { %650 = vadd.xlane.f32.xlu1 %v649_v53 }
 0x3d8   :  { %v8202_v57 = vpop.eup %8201 }
 0x3d9   :  { %v652_v58 = vsel %vm636_vm2, %v8202_v57, 0.0 }
 0x3e7   :  { %887 = vrot.lane.b32.xlu1 %v8856_v40, %s8569_s8 }
 0x40b   :  { %653 = vadd.xlane.f32.xlu1 %v652_v58 }
 0x41c   :  { %885 = vrot.lane.b32.xlu1 %v8864_v41, %s8569_s8 }
 0x463   :  { %v651_v60 = vpop.xlane.xlu1 %650 }
 0x464   :  { %8203 = vrcp.f32 %v651_v60 }
 0x467   :  { %v888_v63 = vpop.permute.xlu1 %887 }
 0x46e   :  { %v8204_v61 = vpop.eup %8203 }
 0x46f   :  { %v656_v62 = vmul.f32 %v8204_v61, %v8200_v52 }
 0x471   :  { %7439 = vmatmul.mubr.msk.f32.vlgmr.msra.gmra.mrb[8].mxu0 %vm636_vm2, %v656_v62 }
 0x472   :  { %7442 = vmatpush3.msra.mxu0 %v8849_v36  ;;  %7443 = vmatprep.mubr.msk.f32.mxu0 %vm8568_vm1, %v8567_v13 }
 0x473   :  { %7446 = vmatprep.subr.mxu0 %v8567_v13 }
 0x498   :  { %v654_v0 = vpop.xlane.xlu1 %653 }
 0x499   :  { %8205 = vrcp.f32 %v654_v0 }
 0x49c   :  { %v886_v4 = vpop.permute.xlu1 %885 }
 0x4a3   :  { %v8206_v1 = vpop.eup %8205 }
 0x4a4   :  { %v658_v2 = vmul.f32 %v8206_v1, %v8202_v57 }
 0x4a6   :  { %7444 = vmatmul.mubr.msk.f32.vlgmr.msra.gmra.mrb[10].mxu0 %vm636_vm2, %v658_v2 }
 0x4a7   :  { %7447 = vmatpush3.xpose.msk.msra.mxu0 %vm182_vm0, %v810_v3  ;;  %7448 = vmatprep.mubr.msk.f32.mxu0 %vm8568_vm1, %v8567_v13 }
 0x4a8   :  { %7451 = vmatprep.subr.mxu0 %v8567_v13 }
 0x4aa   :  { %7449 = vmatmul.mubr.msk.f32.vlgmr.msra.gmra.mrb[12].mxu0 %vm182_vm0, %v808_v59 }
 0x4ab   :  { %7452 = vmatpush3.xpose.msk.msra.mxu0 %vm182_vm0, %v888_v63  ;;  %7453 = vmatprep.mubr.msk.f32.mxu0 %vm8568_vm1, %v8567_v13 }
 0x4ac   :  { %7456 = vmatprep.subr.mxu0 %v8567_v13 }
 0x4ae   :  { %7454 = vmatmul.mubr.msk.f32.vlgmr.msra.gmra.mrb[14].mxu0 %vm182_vm0, %v886_v4 }
 0x4af   :  { %7458 = vmatprep.mubr.msk.f32.mxu0 %vm8568_vm1, %v8567_v13 }
 0x544   :  { %v728_v5 = vpop.f32.mrb[8].mxu0 }
 0x545   :  { %805 = vst.msk [vmem:[#allocation2] sm:$0xff] %vm182_vm0, %v728_v5  ;;  %v7440_v6 = vpop.f32.mrb[9].mxu0 }
 0x579   :  { %v801_v7 = vpop.f32.mrb[10].mxu0 }
 0x57a   :  { %806 = vst.msk [vmem:[#allocation2 + $0x8] sm:$0xff] %vm182_vm0, %v801_v7  ;;  %v7445_v8 = vpop.f32.mrb[11].mxu0 }
 0x57d   :  { %v881_v9 = vpop.f32.mrb[12].mxu0 }
 0x57e   :  { %v7450_v10 = vpop.f32.mrb[13].mxu0  ;;  %v963_v11 = vsel %vm636_vm2, %v881_v9, -inf }
 0x57f   :  { %964 = vmax.xlane.f32.xlu0 %v963_v11 }
 0x581   :  { %v959_v12 = vpop.f32.mrb[14].mxu0 }
 0x582   :  { %v7455_v14 = vpop.f32.mrb[15].mxu0  ;;  %v966_v15 = vsel %vm636_vm2, %v959_v12, -inf }
 0x583   :  { %967 = vmax.xlane.f32.xlu1 %v966_v15 }
 0x594   :  { %1063 = vrot.lane.b32.xlu1 %v8849_v36, %s8569_s8 }
 0x595   :  { %986 = vrot.lane.b32.xlu0 %v8867_v42, %s8569_s8 }
 0x598   :  { %1152 = vrot.lane.b32.xlu1 %v8847_v35, %s8570_s25 }
 0x59c   :  { %1230 = vrot.lane.b32.xlu1 %v8856_v40, %s8570_s25 }
 0x5a0   :  { %1228 = vrot.lane.b32.xlu1 %v8864_v41, %s8570_s25 }
 0x60c   :  { %v965_v16 = vpop.xlane.xlu0 %964 }
 0x60d   :  { %v969_v17 = vsub.f32 %v881_v9, %v965_v16 }
 0x60f   :  { %v971_v18 = vmul.f32 1.442695, %v969_v17 }
 0x610   :  { %v987_v19 = vpop.permute.xlu0 %986  ;;  %v968_v22 = vpop.xlane.xlu1 %967 }
 0x611   :  { %8207 = vpow2.f32 %v971_v18  ;;  %v970_v25 = vsub.f32 %v959_v12, %v968_v22  ;;  %7457 = vmatpush3.msra.mxu0 %v987_v19 }
 0x612   :  { %7466 = vmatprep.subr.mxu0 %v8567_v13 }
 0x613   :  { %v973_v28 = vmul.f32 1.442695, %v970_v25 }
 0x614   :  { %v1064_v29 = vpop.permute.xlu1 %1063 }
 0x615   :  { %8209 = vpow2.f32 %v973_v28  ;;  %7462 = vmatpush3.msra.mxu1 %v1064_v29 }
 0x616   :  { %7471 = vmatprep.subr.mxu1 %v8567_v13 }
 0x618   :  { %v1153_v39 = vpop.permute.xlu1 %1152 }
 0x61b   :  { %v8208_v30 = vpop.eup %8207 }
 0x61c   :  { %v975_v31 = vsel %vm636_vm2, %v8208_v30, 0.0  ;;  %v1231_v46 = vpop.permute.xlu1 %1230 }
 0x61d   :  { %976 = vadd.xlane.f32.xlu0 %v975_v31 }
 0x61f   :  { %v8210_v33 = vpop.eup %8209 }
 0x620   :  { %v978_v34 = vsel %vm636_vm2, %v8210_v33, 0.0  ;;  %v1229_v49 = vpop.permute.xlu1 %1228 }
 0x621   :  { %979 = vadd.xlane.f32.xlu0 %v978_v34 }
 0x637   :  { %1150 = vrot.lane.b32.xlu0 %v8845_v32, %s8570_s25 }
 0x6aa   :  { %v977_v37 = vpop.xlane.xlu0 %976 }
 0x6ab   :  { %8211 = vrcp.f32 %v977_v37 }
 0x6ae   :  { %v980_v38 = vpop.xlane.xlu0 %979 }
 0x6af   :  { %8213 = vrcp.f32 %v980_v38 }
 0x6b2   :  { %v1151_v48 = vpop.permute.xlu0 %1150 }
 0x6b5   :  { %v8212_v43 = vpop.eup %8211 }
 0x6b6   :  { %v982_v44 = vmul.f32 %v8212_v43, %v8208_v30 }
 0x6b8   :  { %7459 = vmatmul.mubr.msk.f32.vlgmr.msra.gmra.mrb[16].mxu0 %vm636_vm2, %v982_v44 }
 0x6b9   :  { %v8214_v45 = vpop.eup %8213  ;;  %7467 = vmatpush3.xpose.msk.msra.mxu0 %vm182_vm0, %v1153_v39  ;;  %7468 = vmatprep.mubr.msk.f32.mxu0 %vm8568_vm1, %v8567_v13 }
 0x6ba   :  { %v984_v47 = vmul.f32 %v8214_v45, %v8210_v33  ;;  %7476 = vmatprep.subr.mxu0 %v8567_v13 }
 0x6bc   :  { %7464 = vmatmul.mubr.msk.f32.vlgmr.msra.gmra.mrb[4].mxu1 %vm636_vm2, %v984_v47  ;;  %7469 = vmatmul.mubr.msk.f32.vlgmr.msra.gmra.mrb[18].mxu0 %vm182_vm0, %v1151_v48 }
 0x6bd   :  { %7472 = vmatpush3.xpose.msk.msra.mxu1 %vm182_vm0, %v1231_v46  ;;  %7473 = vmatprep.mubr.msk.f32.mxu1 %vm8568_vm1, %v8567_v13 }
 0x6be   :  { %7481 = vmatprep.subr.mxu1 %v8567_v13  ;;  %7478 = vmatprep.mubr.msk.f32.mxu0 %vm8568_vm1, %v8567_v13 }
 0x6c0   :  { %7474 = vmatmul.mubr.msk.f32.vlgmr.msra.gmra.mrb[6].mxu1 %vm182_vm0, %v1229_v49 }
 0x6c1   :  { %7483 = vmatprep.mubr.msk.f32.mxu1 %vm8568_vm1, %v8567_v13 }
 0x78b   :  { %v8939_v50 = vpop.f32.mrb[16].mxu0 }
 0x78c   :  { %v7460_v51 = vpop.f32.mrb[17].mxu0 }
 0x78f   :  { %v8941_v52 = vpop.f32.mrb[4].mxu1  ;;  %v1224_v53 = vpop.f32.mrb[18].mxu0 }
 0x790   :  { %v7465_v54 = vpop.f32.mrb[5].mxu1  ;;  %v7470_v55 = vpop.f32.mrb[19].mxu0  ;;  %v1306_v56 = vsel %vm636_vm2, %v1224_v53, -inf }
 0x791   :  { %1307 = vmax.xlane.f32.xlu0 %v1306_v56 }
 0x793   :  { %v1302_v57 = vpop.f32.mrb[6].mxu1 }
 0x794   :  { %v7475_v58 = vpop.f32.mrb[7].mxu1  ;;  %v1309_v59 = vsel %vm636_vm2, %v1302_v57, -inf }
 0x795   :  { %1310 = vmax.xlane.f32.xlu1 %v1309_v59 }
 0x7a6   :  { %1404 = vrot.lane.b32.xlu1 %v8849_v36, %s8570_s25 }
 0x7a7   :  { %1328 = vrot.lane.b32.xlu0 %v8867_v42, %s8570_s25 }
 0x7aa   :  { %1493 = vrot.lane.b32.xlu1 %v8847_v35, %s8571_s17 }
 0x7ae   :  { %1571 = vrot.lane.b32.xlu1 %v8856_v40, %s8571_s17 }
 0x7b2   :  { %1569 = vrot.lane.b32.xlu1 %v8864_v41, %s8571_s17 }
 0x81e   :  { %v1308_v60 = vpop.xlane.xlu0 %1307 }
 0x81f   :  { %v1312_v61 = vsub.f32 %v1224_v53, %v1308_v60 }
 0x821   :  { %v1314_v62 = vmul.f32 1.442695, %v1312_v61 }
 0x822   :  { %v1311_v63 = vpop.xlane.xlu1 %1310  ;;  %v1329_v0 = vpop.permute.xlu0 %1328 }
 0x823   :  { %8215 = vpow2.f32 %v1314_v62  ;;  %v1313_v1 = vsub.f32 %v1302_v57, %v1311_v63  ;;  %7477 = vmatpush3.msra.mxu0 %v1329_v0 }
 0x824   :  { %7486 = vmatprep.subr.mxu0 %v8567_v13 }
 0x825   :  { %v1316_v2 = vmul.f32 1.442695, %v1313_v1 }
 0x826   :  { %v1405_v3 = vpop.permute.xlu1 %1404 }
 0x827   :  { %8217 = vpow2.f32 %v1316_v2  ;;  %7482 = vmatpush3.msra.mxu1 %v1405_v3 }
 0x828   :  { %7491 = vmatprep.subr.mxu1 %v8567_v13 }
 0x82a   :  { %v1494_v10 = vpop.permute.xlu1 %1493 }
 0x82d   :  { %v8216_v4 = vpop.eup %8215 }
 0x82e   :  { %v1318_v5 = vsel %vm636_vm2, %v8216_v4, 0.0  ;;  %v1572_v15 = vpop.permute.xlu1 %1571 }
 0x82f   :  { %1319 = vadd.xlane.f32.xlu0 %v1318_v5 }
 0x831   :  { %v8218_v6 = vpop.eup %8217 }
 0x832   :  { %v1321_v7 = vsel %vm636_vm2, %v8218_v6, 0.0  ;;  %v1570_v18 = vpop.permute.xlu1 %1569 }
 0x833   :  { %1322 = vadd.xlane.f32.xlu0 %v1321_v7 }
 0x849   :  { %1491 = vrot.lane.b32.xlu0 %v8845_v32, %s8571_s17 }
 0x8bc   :  { %v1320_v8 = vpop.xlane.xlu0 %1319 }
 0x8bd   :  { %8219 = vrcp.f32 %v1320_v8 }
 0x8c0   :  { %v1323_v9 = vpop.xlane.xlu0 %1322 }
 0x8c1   :  { %8221 = vrcp.f32 %v1323_v9 }
 0x8c4   :  { %v1492_v17 = vpop.permute.xlu0 %1491 }
 0x8c7   :  { %v8220_v11 = vpop.eup %8219 }
 0x8c8   :  { %v1325_v12 = vmul.f32 %v8220_v11, %v8216_v4 }
 0x8ca   :  { %7479 = vmatmul.mubr.msk.f32.vlgmr.msra.gmra.mrb[20].mxu0 %vm636_vm2, %v1325_v12 }
 0x8cb   :  { %v8222_v14 = vpop.eup %8221  ;;  %7487 = vmatpush3.xpose.msk.msra.mxu0 %vm182_vm0, %v1494_v10  ;;  %7488 = vmatprep.mubr.msk.f32.mxu0 %vm8568_vm1, %v8567_v13 }
 0x8cc   :  { %v1327_v16 = vmul.f32 %v8222_v14, %v8218_v6  ;;  %7496 = vmatprep.subr.mxu0 %v8567_v13 }
 0x8ce   :  { %7484 = vmatmul.mubr.msk.f32.vlgmr.msra.gmra.mrb[8].mxu1 %vm636_vm2, %v1327_v16  ;;  %7489 = vmatmul.mubr.msk.f32.vlgmr.msra.gmra.mrb[22].mxu0 %vm182_vm0, %v1492_v17 }
 0x8cf   :  { %7492 = vmatpush3.xpose.msk.msra.mxu1 %vm182_vm0, %v1572_v15  ;;  %7493 = vmatprep.mubr.msk.f32.mxu1 %vm8568_vm1, %v8567_v13 }
 0x8d0   :  { %7501 = vmatprep.subr.mxu1 %v8567_v13  ;;  %7498 = vmatprep.mubr.msk.f32.mxu0 %vm8568_vm1, %v8567_v13 }
 0x8d2   :  { %7494 = vmatmul.mubr.msk.f32.vlgmr.msra.gmra.mrb[10].mxu1 %vm182_vm0, %v1570_v18 }
 0x8d3   :  { %7503 = vmatprep.mubr.msk.f32.mxu1 %vm8568_vm1, %v8567_v13 }
 0x99d   :  { %v8977_v19 = vpop.f32.mrb[20].mxu0 }
 0x99e   :  { %v7480_v22 = vpop.f32.mrb[21].mxu0 }
 0x9a1   :  { %v8979_v25 = vpop.f32.mrb[8].mxu1  ;;  %v1565_v28 = vpop.f32.mrb[22].mxu0 }
 0x9a2   :  { %v7485_v29 = vpop.f32.mrb[9].mxu1  ;;  %v7490_v30 = vpop.f32.mrb[23].mxu0  ;;  %v1647_v31 = vsel %vm636_vm2, %v1565_v28, -inf }
 0x9a3   :  { %1648 = vmax.xlane.f32.xlu0 %v1647_v31 }
 0x9a5   :  { %v1643_v33 = vpop.f32.mrb[10].mxu1 }
 0x9a6   :  { %v7495_v34 = vpop.f32.mrb[11].mxu1  ;;  %v1650_v37 = vsel %vm636_vm2, %v1643_v33, -inf }
 0x9a7   :  { %1651 = vmax.xlane.f32.xlu1 %v1650_v37 }
 0x9b8   :  { %1745 = vrot.lane.b32.xlu1 %v8849_v36, %s8571_s17 }
 0x9b9   :  { %1669 = vrot.lane.b32.xlu0 %v8867_v42, %s8571_s17 }
 0x9bc   :  { %1834 = vrot.lane.b32.xlu1 %v8847_v35, %s8572_s19 }
 0x9c0   :  { %1912 = vrot.lane.b32.xlu1 %v8856_v40, %s8572_s19 }
 0x9c4   :  { %1910 = vrot.lane.b32.xlu1 %v8864_v41, %s8572_s19 }
 0xa30   :  { %v1649_v38 = vpop.xlane.xlu0 %1648 }
 0xa31   :  { %v1653_v39 = vsub.f32 %v1565_v28, %v1649_v38 }
 0xa33   :  { %v1655_v43 = vmul.f32 1.442695, %v1653_v39 }
 0xa34   :  { %v1652_v44 = vpop.xlane.xlu1 %1651  ;;  %v1670_v45 = vpop.permute.xlu0 %1669 }
 0xa35   :  { %8223 = vpow2.f32 %v1655_v43  ;;  %v1654_v46 = vsub.f32 %v1643_v33, %v1652_v44  ;;  %7497 = vmatpush3.msra.mxu0 %v1670_v45 }
 0xa36   :  { %7506 = vmatprep.subr.mxu0 %v8567_v13 }
 0xa37   :  { %v1657_v47 = vmul.f32 1.442695, %v1654_v46 }
 0xa38   :  { %v1746_v48 = vpop.permute.xlu1 %1745 }
 0xa39   :  { %8225 = vpow2.f32 %v1657_v47  ;;  %7502 = vmatpush3.msra.mxu1 %v1746_v48 }
 0xa3a   :  { %7511 = vmatprep.subr.mxu1 %v8567_v13 }
 0xa3c   :  { %v1835_v57 = vpop.permute.xlu1 %1834 }
 0xa3f   :  { %v8224_v49 = vpop.eup %8223 }
 0xa40   :  { %v1659_v51 = vsel %vm636_vm2, %v8224_v49, 0.0  ;;  %v1913_v61 = vpop.permute.xlu1 %1912 }
 0xa41   :  { %1660 = vadd.xlane.f32.xlu0 %v1659_v51 }
 0xa43   :  { %v8226_v53 = vpop.eup %8225 }
 0xa44   :  { %v1662_v54 = vsel %vm636_vm2, %v8226_v53, 0.0  ;;  %v1911_v0 = vpop.permute.xlu1 %1910 }
 0xa45   :  { %1663 = vadd.xlane.f32.xlu0 %v1662_v54 }
 0xa5b   :  { %1832 = vrot.lane.b32.xlu0 %v8845_v32, %s8572_s19 }
 0xace   :  { %v1661_v55 = vpop.xlane.xlu0 %1660 }
 0xacf   :  { %8227 = vrcp.f32 %v1661_v55 }
 0xad2   :  { %v1664_v56 = vpop.xlane.xlu0 %1663 }
 0xad3   :  { %8229 = vrcp.f32 %v1664_v56 }
 0xad6   :  { %v1833_v63 = vpop.permute.xlu0 %1832 }
 0xad9   :  { %v8228_v58 = vpop.eup %8227 }
 0xada   :  { %v1666_v59 = vmul.f32 %v8228_v58, %v8224_v49 }
 0xadc   :  { %7499 = vmatmul.mubr.msk.f32.vlgmr.msra.gmra.mrb[24].mxu0 %vm636_vm2, %v1666_v59 }
 0xadd   :  { %v8230_v60 = vpop.eup %8229  ;;  %7507 = vmatpush3.xpose.msk.msra.mxu0 %vm182_vm0, %v1835_v57  ;;  %7508 = vmatprep.mubr.msk.f32.mxu0 %vm8568_vm1, %v8567_v13 }
 0xade   :  { %v1668_v62 = vmul.f32 %v8230_v60, %v8226_v53  ;;  %7516 = vmatprep.subr.mxu0 %v8567_v13 }
 0xae0   :  { %7504 = vmatmul.mubr.msk.f32.vlgmr.msra.gmra.mrb[12].mxu1 %vm636_vm2, %v1668_v62  ;;  %7509 = vmatmul.mubr.msk.f32.vlgmr.msra.gmra.mrb[26].mxu0 %vm182_vm0, %v1833_v63 }
 0xae1   :  { %7512 = vmatpush3.xpose.msk.msra.mxu1 %vm182_vm0, %v1913_v61  ;;  %7513 = vmatprep.mubr.msk.f32.mxu1 %vm8568_vm1, %v8567_v13 }
 0xae2   :  { %7521 = vmatprep.subr.mxu1 %v8567_v13  ;;  %7518 = vmatprep.mubr.msk.f32.mxu0 %vm8568_vm1, %v8567_v13 }
 0xae4   :  { %7514 = vmatmul.mubr.msk.f32.vlgmr.msra.gmra.mrb[14].mxu1 %vm182_vm0, %v1911_v0 }
 0xae5   :  { %7523 = vmatprep.mubr.msk.f32.mxu1 %vm8568_vm1, %v8567_v13 }
 0xbaf   :  { %v9015_v1 = vpop.f32.mrb[24].mxu0 }
 0xbb0   :  { %v7500_v2 = vpop.f32.mrb[25].mxu0 }
 0xbb3   :  { %v9017_v3 = vpop.f32.mrb[12].mxu1  ;;  %v1906_v4 = vpop.f32.mrb[26].mxu0 }
 0xbb4   :  { %v7505_v5 = vpop.f32.mrb[13].mxu1  ;;  %v7510_v6 = vpop.f32.mrb[27].mxu0  ;;  %v1988_v7 = vsel %vm636_vm2, %v1906_v4, -inf }
 0xbb5   :  { %1989 = vmax.xlane.f32.xlu0 %v1988_v7 }
 0xbb7   :  { %v1984_v8 = vpop.f32.mrb[14].mxu1 }
 0xbb8   :  { %v7515_v9 = vpop.f32.mrb[15].mxu1  ;;  %v1991_v10 = vsel %vm636_vm2, %v1984_v8, -inf }
 0xbb9   :  { %1992 = vmax.xlane.f32.xlu1 %v1991_v10 }
 0xbca   :  { %2086 = vrot.lane.b32.xlu1 %v8849_v36, %s8572_s19 }
 0xbcb   :  { %2010 = vrot.lane.b32.xlu0 %v8867_v42, %s8572_s19 }
 0xbce   :  { %2175 = vrot.lane.b32.xlu1 %v8847_v35, %s8573_s6 }
 0xbd2   :  { %2253 = vrot.lane.b32.xlu1 %v8856_v40, %s8573_s6 }
 0xbd6   :  { %2251 = vrot.lane.b32.xlu1 %v8864_v41, %s8573_s6 }
 0xc42   :  { %v1990_v11 = vpop.xlane.xlu0 %1989 }
 0xc43   :  { %v1994_v12 = vsub.f32 %v1906_v4, %v1990_v11 }
 0xc45   :  { %v1996_v14 = vmul.f32 1.442695, %v1994_v12 }
 0xc46   :  { %v1993_v15 = vpop.xlane.xlu1 %1992  ;;  %v2011_v16 = vpop.permute.xlu0 %2010 }
 0xc47   :  { %8231 = vpow2.f32 %v1996_v14  ;;  %v1995_v17 = vsub.f32 %v1984_v8, %v1993_v15  ;;  %7517 = vmatpush3.msra.mxu0 %v2011_v16 }
 0xc48   :  { %7526 = vmatprep.subr.mxu0 %v8567_v13 }
 0xc49   :  { %v1998_v18 = vmul.f32 1.442695, %v1995_v17 }
 0xc4a   :  { %v2087_v22 = vpop.permute.xlu1 %2086 }
 0xc4b   :  { %8233 = vpow2.f32 %v1998_v18  ;;  %7522 = vmatpush3.msra.mxu1 %v2087_v22 }
 0xc4c   :  { %7531 = vmatprep.subr.mxu1 %v8567_v13 }
 0xc4e   :  { %v2176_v37 = vpop.permute.xlu1 %2175 }
 0xc51   :  { %v8232_v28 = vpop.eup %8231 }
 0xc52   :  { %v2000_v29 = vsel %vm636_vm2, %v8232_v28, 0.0  ;;  %v2254_v44 = vpop.permute.xlu1 %2253 }
 0xc53   :  { %2001 = vadd.xlane.f32.xlu0 %v2000_v29 }
 0xc55   :  { %v8234_v30 = vpop.eup %8233 }
 0xc56   :  { %v2003_v31 = vsel %vm636_vm2, %v8234_v30, 0.0  ;;  %v2252_v47 = vpop.permute.xlu1 %2251 }
 0xc57   :  { %2004 = vadd.xlane.f32.xlu0 %v2003_v31 }
 0xc6d   :  { %2173 = vrot.lane.b32.xlu0 %v8845_v32, %s8573_s6 }
 0xce0   :  { %v2002_v33 = vpop.xlane.xlu0 %2001 }
 0xce1   :  { %8235 = vrcp.f32 %v2002_v33 }
 0xce4   :  { %v2005_v34 = vpop.xlane.xlu0 %2004 }
 0xce5   :  { %8237 = vrcp.f32 %v2005_v34 }
 0xce8   :  { %v2174_v46 = vpop.permute.xlu0 %2173 }
 0xceb   :  { %v8236_v38 = vpop.eup %8235 }
 0xcec   :  { %v2007_v39 = vmul.f32 %v8236_v38, %v8232_v28 }
 0xcee   :  { %7519 = vmatmul.mubr.msk.f32.vlgmr.msra.gmra.mrb[28].mxu0 %vm636_vm2, %v2007_v39 }
 0xcef   :  { %v8238_v43 = vpop.eup %8237  ;;  %7527 = vmatpush3.xpose.msk.msra.mxu0 %vm182_vm0, %v2176_v37  ;;  %7528 = vmatprep.mubr.msk.f32.mxu0 %vm8568_vm1, %v8567_v13 }
 0xcf0   :  { %v2009_v45 = vmul.f32 %v8238_v43, %v8234_v30  ;;  %7536 = vmatprep.subr.mxu0 %v8567_v13 }
 0xcf2   :  { %7524 = vmatmul.mubr.msk.f32.vlgmr.msra.gmra.mrb[16].mxu1 %vm636_vm2, %v2009_v45  ;;  %7529 = vmatmul.mubr.msk.f32.vlgmr.msra.gmra.mrb[30].mxu0 %vm182_vm0, %v2174_v46 }
 0xcf3   :  { %7532 = vmatpush3.xpose.msk.msra.mxu1 %vm182_vm0, %v2254_v44  ;;  %7533 = vmatprep.mubr.msk.f32.mxu1 %vm8568_vm1, %v8567_v13 }
 0xcf4   :  { %7541 = vmatprep.subr.mxu1 %v8567_v13  ;;  %7538 = vmatprep.mubr.msk.f32.mxu0 %vm8568_vm1, %v8567_v13 }
 0xcf6   :  { %7534 = vmatmul.mubr.msk.f32.vlgmr.msra.gmra.mrb[18].mxu1 %vm182_vm0, %v2252_v47 }
 0xcf7   :  { %7543 = vmatprep.mubr.msk.f32.mxu1 %vm8568_vm1, %v8567_v13 }
 0xdc1   :  { %v9053_v48 = vpop.f32.mrb[28].mxu0 }
 0xdc2   :  { %v7520_v49 = vpop.f32.mrb[29].mxu0 }
 0xdc5   :  { %v9055_v51 = vpop.f32.mrb[16].mxu1  ;;  %v2247_v53 = vpop.f32.mrb[30].mxu0 }
 0xdc6   :  { %v7525_v54 = vpop.f32.mrb[17].mxu1  ;;  %v7530_v55 = vpop.f32.mrb[31].mxu0  ;;  %v2329_v56 = vsel %vm636_vm2, %v2247_v53, -inf }
 0xdc7   :  { %2330 = vmax.xlane.f32.xlu0 %v2329_v56 }
 0xdc9   :  { %v2325_v57 = vpop.f32.mrb[18].mxu1 }
 0xdca   :  { %v7535_v58 = vpop.f32.mrb[19].mxu1  ;;  %v2332_v59 = vsel %vm636_vm2, %v2325_v57, -inf }
 0xdcb   :  { %2333 = vmax.xlane.f32.xlu1 %v2332_v59 }
 0xddc   :  { %2427 = vrot.lane.b32.xlu1 %v8849_v36, %s8573_s6 }
 0xddd   :  { %2351 = vrot.lane.b32.xlu0 %v8867_v42, %s8573_s6 }
 0xde0   :  { %2516 = vrot.lane.b32.xlu1 %v8847_v35, %s8574_s29 }
 0xde4   :  { %2594 = vrot.lane.b32.xlu1 %v8856_v40, %s8574_s29 }
 0xde8   :  { %2592 = vrot.lane.b32.xlu1 %v8864_v41, %s8574_s29 }
 0xe54   :  { %v2331_v60 = vpop.xlane.xlu0 %2330 }
 0xe55   :  { %v2335_v61 = vsub.f32 %v2247_v53, %v2331_v60 }
 0xe57   :  { %v2337_v62 = vmul.f32 1.442695, %v2335_v61 }
 0xe58   :  { %v2334_v63 = vpop.xlane.xlu1 %2333  ;;  %v2352_v0 = vpop.permute.xlu0 %2351 }
 0xe59   :  { %8239 = vpow2.f32 %v2337_v62  ;;  %v2336_v2 = vsub.f32 %v2325_v57, %v2334_v63  ;;  %7537 = vmatpush3.msra.mxu0 %v2352_v0 }
 0xe5a   :  { %7546 = vmatprep.subr.mxu0 %v8567_v13 }
 0xe5b   :  { %v2339_v4 = vmul.f32 1.442695, %v2336_v2 }
 0xe5c   :  { %v2428_v5 = vpop.permute.xlu1 %2427 }
 0xe5d   :  { %8241 = vpow2.f32 %v2339_v4  ;;  %7542 = vmatpush3.msra.mxu1 %v2428_v5 }
 0xe5e   :  { %7551 = vmatprep.subr.mxu1 %v8567_v13 }
 0xe60   :  { %v2517_v12 = vpop.permute.xlu1 %2516 }
 0xe63   :  { %v8240_v6 = vpop.eup %8239 }
 0xe64   :  { %v2341_v7 = vsel %vm636_vm2, %v8240_v6, 0.0  ;;  %v2595_v17 = vpop.permute.xlu1 %2594 }
 0xe65   :  { %2342 = vadd.xlane.f32.xlu0 %v2341_v7 }
 0xe67   :  { %v8242_v8 = vpop.eup %8241 }
 0xe68   :  { %v2344_v9 = vsel %vm636_vm2, %v8242_v8, 0.0  ;;  %v2593_v28 = vpop.permute.xlu1 %2592 }
 0xe69   :  { %2345 = vadd.xlane.f32.xlu0 %v2344_v9 }
 0xe7f   :  { %2514 = vrot.lane.b32.xlu0 %v8845_v32, %s8574_s29 }
 0xef2   :  { %v2343_v10 = vpop.xlane.xlu0 %2342 }
 0xef3   :  { %8243 = vrcp.f32 %v2343_v10 }
 0xef6   :  { %v2346_v11 = vpop.xlane.xlu0 %2345 }
 0xef7   :  { %8245 = vrcp.f32 %v2346_v11 }
 0xefa   :  { %v2515_v22 = vpop.permute.xlu0 %2514 }
 0xefd   :  { %v8244_v14 = vpop.eup %8243 }
 0xefe   :  { %v2348_v15 = vmul.f32 %v8244_v14, %v8240_v6 }
 0xf00   :  { %7539 = vmatmul.mubr.msk.f32.vlgmr.msra.gmra.mrb[32].mxu0 %vm636_vm2, %v2348_v15 }
 0xf01   :  { %v8246_v16 = vpop.eup %8245  ;;  %7547 = vmatpush3.xpose.msk.msra.mxu0 %vm182_vm0, %v2517_v12  ;;  %7548 = vmatprep.mubr.msk.f32.mxu0 %vm8568_vm1, %v8567_v13 }
 0xf02   :  { %v2350_v18 = vmul.f32 %v8246_v16, %v8242_v8  ;;  %7556 = vmatprep.subr.mxu0 %v8567_v13 }
 0xf04   :  { %7544 = vmatmul.mubr.msk.f32.vlgmr.msra.gmra.mrb[20].mxu1 %vm636_vm2, %v2350_v18  ;;  %7549 = vmatmul.mubr.msk.f32.vlgmr.msra.gmra.mrb[34].mxu0 %vm182_vm0, %v2515_v22 }
 0xf05   :  { %7552 = vmatpush3.xpose.msk.msra.mxu1 %vm182_vm0, %v2595_v17  ;;  %7553 = vmatprep.mubr.msk.f32.mxu1 %vm8568_vm1, %v8567_v13 }
 0xf06   :  { %7561 = vmatprep.subr.mxu1 %v8567_v13  ;;  %7558 = vmatprep.mubr.msk.f32.mxu0 %vm8568_vm1, %v8567_v13 }
 0xf08   :  { %7554 = vmatmul.mubr.msk.f32.vlgmr.msra.gmra.mrb[22].mxu1 %vm182_vm0, %v2593_v28 }
 0xf09   :  { %7563 = vmatprep.mubr.msk.f32.mxu1 %vm8568_vm1, %v8567_v13 }
 0xfd3   :  { %v9091_v29 = vpop.f32.mrb[32].mxu0 }
 0xfd4   :  { %v7540_v30 = vpop.f32.mrb[33].mxu0 }
 0xfd7   :  { %v9093_v31 = vpop.f32.mrb[20].mxu1  ;;  %v2588_v33 = vpop.f32.mrb[34].mxu0 }
 0xfd8   :  { %v7545_v34 = vpop.f32.mrb[21].mxu1  ;;  %v7550_v37 = vpop.f32.mrb[35].mxu0  ;;  %v2670_v38 = vsel %vm636_vm2, %v2588_v33, -inf }
 0xfd9   :  { %2671 = vmax.xlane.f32.xlu0 %v2670_v38 }
 0xfdb   :  { %v2666_v39 = vpop.f32.mrb[22].mxu1 }
 0xfdc   :  { %v7555_v43 = vpop.f32.mrb[23].mxu1  ;;  %v2673_v44 = vsel %vm636_vm2, %v2666_v39, -inf }
 0xfdd   :  { %2674 = vmax.xlane.f32.xlu1 %v2673_v44 }
 0xfee   :  { %2768 = vrot.lane.b32.xlu1 %v8849_v36, %s8574_s29 }
 0xfef   :  { %2692 = vrot.lane.b32.xlu0 %v8867_v42, %s8574_s29 }
 0xff2   :  { %2857 = vrot.lane.b32.xlu1 %v8847_v35, %s8557_s24 }
 0xff6   :  { %2935 = vrot.lane.b32.xlu1 %v8856_v40, %s8557_s24 }
 0xffa   :  { %2933 = vrot.lane.b32.xlu1 %v8864_v41, %s8557_s24 }
0x1066   :  { %v2672_v45 = vpop.xlane.xlu0 %2671 }
0x1067   :  { %v2676_v46 = vsub.f32 %v2588_v33, %v2672_v45 }
0x1069   :  { %v2678_v47 = vmul.f32 1.442695, %v2676_v46 }
0x106a   :  { %v2675_v49 = vpop.xlane.xlu1 %2674  ;;  %v2693_v53 = vpop.permute.xlu0 %2692 }
0x106b   :  { %8247 = vpow2.f32 %v2678_v47  ;;  %v2677_v54 = vsub.f32 %v2666_v39, %v2675_v49  ;;  %7557 = vmatpush3.msra.mxu0 %v2693_v53 }
0x106c   :  { %7566 = vmatprep.subr.mxu0 %v8567_v13 }
0x106d   :  { %v2680_v55 = vmul.f32 1.442695, %v2677_v54  ;;  %v3198_v54 = vld [vmem:[#allocation10] sm:$0xff] }
0x106e   :  { %v2769_v56 = vpop.permute.xlu1 %2768 }
0x106f   :  { %8249 = vpow2.f32 %v2680_v55  ;;  %7562 = vmatpush3.msra.mxu1 %v2769_v56  ;;  %v3199_v55 = vld [vmem:[#allocation10 + $0x8] sm:$0xff]  ;;  %v3200_v56 = vld [vmem:[#allocation10 + $0x10] sm:$0xff] }
0x1070   :  { %7571 = vmatprep.subr.mxu1 %v8567_v13 }
0x1072   :  { %v2858_v60 = vpop.permute.xlu1 %2857 }
0x1075   :  { %v8248_v35 = vpop.eup %8247 }
0x1076   :  { %v2682_v40 = vsel %vm636_vm2, %v8248_v35, 0.0  ;;  %v2936_v0 = vpop.permute.xlu1 %2935 }
0x1077   :  { %2683 = vadd.xlane.f32.xlu0 %v2682_v40  ;;  %v3201_v40 = vld [vmem:[#allocation10 + $0x18] sm:$0xff] }
0x1079   :  { %v8250_v41 = vpop.eup %8249 }
0x107a   :  { %v2685_v57 = vsel %vm636_vm2, %v8250_v41, 0.0  ;;  %v2934_v4 = vpop.permute.xlu1 %2933 }
0x107b   :  { %2686 = vadd.xlane.f32.xlu0 %v2685_v57  ;;  %v3202_v57 = vld [vmem:[#allocation10 + $0x20] sm:$0xff] }
0x1091   :  { %2855 = vrot.lane.b32.xlu0 %v8845_v32, %s8557_s24 }
0x1104   :  { %v2684_v58 = vpop.xlane.xlu0 %2683 }
0x1105   :  { %8251 = vrcp.f32 %v2684_v58  ;;  %v3203_v58 = vld [vmem:[#allocation10 + $0x28] sm:$0xff] }
0x1108   :  { %v2687_v59 = vpop.xlane.xlu0 %2686 }
0x1109   :  { %8253 = vrcp.f32 %v2687_v59  ;;  %v7927_v59 = vpack.c.bf16 %v3203_v58, %v3202_v57  ;;  %v3352_v57 = vld [vmem:[#allocation11 + $0x68] sm:$0xff]  ;;  %v3354_v58 = vld [vmem:[#allocation11 + $0x78] sm:$0xff] }
0x110c   :  { %v2856_v32 = vpop.permute.xlu0 %2855 }
0x110f   :  { %v8252_v61 = vpop.eup %8251 }
0x1110   :  { %v2689_v62 = vmul.f32 %v8252_v61, %v8248_v35  ;;  %v7919_v35 = vpack.c.bf16 %v3199_v55, %v3198_v54  ;;  %v3205_v61 = vld [vmem:[#allocation10 + $0x38] sm:$0xff] }
0x1112   :  { %7559 = vmatmul.mubr.msk.f32.vlgmr.msra.gmra.mrb[36].mxu0 %vm636_vm2, %v2689_v62 }
0x1113   :  { %v8254_v63 = vpop.eup %8253  ;;  %7567 = vmatpush3.xpose.msk.msra.mxu0 %vm182_vm0, %v2858_v60  ;;  %7568 = vmatprep.mubr.msk.f32.mxu0 %vm8568_vm1, %v8567_v13  ;;  %v3204_v60 = vld [vmem:[#allocation10 + $0x30] sm:$0xff] }
0x1114   :  { %v2691_v2 = vmul.f32 %v8254_v63, %v8250_v41  ;;  %7576 = vmatprep.subr.mxu0 %v8567_v13  ;;  %v7923_v41 = vpack.c.bf16 %v3201_v40, %v3200_v56  ;;  %v7931_v62 = vpack.c.bf16 %v3205_v61, %v3204_v60  ;;  %v3206_v63 = vld [vmem:[#allocation10 + $0x40] sm:$0xff]  ;;  %v3353_v61 = vld [vmem:[#allocation11 + $0x70] sm:$0xff] }
0x1115   :  { %v3351_v60 = vld [vmem:[#allocation11 + $0x60] sm:$0xff] }
0x1116   :  { %7564 = vmatmul.mubr.msk.f32.vlgmr.msra.gmra.mrb[24].mxu1 %vm636_vm2, %v2691_v2  ;;  %7569 = vmatmul.mubr.msk.f32.vlgmr.msra.gmra.mrb[38].mxu0 %vm182_vm0, %v2856_v32  ;;  %v3208_v32 = vld [vmem:[#allocation10 + $0x50] sm:$0xff] }
0x1117   :  { %7572 = vmatpush3.xpose.msk.msra.mxu1 %vm182_vm0, %v2936_v0  ;;  %7573 = vmatprep.mubr.msk.f32.mxu1 %vm8568_vm1, %v8567_v13  ;;  %v3207_v0 = vld [vmem:[#allocation10 + $0x48] sm:$0xff] }
0x1118   :  { %7581 = vmatprep.subr.mxu1 %v8567_v13  ;;  %7578 = vmatprep.mubr.msk.f32.mxu0 %vm8568_vm1, %v8567_v13  ;;  %v7935_v2 = vpack.c.bf16 %v3207_v0, %v3206_v63  ;;  %v3356_v63 = vld [vmem:[#allocation11 + $0x88] sm:$0xff]  ;;  %v3358_v0 = vld [vmem:[#allocation11 + $0x98] sm:$0xff] }
0x111a   :  { %7574 = vmatmul.mubr.msk.f32.vlgmr.msra.gmra.mrb[26].mxu1 %vm182_vm0, %v2934_v4  ;;  %v3209_v4 = vld [vmem:[#allocation10 + $0x58] sm:$0xff] }
0x111b   :  { %7583 = vmatprep.mubr.msk.f32.mxu1 %vm8568_vm1, %v8567_v13 }
0x11e5   :  { %v2764_v5 = vpop.f32.mrb[36].mxu0 }
0x11e6   :  { %v7560_v6 = vpop.f32.mrb[37].mxu0 }
0x11e7   :  { %v3210_v6 = vld [vmem:[#allocation10 + $0x60] sm:$0xff] }
0x11e9   :  { %v2840_v7 = vpop.f32.mrb[24].mxu1  ;;  %v2929_v8 = vpop.f32.mrb[38].mxu0 }
0x11ea   :  { %v7565_v9 = vpop.f32.mrb[25].mxu1  ;;  %v7570_v10 = vpop.f32.mrb[39].mxu0  ;;  %v3011_v11 = vsel %vm636_vm2, %v2929_v8, -inf }
0x11eb   :  { %3012 = vmax.xlane.f32.xlu0 %v3011_v11  ;;  %v3212_v9 = vld [vmem:[#allocation10 + $0x70] sm:$0xff]  ;;  %v3213_v10 = vld [vmem:[#allocation10 + $0x78] sm:$0xff] }
0x11ec   :  { %v7947_v11 = vpack.c.bf16 %v3213_v10, %v3212_v9  ;;  %v3359_v9 = vld [vmem:[#allocation11 + $0xa0] sm:$0xff]  ;;  %v3361_v10 = vld [vmem:[#allocation11 + $0xb0] sm:$0xff] }
0x11ed   :  { %v3007_v12 = vpop.f32.mrb[26].mxu1 }
0x11ee   :  { %v7575_v14 = vpop.f32.mrb[27].mxu1  ;;  %v3014_v15 = vsel %vm636_vm2, %v3007_v12, -inf }
0x11ef   :  { %3015 = vmax.xlane.f32.xlu1 %v3014_v15 }
0x1200   :  { %3109 = vrot.lane.b32.xlu1 %v8849_v36, %s8557_s24 }
0x1204   :  { %1141 = vrot.lane.b32.xlu1 %v8939_v50, %s8557_s24 }
0x1208   :  { %1143 = vrot.lane.b32.xlu1 %v8941_v52, %s8557_s24 }
0x120c   :  { %1484 = vrot.lane.b32.xlu1 %v8979_v25, %s8574_s29 }
0x1210   :  { %1825 = vrot.lane.b32.xlu1 %v9017_v3, %s8573_s6 }
0x1214   :  { %2166 = vrot.lane.b32.xlu1 %v9055_v51, %s8572_s19 }
0x1218   :  { %2507 = vrot.lane.b32.xlu1 %v9093_v31, %s8571_s17 }
0x121c   :  { %2848 = vrot.lane.b32.xlu1 %v2840_v7, %s8570_s25  ;;  %v3211_v7 = vld [vmem:[#allocation10 + $0x68] sm:$0xff] }
0x1278   :  { %v3013_v36 = vpop.xlane.xlu0 %3012 }
0x1279   :  { %v3017_v16 = vsub.f32 %v2929_v8, %v3013_v36  ;;  %v7943_v8 = vpack.c.bf16 %v3211_v7, %v3210_v6  ;;  %v3360_v6 = vld [vmem:[#allocation11 + $0xa8] sm:$0xff]  ;;  %v3362_v7 = vld [vmem:[#allocation11 + $0xb8] sm:$0xff] }
0x127b   :  { %v3019_v50 = vmul.f32 1.442695, %v3017_v16 }
0x127c   :  { %v3016_v17 = vpop.xlane.xlu1 %3015 }
0x127d   :  { %8255 = vpow2.f32 %v3019_v50  ;;  %v3018_v52 = vsub.f32 %v3007_v12, %v3016_v17 }
0x127f   :  { %v3021_v18 = vmul.f32 1.442695, %v3018_v52 }
0x1280   :  { %v3110_v22 = vpop.permute.xlu1 %3109 }
0x1281   :  { %8257 = vpow2.f32 %v3021_v18  ;;  %7582 = vmatpush3.msra.mxu1 %v3110_v22  ;;  %v7038_v18 = vld [vmem:[%s9617_s7] ss:$0 sm:$0xff] }
0x1284   :  { %v1142_v25 = vpop.permute.xlu1 %1141 }
0x1285   :  { %1148 = vst.msk [vmem:[#allocation2] sm:$0xff] %vm1147_vm3, %v1142_v25 }
0x1287   :  { %v8256_v3 = vpop.eup %8255 }
0x1288   :  { %v1144_v51 = vpop.permute.xlu1 %1143  ;;  %v3023_v28 = vsel %vm636_vm2, %v8256_v3, 0.0 }
0x1289   :  { %1149 = vst.msk [vmem:[#allocation2 + $0x8] sm:$0xff] %vm1147_vm3, %v1144_v51  ;;  %3024 = vadd.xlane.f32.xlu0 %v3023_v28 }
0x128b   :  { %v8258_v30 = vpop.eup %8257 }
0x128c   :  { %v1485_v31 = vpop.permute.xlu1 %1484  ;;  %v3026_v33 = vsel %vm636_vm2, %v8258_v30, 0.0 }
0x128d   :  { %1490 = vst.msk [vmem:[#allocation2 + $0x8] sm:$0xff] %vm1488_vm4, %v1485_v31  ;;  %3027 = vadd.xlane.f32.xlu0 %v3026_v33  ;;  %v3340_v31 = vld [vmem:[#allocation11 + $0x8] sm:$0xff]  ;;  %v3342_v33 = vld [vmem:[#allocation11 + $0x18] sm:$0xff] }
0x1290   :  { %v1826_v34 = vpop.permute.xlu1 %1825 }
0x1291   :  { %1831 = vst.msk [vmem:[#allocation2 + $0x8] sm:$0xff] %vm1829_vm5, %v1826_v34  ;;  %v3339_v34 = vld [vmem:[#allocation11] sm:$0xff] }
0x1294   :  { %v2167_v37 = vpop.permute.xlu1 %2166 }
0x1295   :  { %2172 = vst.msk [vmem:[#allocation2 + $0x8] sm:$0xff] %vm2170_vm6, %v2167_v37  ;;  %v7951_v37 = vpack.c.bf16 %v3342_v33, %v3340_v31  ;;  %v3465_v33 = vld [vmem:[#allocation13 + $0x8] sm:$0xff] }
0x1297   :  { %7952 = vmatprep.subr.bf16.mxu1 %v7951_v37  ;;  %v3483_v37 = vld [vmem:[#allocation13 + $0x98] sm:$0xff] }
0x1298   :  { %v2508_v38 = vpop.permute.xlu1 %2507 }
0x1299   :  { %2513 = vst.msk [vmem:[#allocation2 + $0x8] sm:$0xff] %vm2511_vm7, %v2508_v38  ;;  %v3341_v38 = vld [vmem:[#allocation11 + $0x10] sm:$0xff] }
0x129c   :  { %v2849_v39 = vpop.permute.xlu1 %2848 }
0x129d   :  { %2854 = vst.msk [vmem:[#allocation2 + $0x8] sm:$0xff] %vm2852_vm8, %v2849_v39  ;;  %v3344_v39 = vld [vmem:[#allocation11 + $0x28] sm:$0xff] }
0x12a3   :  { %3033 = vrot.lane.b32.xlu0 %v8867_v42, %s8557_s24 }
0x12a7   :  { %1482 = vrot.lane.b32.xlu0 %v8977_v19, %s8574_s29 }
0x12ab   :  { %1823 = vrot.lane.b32.xlu0 %v9015_v1, %s8573_s6 }
0x12af   :  { %2164 = vrot.lane.b32.xlu0 %v9053_v48, %s8572_s19 }
0x12b3   :  { %2505 = vrot.lane.b32.xlu0 %v9091_v29, %s8571_s17 }
0x12b7   :  { %2846 = vrot.lane.b32.xlu0 %v2764_v5, %s8570_s25  ;;  %v7939_v5 = vpack.c.bf16 %v3209_v4, %v3208_v32  ;;  %v3355_v32 = vld [vmem:[#allocation11 + $0x80] sm:$0xff]  ;;  %v3357_v4 = vld [vmem:[#allocation11 + $0x90] sm:$0xff] }
0x1316   :  { %v3025_v43 = vpop.xlane.xlu0 %3024 }
0x1317   :  { %8259 = vrcp.f32 %v3025_v43  ;;  %v3346_v43 = vld [vmem:[#allocation11 + $0x38] sm:$0xff] }
0x131a   :  { %v3028_v44 = vpop.xlane.xlu0 %3027 }
0x131b   :  { %8261 = vrcp.f32 %v3028_v44  ;;  %v7953_v44 = vpack.c.bf16 %v3341_v38, %v3339_v34  ;;  %v3482_v34 = vld [vmem:[#allocation13 + $0x90] sm:$0xff] }
0x131e   :  { %v3034_v45 = vpop.permute.xlu0 %3033 }
0x131f   :  { %7577 = vmatpush3.msra.mxu0 %v3034_v45  ;;  %v7955_v45 = vpack.c.bf16 %v3346_v43, %v3344_v39  ;;  %v7987_v39 = vpack.c.bf16 %v3483_v37, %v3482_v34  ;;  %v3466_v43 = vld [vmem:[#allocation13 + $0x10] sm:$0xff] }
0x1320   :  { %7920 = vmatprep.subr.bf16.mxu0 %v7919_v35 }
0x1321   :  { %v8260_v42 = vpop.eup %8259 }
0x1322   :  { %v1483_v46 = vpop.permute.xlu0 %1482  ;;  %v3030_v19 = vmul.f32 %v8260_v42, %v8256_v3  ;;  %v3343_v42 = vld [vmem:[#allocation11 + $0x20] sm:$0xff] }
0x1323   :  { %1489 = vst.msk [vmem:[#allocation2] sm:$0xff] %vm1488_vm4, %v1483_v46  ;;  %v3345_v46 = vld [vmem:[#allocation11 + $0x30] sm:$0xff] }
0x1324   :  { %7579 = vmatmul.mubr.msk.f32.vlgmr.msra.gmra.mrb[40].mxu0 %vm636_vm2, %v3030_v19  ;;  %v3348_v19 = vld [vmem:[#allocation11 + $0x48] sm:$0xff] }
0x1325   :  { %v8262_v1 = vpop.eup %8261  ;;  %7922 = vmatpush3.bf16.msra.mxu0 %v7919_v35 }
0x1326   :  { %v1824_v48 = vpop.permute.xlu0 %1823  ;;  %v3032_v47 = vmul.f32 %v8262_v1, %v8258_v30  ;;  %7924 = vmatprep.subr.bf16.mxu0 %v7923_v41  ;;  %v3350_v1 = vld [vmem:[#allocation11 + $0x58] sm:$0xff] }
0x1327   :  { %1830 = vst.msk [vmem:[#allocation2] sm:$0xff] %vm1829_vm5, %v1824_v48  ;;  %v3347_v48 = vld [vmem:[#allocation11 + $0x40] sm:$0xff] }
0x1328   :  { %7584 = vmatmul.mubr.msk.f32.vlgmr.msra.gmra.mrb[28].mxu1 %vm636_vm2, %v3032_v47  ;;  %v3349_v47 = vld [vmem:[#allocation11 + $0x50] sm:$0xff] }
0x1329   :  { %3447 = vmatprep.mubr.f32.mxu1 %v8567_v13  ;;  %7926 = vmatpush3.bf16.msra.mxu0 %v7923_v41 }
0x132a   :  { %v2165_v29 = vpop.permute.xlu0 %2164  ;;  %7928 = vmatprep.subr.bf16.mxu0 %v7927_v59  ;;  %7954 = vmatpush1.bf16.msra.mxu1 %v7953_v44  ;;  %v3467_v44 = vld [vmem:[#allocation13 + $0x18] sm:$0xff] }
0x132b   :  { %2171 = vst.msk [vmem:[#allocation2] sm:$0xff] %vm2170_vm6, %v2165_v29  ;;  %7956 = vmatprep.subr.bf16.mxu1 %v7955_v45  ;;  %v7961_v29 = vpack.c.bf16 %v3349_v47, %v3347_v48  ;;  %v3484_v45 = vld [vmem:[#allocation13 + $0xa0] sm:$0xff]  ;;  %v3487_v48 = vld [vmem:[#allocation13 + $0xb8] sm:$0xff] }
0x132d   :  { %7930 = vmatpush3.bf16.msra.mxu0 %v7927_v59  ;;  %v7963_v59 = vpack.c.bf16 %v3354_v58, %v3352_v57  ;;  %v3472_v57 = vld [vmem:[#allocation13 + $0x40] sm:$0xff]  ;;  %v3473_v58 = vld [vmem:[#allocation13 + $0x48] sm:$0xff] }
0x132e   :  { %v2506_v49 = vpop.permute.xlu0 %2505  ;;  %7932 = vmatprep.subr.bf16.mxu0 %v7931_v62 }
0x132f   :  { %2512 = vst.msk [vmem:[#allocation2] sm:$0xff] %vm2511_vm7, %v2506_v49 }
0x1331   :  { %7934 = vmatpush3.bf16.msra.mxu0 %v7931_v62  ;;  %v7965_v62 = vpack.c.bf16 %v3353_v61, %v3351_v60  ;;  %v3491_v60 = vld [vmem:[#allocation13 + $0xd8] sm:$0xff]  ;;  %v8001_v61 = vpack.c.bf16 %v3473_v58, %v3472_v57 }
0x1332   :  { %v2847_v53 = vpop.permute.xlu0 %2846  ;;  %7936 = vmatprep.subr.bf16.mxu0 %v7935_v2 }
0x1333   :  { %2853 = vst.msk [vmem:[#allocation2] sm:$0xff] %vm2852_vm8, %v2847_v53 }
0x1335   :  { %7938 = vmatpush3.bf16.msra.mxu0 %v7935_v2  ;;  %v7967_v2 = vpack.c.bf16 %v3358_v0, %v3356_v63  ;;  %v3474_v63 = vld [vmem:[#allocation13 + $0x50] sm:$0xff]  ;;  %v3475_v0 = vld [vmem:[#allocation13 + $0x58] sm:$0xff] }
0x1336   :  { %7940 = vmatprep.subr.bf16.mxu0 %v7939_v5 }
0x1339   :  { %7942 = vmatpush3.bf16.msra.mxu0 %v7939_v5  ;;  %v7969_v5 = vpack.c.bf16 %v3357_v4, %v3355_v32  ;;  %v3493_v32 = vld [vmem:[#allocation13 + $0xe8] sm:$0xff]  ;;  %v8005_v4 = vpack.c.bf16 %v3475_v0, %v3474_v63  ;;  %v3621_v63 = vld [vmem:[#allocation8 + $0x180] sm:$0xff] }
0x133a   :  { %7944 = vmatprep.subr.bf16.mxu0 %v7943_v8 }
0x133d   :  { %7946 = vmatpush3.bf16.msra.mxu0 %v7943_v8  ;;  %v7971_v8 = vpack.c.bf16 %v3362_v7, %v3360_v6 }
0x133e   :  { %7948 = vmatprep.subr.bf16.mxu0 %v7947_v11 }
0x1341   :  { %7950 = vmatpush3.bf16.msra.mxu0 %v7947_v11  ;;  %v3364_v11 = vld [vmem:[#allocation11 + $0xc8] sm:$0xff] }
0x13f7   :  { %v3105_v12 = vpop.f32.mrb[40].mxu0 }
0x13f8   :  { %3187 = vrot.lane.b32.xlu0 %v3105_v12, %s8569_s8  ;;  %v7580_v14 = vpop.f32.mrb[41].mxu0  ;;  %v7973_v12 = vpack.c.bf16 %v3361_v10, %v3359_v9 }
0x13f9   :  { %v3366_v14 = vld [vmem:[#allocation11 + $0xd8] sm:$0xff] }
0x13fb   :  { %v3181_v15 = vpop.f32.mrb[28].mxu1 }
0x13fc   :  { %3189 = vrot.lane.b32.xlu1 %v3181_v15, %s8569_s8  ;;  %v7585_v36 = vpop.f32.mrb[29].mxu1  ;;  %v3363_v15 = vld [vmem:[#allocation11 + $0xc0] sm:$0xff] }
0x13fd   :  { %v3365_v36 = vld [vmem:[#allocation11 + $0xd0] sm:$0xff] }
0x146a   :  { %v3188_v16 = vpop.permute.xlu0 %3187 }
0x146b   :  { %3194 = vst.msk [vmem:[#allocation2] sm:$0xff] %vm3193_vm9, %v3188_v16  ;;  %v7975_v16 = vpack.c.bf16 %v3366_v14, %v3364_v11  ;;  %v7039_v14 = vld [vmem:[%s9622_s12] ss:$0 sm:$0xff] }
0x146e   :  { %v3190_v50 = vpop.permute.xlu1 %3189 }
0x146f   :  { %3195 = vst.msk [vmem:[#allocation2 + $0x8] sm:$0xff] %vm3193_vm9, %v3190_v50  ;;  %v3368_v50 = vld [vmem:[#allocation11 + $0xe8] sm:$0xff] }
0x1472   :  { %v3196_v17 = vld [vmem:[#allocation2] sm:$0xff] }
0x1473   :  { %7618 = vmatprep.mubr.f32.mxu0 %v3196_v17  ;;  %v3370_v17 = vld [vmem:[#allocation11 + $0xf8] sm:$0xff] }
0x1476   :  { %v3197_v52 = vld [vmem:[#allocation2 + $0x8] sm:$0xff] }
0x1477   :  { %7619 = vmatmul.mubr.f32.vlgmr.msra.gmra.mrb[42].mxu0 %v3197_v52  ;;  %v7977_v52 = vpack.c.bf16 %v3365_v36, %v3363_v15  ;;  %v7040_v36 = vld [vmem:[#allocation14] ss:$0 sm:$0xff] }
0x154a   :  { %v7620_v22 = vpop.f32.mrb[42].mxu0 }
0x154b   :  { %v3293_v25 = vadd.f32 %v7620_v22, %v7038_v18  ;;  %v3287_v3 = vpop.f32.mrb[43].mxu0  ;;  %v3367_v22 = vld [vmem:[#allocation11 + $0xe0] sm:$0xff] }
0x154c   :  { %v3288_v51 = vadd.f32 %v7038_v18, %v3287_v3  ;;  %v7979_v18 = vpack.c.bf16 %v3370_v17, %v3368_v50 }
0x154d   :  { %v3297_v28 = vadd.f32 %v3293_v25, %v8818_v21  ;;  %v7957_v21 = vpack.c.bf16 %v3345_v46, %v3343_v42  ;;  %v3369_v25 = vld [vmem:[#allocation11 + $0xf0] sm:$0xff]  ;;  %v3485_v42 = vld [vmem:[#allocation13 + $0xa8] sm:$0xff]  ;;  %v7989_v46 = vpack.c.bf16 %v3467_v44, %v3466_v43 }
0x154e   :  { %v3296_v30 = vadd.f32 %v3288_v51, %v8816_v20  ;;  %v7959_v20 = vpack.c.bf16 %v3350_v1, %v3348_v19  ;;  %v7981_v3 = vpack.c.bf16 %v3369_v25, %v3367_v22  ;;  %v3480_v51 = vld [vmem:[#allocation13 + $0x80] sm:$0xff]  ;;  %v7991_v19 = vpack.c.bf16 %v3485_v42, %v3484_v45 }
0x154f   :  { %3302 = vadd.xlane.f32.xlu1 %v3297_v28  ;;  %7958 = vmatpush1.bf16.msra.mxu1 %v7957_v21  ;;  %v3468_v1 = vld [vmem:[#allocation13 + $0x20] sm:$0xff]  ;;  %v3469_v21 = vld [vmem:[#allocation13 + $0x28] sm:$0xff] }
0x1550   :  { %3300 = vadd.xlane.f32.xlu0 %v3296_v30  ;;  %7960 = vmatprep.subr.bf16.mxu1 %v7959_v20  ;;  %v3486_v20 = vld [vmem:[#allocation13 + $0xb0] sm:$0xff]  ;;  %v7993_v47 = vpack.c.bf16 %v3469_v21, %v3468_v1  ;;  %v3476_v25 = vld [vmem:[#allocation13 + $0x60] sm:$0xff] }
0x1553   :  { %7962 = vmatpush1.bf16.msra.mxu1 %v7961_v29  ;;  %v7995_v29 = vpack.c.bf16 %v3487_v48, %v3486_v20 }
0x1554   :  { %7964 = vmatprep.subr.bf16.mxu1 %v7963_v59  ;;  %v3490_v59 = vld [vmem:[#allocation13 + $0xd0] sm:$0xff] }
0x1557   :  { %7966 = vmatpush1.bf16.msra.mxu1 %v7965_v62  ;;  %v8003_v62 = vpack.c.bf16 %v3491_v60, %v3490_v59 }
0x1558   :  { %7968 = vmatprep.subr.bf16.mxu1 %v7967_v2  ;;  %v3492_v2 = vld [vmem:[#allocation13 + $0xe0] sm:$0xff] }
0x155b   :  { %7970 = vmatpush1.bf16.msra.mxu1 %v7969_v5  ;;  %v8007_v5 = vpack.c.bf16 %v3493_v32, %v3492_v2  ;;  %v3624_v2 = vld [vmem:[#allocation8 + $0x198] sm:$0xff] }
0x155c   :  { %7972 = vmatprep.subr.bf16.mxu1 %v7971_v8  ;;  %v3628_v32 = vld [vmem:[#allocation8 + $0x1b8] sm:$0xff] }
0x155f   :  { %7974 = vmatpush1.bf16.msra.mxu1 %v7973_v12 }
0x1560   :  { %7976 = vmatprep.subr.bf16.mxu1 %v7975_v16 }
0x1563   :  { %7978 = vmatpush1.bf16.msra.mxu1 %v7977_v52 }
0x1564   :  { %7980 = vmatprep.subr.bf16.mxu1 %v7979_v18 }
0x1567   :  { %7982 = vmatpush1.bf16.msra.mxu1 %v7981_v3  ;;  %v3477_v3 = vld [vmem:[#allocation13 + $0x68] sm:$0xff] }
0x15dc   :  { %v3303_v49 = vpop.xlane.xlu1 %3302 }
0x15dd   :  { %v3301_v53 = vpop.xlane.xlu0 %3300  ;;  %v3306_v54 = vmul.f32 0.0078125, %v3303_v49  ;;  %v3470_v49 = vld [vmem:[#allocation13 + $0x30] sm:$0xff] }
0x15de   :  { %v3305_v55 = vmul.f32 0.0078125, %v3301_v53  ;;  %v3471_v53 = vld [vmem:[#allocation13 + $0x38] sm:$0xff] }
0x15df   :  { %v9187_v40 = vsub.f32 %v3297_v28, %v3306_v54  ;;  %v3481_v28 = vld [vmem:[#allocation13 + $0x88] sm:$0xff]  ;;  %v3488_v54 = vld [vmem:[#allocation13 + $0xc0] sm:$0xff] }
0x15e0   :  { %v9183_v56 = vsub.f32 %v3296_v30, %v3305_v55  ;;  %v3464_v30 = vld [vmem:[#allocation13] sm:$0xff]  ;;  %v7983_v31 = vpack.c.bf16 %v3481_v28, %v3480_v51  ;;  %v3489_v55 = vld [vmem:[#allocation13 + $0xc8] sm:$0xff]  ;;  %v8009_v51 = vpack.c.bf16 %v3477_v3, %v3476_v25  ;;  %v3494_v28 = vld [vmem:[#allocation13 + $0xf0] sm:$0xff] }
0x15e1   :  { %v3310_v41 = vmul.f32 %v9187_v40, %v9187_v40  ;;  %v7985_v38 = vpack.c.bf16 %v3465_v33, %v3464_v30  ;;  %v3479_v33 = vld [vmem:[#allocation13 + $0x78] sm:$0xff] }
0x15e2   :  { %v3309_v35 = vmul.f32 %v9183_v56, %v9183_v56  ;;  %7984 = vmatprep.subr.bf16.mxu0 %v7983_v31  ;;  %v3478_v31 = vld [vmem:[#allocation13 + $0x70] sm:$0xff] }
0x15e3   :  { %7986 = vmatpush3.bf16.msra.mxu0 %v7985_v38  ;;  %v8013_v34 = vpack.c.bf16 %v3479_v33, %v3478_v31 }
0x15e4   :  { %3311 = vadd.xlane.f32.xlu0 %v3309_v35  ;;  %7988 = vmatprep.subr.bf16.mxu0 %v7987_v39  ;;  %v7997_v35 = vpack.c.bf16 %v3471_v53, %v3470_v49  ;;  %v7041_v49 = vld [vmem:[%s9621_s11] ss:$0 sm:$0xff] }
0x15e7   :  { %7990 = vmatpush3.bf16.msra.mxu0 %v7989_v46 }
0x15e8   :  { %3313 = vadd.xlane.f32.xlu0 %v3310_v41  ;;  %7992 = vmatprep.subr.bf16.mxu0 %v7991_v19  ;;  %v7999_v41 = vpack.c.bf16 %v3489_v55, %v3488_v54 }
0x15eb   :  { %7994 = vmatpush3.bf16.msra.mxu0 %v7993_v47 }
0x15ec   :  { %7996 = vmatprep.subr.bf16.mxu0 %v7995_v29 }
0x15ef   :  { %7998 = vmatpush3.bf16.msra.mxu0 %v7997_v35 }
0x15f0   :  { %8000 = vmatprep.subr.bf16.mxu0 %v7999_v41 }
0x15f3   :  { %8002 = vmatpush3.bf16.msra.mxu0 %v8001_v61  ;;  %v3622_v61 = vld [vmem:[#allocation8 + $0x188] sm:$0xff] }
0x15f4   :  { %8004 = vmatprep.subr.bf16.mxu0 %v8003_v62  ;;  %v3625_v62 = vld [vmem:[#allocation8 + $0x1a0] sm:$0xff] }
0x15f5   :  { %v8015_v0 = vpack.c.bf16 %v3625_v62, %v3622_v61  ;;  %v3658_v61 = vld [vmem:[#allocation8 + $0x2a8] sm:$0xff]  ;;  %v3661_v62 = vld [vmem:[#allocation8 + $0x2c0] sm:$0xff] }
0x15f7   :  { %8006 = vmatpush3.bf16.msra.mxu0 %v8005_v4  ;;  %v3631_v4 = vld [vmem:[#allocation8 + $0x1d0] sm:$0xff]  ;;  %8016 = vmatprep.subr.bf16.mxu1 %v8015_v0  ;;  %v8039_v0 = vpack.c.bf16 %v3661_v62, %v3658_v61 }
0x15f8   :  { %8008 = vmatprep.subr.bf16.mxu0 %v8007_v5  ;;  %v8017_v5 = vpack.c.bf16 %v3624_v2, %v3621_v63  ;;  %v3653_v63 = vld [vmem:[#allocation8 + $0x280] sm:$0xff]  ;;  %v3656_v2 = vld [vmem:[#allocation8 + $0x298] sm:$0xff] }
0x15fb   :  { %8010 = vmatpush3.bf16.msra.mxu0 %v8009_v51 }
0x1671   :  { %v3312_v6 = vpop.xlane.xlu0 %3311 }
0x1672   :  { %v3315_v7 = vmul.f32 0.0078125, %v3312_v6  ;;  %v8019_v6 = vpack.c.bf16 %v3631_v4, %v3628_v32  ;;  %v3657_v32 = vld [vmem:[#allocation8 + $0x2a0] sm:$0xff]  ;;  %v3660_v4 = vld [vmem:[#allocation8 + $0x2b8] sm:$0xff] }
0x1674   :  { %v3317_v8 = vadd.f32 1e-05, %v3315_v7  ;;  %v3623_v7 = vld [vmem:[#allocation8 + $0x190] sm:$0xff] }
0x1675   :  { %v3314_v9 = vpop.xlane.xlu0 %3313 }
0x1676   :  { %8263 = vrsqrt.f32 %v3317_v8  ;;  %v3316_v10 = vmul.f32 0.0078125, %v3314_v9  ;;  %v3626_v8 = vld [vmem:[#allocation8 + $0x1a8] sm:$0xff]  ;;  %v3627_v9 = vld [vmem:[#allocation8 + $0x1b0] sm:$0xff] }
0x1678   :  { %v3318_v11 = vadd.f32 1e-05, %v3316_v10  ;;  %v8047_v10 = vpack.c.bf16 %v3626_v8, %v3623_v7  ;;  %v3664_v7 = vld [vmem:[#allocation8 + $0x2d8] sm:$0xff]  ;;  %v3667_v8 = vld [vmem:[#allocation8 + $0x2f0] sm:$0xff] }
0x167a   :  { %8265 = vrsqrt.f32 %v3318_v11  ;;  %v3630_v11 = vld [vmem:[#allocation8 + $0x1c8] sm:$0xff] }
0x1680   :  { %v8264_v12 = vpop.eup %8263 }
0x1681   :  { %v3321_v15 = vmul.f32 %v8264_v12, %v9183_v56  ;;  %v3495_v56 = vld [vmem:[#allocation13 + $0xf8] sm:$0xff]  ;;  %v3634_v12 = vld [vmem:[#allocation8 + $0x1e8] sm:$0xff] }
0x1682   :  { %v8011_v30 = vpack.c.bf16 %v3495_v56, %v3494_v28 }
0x1683   :  { %v3329_v16 = vmul.f32 %v7039_v14, %v3321_v15  ;;  %v8021_v15 = vpack.c.bf16 %v3630_v11, %v3627_v9  ;;  %v3659_v9 = vld [vmem:[#allocation8 + $0x2b0] sm:$0xff]  ;;  %v3662_v11 = vld [vmem:[#allocation8 + $0x2c8] sm:$0xff] }
0x1684   :  { %v8266_v50 = vpop.eup %8265  ;;  %8012 = vmatprep.subr.bf16.mxu0 %v8011_v30 }
0x1685   :  { %v3337_v17 = vadd.f32 %v7040_v36, %v3329_v16  ;;  %v3322_v52 = vmul.f32 %v8266_v50, %v9187_v40  ;;  %8014 = vmatpush3.bf16.msra.mxu0 %v8013_v34  ;;  %v3371_v40 = vld [vmem:[%s9619_s9] sm:$0x3]  ;;  %v3632_v16 = vld [vmem:[#allocation8 + $0x1d8] sm:$0xff] }
0x1686   :  { %v3376_v37 = vrot.slane %v3371_v40, %v8832_v24  ;;  %v3380_v38 = vrot.slane %v3371_v40, %v8838_v26  ;;  %8048 = vmatprep.subr.bf16.mxu0 %v8047_v10  ;;  %v3640_v34 = vld [vmem:[#allocation8 + $0x218] sm:$0xff]  ;;  %v3643_v40 = vld [vmem:[#allocation8 + $0x230] sm:$0xff] }
0x1687   :  { %3448 = vmatmul.mubr.f32.vlgmr.msra.gmra.mrb[30].mxu1 %v3337_v17  ;;  %v3330_v18 = vmul.f32 %v7039_v14, %v3322_v52  ;;  %v3637_v14 = vld [vmem:[#allocation8 + $0x200] sm:$0xff] }
0x1688   :  { %3453 = vmatprep.mubr.f32.mxu1 %v8567_v13  ;;  %8018 = vmatpush1.bf16.msra.mxu1 %v8017_v5  ;;  %v8023_v50 = vpack.c.bf16 %v3637_v14, %v3634_v12  ;;  %v3633_v52 = vld [vmem:[#allocation8 + $0x1e0] sm:$0xff]  ;;  %v8067_v5 = vpack.c.bf16 %v3656_v2, %v3653_v63  ;;  %v3663_v12 = vld [vmem:[#allocation8 + $0x2d0] sm:$0xff]  ;;  %v3666_v14 = vld [vmem:[#allocation8 + $0x2e8] sm:$0xff] }
0x1689   :  { %v3338_v22 = vadd.f32 %v7040_v36, %v3330_v18  ;;  %v3629_v36 = vld [vmem:[#allocation8 + $0x1c0] sm:$0xff]  ;;  %8020 = vmatprep.subr.bf16.mxu1 %v8019_v6  ;;  %v3636_v18 = vld [vmem:[#allocation8 + $0x1f8] sm:$0xff]  ;;  %v8041_v6 = vpack.c.bf16 %v3660_v4, %v3657_v32 }
0x168b   :  { %3454 = vmatmul.mubr.f32.gmra.mrb[32].mxu1 %v3338_v22 }
0x168c   :  { %3751 = vmatprep.mubr.f32.mxu1 %v8567_v13  ;;  %8022 = vmatpush1.bf16.msra.mxu1 %v8021_v15  ;;  %v8071_v15 = vpack.c.bf16 %v3662_v11, %v3659_v9 }
0x168d   :  { %8024 = vmatprep.subr.bf16.mxu1 %v8023_v50  ;;  %v3668_v50 = vld [vmem:[#allocation8 + $0x2f8] sm:$0xff] }
0x175a   :  { %v3449_v39 = vpop.f32.mrb[30].mxu1 }
0x175b   :  { %v3450_v43 = vadd.f32 %v3449_v39, %v3376_v37  ;;  %v3451_v44 = vpop.f32.mrb[31].mxu1  ;;  %v3638_v39 = vld [vmem:[#allocation8 + $0x208] sm:$0xff] }
0x175c   :  { %v3452_v45 = vadd.f32 %v3451_v44, %v3380_v38  ;;  %v3642_v44 = vld [vmem:[#allocation8 + $0x228] sm:$0xff] }
0x175d   :  { %v3460_v19 = vmax.f32 %v3450_v43, 0.0  ;;  %v3639_v43 = vld [vmem:[#allocation8 + $0x210] sm:$0xff] }
0x175e   :  { %v3461_v42 = vmax.f32 %v3452_v45, 0.0  ;;  %v3455_v46 = vpop.f32.mrb[32].mxu1 }
0x175f   :  { %v3456_v1 = vadd.f32 %v3455_v46, %v3376_v37  ;;  %v3457_v21 = vpop.f32.mrb[33].mxu1  ;;  %v3635_v37 = vld [vmem:[#allocation8 + $0x1f0] sm:$0xff]  ;;  %v3646_v46 = vld [vmem:[#allocation8 + $0x248] sm:$0xff] }
0x1760   :  { %v3458_v20 = vadd.f32 %v3457_v21, %v3380_v38  ;;  %3567 = vmatprep.mubr.f32.mxu0 %v3461_v42  ;;  %v8027_v38 = vpack.c.bf16 %v3643_v40, %v3640_v34  ;;  %v8055_v45 = vpack.c.bf16 %v3638_v39, %v3635_v37  ;;  %v8029_v42 = vpack.c.bf16 %v3642_v44, %v3639_v43  ;;  %v7043_v34 = vld [vmem:[#allocation16] ss:$0 sm:$0xff] }
0x1761   :  { %3568 = vmatmul.mubr.f32.vlgmr.msra.gmra.mrb[44].mxu0 %v3460_v19  ;;  %v3462_v47 = vmax.f32 %v3456_v1, 0.0  ;;  %v3649_v19 = vld [vmem:[#allocation8 + $0x260] sm:$0xff] }
0x1762   :  { %v3463_v48 = vmax.f32 %v3458_v20, 0.0  ;;  %8050 = vmatpush3.bf16.msra.mxu0 %v8047_v10  ;;  %v3641_v1 = vld [vmem:[#allocation8 + $0x220] sm:$0xff]  ;;  %v8031_v21 = vpack.c.bf16 %v3649_v19, %v3646_v46  ;;  %v3644_v20 = vld [vmem:[#allocation8 + $0x238] sm:$0xff]  ;;  %v8043_v10 = vpack.c.bf16 %v3667_v8, %v3664_v7 }
0x1764   :  { %3572 = vmatprep.mubr.f32.mxu0 %v3463_v48  ;;  %v3645_v48 = vld [vmem:[#allocation8 + $0x240] sm:$0xff] }
0x1765   :  { %3573 = vmatmul.mubr.f32.gmra.mrb[46].mxu0 %v3462_v47  ;;  %v3648_v47 = vld [vmem:[#allocation8 + $0x258] sm:$0xff] }
0x1834   :  { %v7240_v29 = vpop.f32.mrb[44].mxu0 }
0x1835   :  { %v7241_v53 = vpop.f32.mrb[45].mxu0 }
0x1836   :  { %v7242_v54 = vadd.f32 %v7241_v53, %v7240_v29  ;;  %v8059_v29 = vpack.c.bf16 %v3644_v20, %v3641_v1  ;;  %v3652_v53 = vld [vmem:[#allocation8 + $0x278] sm:$0xff] }
0x1838   :  { %v3570_v55 = vadd.f32 %v7242_v54, %v7041_v49  ;;  %v7243_v35 = vpop.f32.mrb[46].mxu0  ;;  %v3655_v54 = vld [vmem:[#allocation8 + $0x290] sm:$0xff] }
0x1839   :  { %v7244_v41 = vpop.f32.mrb[47].mxu0 }
0x183a   :  { %v7245_v57 = vadd.f32 %v7244_v41, %v7243_v35  ;;  %v3578_v58 = vadd.f32 %v3570_v55, %v3337_v17  ;;  %v8051_v17 = vpack.c.bf16 %v3632_v16, %v3629_v36  ;;  %v3647_v55 = vld [vmem:[#allocation8 + $0x250] sm:$0xff]  ;;  %v8035_v35 = vpack.c.bf16 %v3655_v54, %v3652_v53  ;;  %v3650_v41 = vld [vmem:[#allocation8 + $0x268] sm:$0xff]  ;;  %v3665_v16 = vld [vmem:[#allocation8 + $0x2e0] sm:$0xff] }
0x183b   :  { %v8045_v36 = vpack.c.bf16 %v3666_v14, %v3663_v12 }
0x183c   :  { %v3575_v59 = vadd.f32 %v7245_v57, %v7041_v49  ;;  %3582 = vadd.xlane.f32.xlu0 %v3578_v58  ;;  %8052 = vmatprep.subr.bf16.mxu0 %v8051_v17  ;;  %v8033_v49 = vpack.c.bf16 %v3648_v47, %v3645_v48  ;;  %v3651_v57 = vld [vmem:[#allocation8 + $0x270] sm:$0xff] }
0x183d   :  { %8054 = vmatpush3.bf16.msra.mxu0 %v8051_v17  ;;  %v8075_v17 = vpack.c.bf16 %v3668_v50, %v3665_v16 }
0x183e   :  { %v3579_v60 = vadd.f32 %v3575_v59, %v3338_v22  ;;  %v8025_v22 = vpack.c.bf16 %v3636_v18, %v3633_v52  ;;  %8056 = vmatprep.subr.bf16.mxu0 %v8055_v45  ;;  %v8063_v59 = vpack.c.bf16 %v3650_v41, %v3647_v55 }
0x1840   :  { %3584 = vadd.xlane.f32.xlu1 %v3579_v60  ;;  %8026 = vmatpush1.bf16.msra.mxu1 %v8025_v22 }
0x1841   :  { %8028 = vmatprep.subr.bf16.mxu1 %v8027_v38  ;;  %8058 = vmatpush3.bf16.msra.mxu0 %v8055_v45 }
0x1842   :  { %8060 = vmatprep.subr.bf16.mxu0 %v8059_v29 }
0x1844   :  { %8030 = vmatpush1.bf16.msra.mxu1 %v8029_v42 }
0x1845   :  { %8032 = vmatprep.subr.bf16.mxu1 %v8031_v21  ;;  %8062 = vmatpush3.bf16.msra.mxu0 %v8059_v29 }
0x1846   :  { %8064 = vmatprep.subr.bf16.mxu0 %v8063_v59 }
0x1848   :  { %8034 = vmatpush1.bf16.msra.mxu1 %v8033_v49 }
0x1849   :  { %8036 = vmatprep.subr.bf16.mxu1 %v8035_v35  ;;  %8066 = vmatpush3.bf16.msra.mxu0 %v8063_v59 }
0x184a   :  { %8068 = vmatprep.subr.bf16.mxu0 %v8067_v5 }
0x184d   :  { %8070 = vmatpush3.bf16.msra.mxu0 %v8067_v5 }
0x184e   :  { %8072 = vmatprep.subr.bf16.mxu0 %v8071_v15 }
0x1851   :  { %8074 = vmatpush3.bf16.msra.mxu0 %v8071_v15 }
0x1852   :  { %8076 = vmatprep.subr.bf16.mxu0 %v8075_v17 }
0x1855   :  { %8078 = vmatpush3.bf16.msra.mxu0 %v8075_v17 }
0x1856   :  { %7691 = vmatprep.subr.mxu0 %v8567_v13 }
0x18c9   :  { %v3583_v25 = vpop.xlane.xlu0 %3582 }
0x18ca   :  { %v3586_v3 = vmul.f32 0.0078125, %v3583_v25 }
0x18cc   :  { %v9206_v51 = vsub.f32 %v3578_v58, %v3586_v3  ;;  %v3654_v58 = vld [vmem:[#allocation8 + $0x288] sm:$0xff] }
0x18cd   :  { %v3585_v28 = vpop.xlane.xlu1 %3584 }
0x18ce   :  { %v3587_v56 = vmul.f32 0.0078125, %v3585_v28  ;;  %v3590_v30 = vmul.f32 %v9206_v51, %v9206_v51 }
0x18d0   :  { %3592 = vadd.xlane.f32.xlu0 %v3590_v30  ;;  %v9210_v31 = vsub.f32 %v3579_v60, %v3587_v56  ;;  %v8037_v60 = vpack.c.bf16 %v3654_v58, %v3651_v57  ;;  %v7042_v30 = vld [vmem:[%s9624_s14] ss:$0 sm:$0xff] }
0x18d2   :  { %v3591_v33 = vmul.f32 %v9210_v31, %v9210_v31  ;;  %8038 = vmatpush1.bf16.msra.mxu1 %v8037_v60 }
0x18d3   :  { %8040 = vmatprep.subr.bf16.mxu1 %v8039_v0 }
0x18d4   :  { %3594 = vadd.xlane.f32.xlu1 %v3591_v33 }
0x18d6   :  { %8042 = vmatpush1.bf16.msra.mxu1 %v8041_v6 }
0x18d7   :  { %8044 = vmatprep.subr.bf16.mxu1 %v8043_v10 }
0x18da   :  { %8046 = vmatpush1.bf16.msra.mxu1 %v8045_v36 }
0x18db   :  { %7656 = vmatprep.subr.mxu1 %v8567_v13 }
0x195d   :  { %v3593_v52 = vpop.xlane.xlu0 %3592 }
0x195e   :  { %v3596_v18 = vmul.f32 0.0078125, %v3593_v52 }
0x1960   :  { %v3598_v22 = vadd.f32 1e-05, %v3596_v18 }
0x1961   :  { %v3595_v25 = vpop.xlane.xlu1 %3594 }
0x1962   :  { %8267 = vrsqrt.f32 %v3598_v22  ;;  %v3597_v3 = vmul.f32 0.0078125, %v3595_v25 }
0x1964   :  { %v3599_v28 = vadd.f32 1e-05, %v3597_v3 }
0x1966   :  { %8269 = vrsqrt.f32 %v3599_v28 }
0x196c   :  { %v8268_v56 = vpop.eup %8267 }
0x196d   :  { %v3602_v33 = vmul.f32 %v8268_v56, %v9206_v51  ;;  %v7044_v51 = vld [vmem:[%s9615_s5 + $0x3] sm:$0x7] }
0x196e   :  { %v3675_v42 = vrot.slane %v7044_v51, %v8832_v24  ;;  %v3683_v19 = vrot.slane %v7044_v51, %v327_v27 }
0x196f   :  { %v3610_v40 = vmul.f32 %v7042_v30, %v3602_v33 }
0x1970   :  { %v8270_v37 = vpop.eup %8269 }
0x1971   :  { %v9220_v38 = vadd.f32 %v7043_v34, %v3610_v40  ;;  %v3603_v39 = vmul.f32 %v8270_v37, %v9210_v31  ;;  %v3679_v31 = vrot.slane %v7044_v51, %v8838_v26 }
0x1973   :  { %3752 = vmatmul.mubr.f32.vlgmr.msra.gmra.mrb[34].mxu1 %v9220_v38  ;;  %7653 = vmatprep.mubr.f32.mxu0 %v9220_v38  ;;  %v3611_v43 = vmul.f32 %v7042_v30, %v3603_v39 }
0x1974   :  { %3757 = vmatprep.mubr.f32.mxu1 %v8567_v13 }
0x1975   :  { %v9226_v44 = vadd.f32 %v7043_v34, %v3611_v43 }
0x1977   :  { %3758 = vmatmul.mubr.f32.gmra.mrb[36].mxu1 %v9226_v44  ;;  %7654 = vmatmul.mubr.f32.vlgmr.msra.gmra.mrb[48].mxu0 %v9226_v44 }
0x1978   :  { %7658 = vmatprep.mubr.msk.f32.mxu1 %vm8568_vm1, %v8567_v13  ;;  %7693 = vmatprep.mubr.msk.f32.mxu0 %vm8568_vm1, %v8567_v13 }
0x1a46   :  { %v3753_v45 = vpop.f32.mrb[34].mxu1 }
0x1a47   :  { %v3755_v46 = vpop.f32.mrb[35].mxu1  ;;  %v9245_v48 = vadd.f32 %v3753_v45, %v3675_v42 }
0x1a48   :  { %v9241_v1 = vadd.f32 %v3755_v46, %v3679_v31 }
0x1a4a   :  { %v3759_v21 = vpop.f32.mrb[36].mxu1  ;;  %v7655_v20 = vpop.f32.mrb[48].mxu0  ;;  %7657 = vmatpush3.xpose.msk.msra.mxu1 %vm182_vm0, %v9241_v1 }
0x1a4b   :  { %v9247_v47 = vadd.f32 %v7655_v20, %v3683_v19  ;;  %v3761_v29 = vpop.f32.mrb[37].mxu1  ;;  %v3830_v49 = vpop.f32.mrb[49].mxu0  ;;  %7661 = vmatprep.subr.mxu1 %v8567_v13  ;;  %v9258_v23 = vadd.f32 %v3759_v21, %v3675_v42 }
0x1a4c   :  { %v9250_v53 = vadd.f32 %v3761_v29, %v3679_v31  ;;  %v9261_v27 = vadd.f32 %v3830_v49, %v3683_v19 }
0x1a4d   :  { %7659 = vmatmul.mubr.msk.f32.vlgmr.msra.gmra.mrb[38].mxu1 %vm182_vm0, %v9245_v48 }
0x1a4e   :  { %7662 = vmatpush3.xpose.msk.msra.mxu1 %vm182_vm0, %v9250_v53  ;;  %7663 = vmatprep.mubr.msk.f32.mxu1 %vm8568_vm1, %v8567_v13 }
0x1a4f   :  { %7666 = vmatprep.subr.mxu1 %v8567_v13 }
0x1a51   :  { %7664 = vmatmul.mubr.msk.f32.vlgmr.msra.gmra.mrb[40].mxu1 %vm182_vm0, %v9258_v23 }
0x1a52   :  { %7667 = vmatpush3.msra.mxu1 %v9261_v27  ;;  %7668 = vmatprep.mubr.msk.f32.mxu1 %vm8568_vm1, %v8567_v13 }
0x1a53   :  { %7671 = vmatprep.subr.mxu1 %v8567_v13 }
0x1b20   :  { %v3911_v54 = vpop.f32.mrb[38].mxu1 }
0x1b21   :  { %v7660_v55 = vpop.f32.mrb[39].mxu1  ;;  %v3991_v35 = vsel %vm636_vm2, %v3911_v54, -inf }
0x1b22   :  { %3992 = vmax.xlane.f32.xlu0 %v3991_v35 }
0x1b24   :  { %v3987_v41 = vpop.f32.mrb[40].mxu1 }
0x1b25   :  { %v7665_v57 = vpop.f32.mrb[41].mxu1  ;;  %v3994_v58 = vsel %vm636_vm2, %v3987_v41, -inf }
0x1b26   :  { %3995 = vmax.xlane.f32.xlu1 %v3994_v58 }
0x1b37   :  { %4161 = vrot.lane.b32.xlu1 %v9245_v48, %s8569_s8 }
0x1b3b   :  { %4241 = vrot.lane.b32.xlu1 %v9250_v53, %s8569_s8 }
0x1baf   :  { %v3993_v59 = vpop.xlane.xlu0 %3992 }
0x1bb0   :  { %v3997_v60 = vsub.f32 %v3911_v54, %v3993_v59 }
0x1bb2   :  { %v3999_v61 = vmul.f32 1.442695, %v3997_v60 }
0x1bb3   :  { %v3996_v62 = vpop.xlane.xlu1 %3995 }
0x1bb4   :  { %8271 = vpow2.f32 %v3999_v61  ;;  %v3998_v63 = vsub.f32 %v3987_v41, %v3996_v62 }
0x1bb6   :  { %v4001_v0 = vmul.f32 1.442695, %v3998_v63 }
0x1bb7   :  { %v4162_v6 = vpop.permute.xlu1 %4161 }
0x1bb8   :  { %8273 = vpow2.f32 %v4001_v0 }
0x1bbb   :  { %v4242_v7 = vpop.permute.xlu1 %4241 }
0x1bbe   :  { %v8272_v2 = vpop.eup %8271 }
0x1bbf   :  { %v4003_v32 = vsel %vm636_vm2, %v8272_v2, 0.0 }
0x1bc0   :  { %4004 = vadd.xlane.f32.xlu0 %v4003_v32 }
0x1bc2   :  { %v8274_v4 = vpop.eup %8273 }
0x1bc3   :  { %v4006_v5 = vsel %vm636_vm2, %v8274_v4, 0.0 }
0x1bc4   :  { %4007 = vadd.xlane.f32.xlu1 %v4006_v5 }
0x1bd5   :  { %4239 = vrot.lane.b32.xlu1 %v9258_v23, %s8569_s8 }
0x1bd6   :  { %4163 = vrot.lane.b32.xlu0 %v9241_v1, %s8569_s8 }
0x1c4d   :  { %v4005_v8 = vpop.xlane.xlu0 %4004 }
0x1c4e   :  { %8275 = vrcp.f32 %v4005_v8 }
0x1c51   :  { %v4008_v9 = vpop.xlane.xlu1 %4007  ;;  %v4164_v15 = vpop.permute.xlu0 %4163 }
0x1c52   :  { %8277 = vrcp.f32 %v4008_v9 }
0x1c55   :  { %v4240_v36 = vpop.permute.xlu1 %4239 }
0x1c58   :  { %v8276_v10 = vpop.eup %8275 }
0x1c59   :  { %v4010_v11 = vmul.f32 %v8276_v10, %v8272_v2 }
0x1c5b   :  { %7669 = vmatmul.mubr.msk.f32.vlgmr.msra.gmra.mrb[42].mxu1 %vm636_vm2, %v4010_v11 }
0x1c5c   :  { %v8278_v12 = vpop.eup %8277  ;;  %7672 = vmatpush3.msra.mxu1 %v9247_v47  ;;  %7673 = vmatprep.mubr.msk.f32.mxu1 %vm8568_vm1, %v8567_v13 }
0x1c5d   :  { %v4012_v14 = vmul.f32 %v8278_v12, %v8274_v4  ;;  %7676 = vmatprep.subr.mxu1 %v8567_v13 }
0x1c5f   :  { %7674 = vmatmul.mubr.msk.f32.vlgmr.msra.gmra.mrb[44].mxu1 %vm636_vm2, %v4012_v14 }
0x1c60   :  { %7678 = vmatprep.mubr.msk.f32.mxu1 %vm8568_vm1, %v8567_v13 }
0x1c63   :  { %7677 = vmatpush3.xpose.msk.msra.mxu1 %vm182_vm0, %v4164_v15 }
0x1c64   :  { %7681 = vmatprep.subr.mxu1 %v8567_v13 }
0x1c66   :  { %7679 = vmatmul.mubr.msk.f32.vlgmr.msra.gmra.mrb[46].mxu1 %vm182_vm0, %v4162_v6 }
0x1c67   :  { %7682 = vmatpush3.xpose.msk.msra.mxu1 %vm182_vm0, %v4242_v7  ;;  %7683 = vmatprep.mubr.msk.f32.mxu1 %vm8568_vm1, %v8567_v13 }
0x1c68   :  { %7686 = vmatprep.subr.mxu1 %v8567_v13 }
0x1c6a   :  { %7684 = vmatmul.mubr.msk.f32.vlgmr.msra.gmra.mrb[48].mxu1 %vm182_vm0, %v4240_v36 }
0x1c6b   :  { %7688 = vmatprep.mubr.msk.f32.mxu1 %vm8568_vm1, %v8567_v13 }
0x1d2e   :  { %v4082_v16 = vpop.f32.mrb[42].mxu1 }
0x1d2f   :  { %4159 = vst.msk [vmem:[#allocation2] sm:$0xff] %vm182_vm0, %v4082_v16  ;;  %v7670_v50 = vpop.f32.mrb[43].mxu1 }
0x1d32   :  { %v4155_v17 = vpop.f32.mrb[44].mxu1 }
0x1d33   :  { %4160 = vst.msk [vmem:[#allocation2 + $0x8] sm:$0xff] %vm182_vm0, %v4155_v17  ;;  %v7675_v52 = vpop.f32.mrb[45].mxu1 }
0x1d39   :  { %v4235_v18 = vpop.f32.mrb[46].mxu1 }
0x1d3a   :  { %v7680_v22 = vpop.f32.mrb[47].mxu1  ;;  %v4317_v25 = vsel %vm636_vm2, %v4235_v18, -inf }
0x1d3b   :  { %4318 = vmax.xlane.f32.xlu0 %v4317_v25 }
0x1d3d   :  { %v4313_v3 = vpop.f32.mrb[48].mxu1 }
0x1d3e   :  { %v7685_v28 = vpop.f32.mrb[49].mxu1  ;;  %v4320_v56 = vsel %vm636_vm2, %v4313_v3, -inf }
0x1d3f   :  { %4321 = vmax.xlane.f32.xlu1 %v4320_v56 }
0x1d50   :  { %4417 = vrot.lane.b32.xlu1 %v9247_v47, %s8569_s8 }
0x1d51   :  { %4340 = vrot.lane.b32.xlu0 %v9261_v27, %s8569_s8 }
0x1d54   :  { %4505 = vrot.lane.b32.xlu1 %v9241_v1, %s8570_s25 }
0x1d58   :  { %4583 = vrot.lane.b32.xlu1 %v9250_v53, %s8570_s25 }
0x1d5c   :  { %4581 = vrot.lane.b32.xlu1 %v9258_v23, %s8570_s25 }
0x1dc8   :  { %v4319_v30 = vpop.xlane.xlu0 %4318 }
0x1dc9   :  { %v4323_v33 = vsub.f32 %v4235_v18, %v4319_v30 }
0x1dcb   :  { %v4325_v34 = vmul.f32 1.442695, %v4323_v33 }
0x1dcc   :  { %v4341_v40 = vpop.permute.xlu0 %4340  ;;  %v4322_v37 = vpop.xlane.xlu1 %4321 }
0x1dcd   :  { %8279 = vpow2.f32 %v4325_v34  ;;  %v4324_v39 = vsub.f32 %v4313_v3, %v4322_v37  ;;  %7687 = vmatpush3.msra.mxu1 %v4341_v40 }
0x1dce   :  { %7696 = vmatprep.subr.mxu1 %v8567_v13 }
0x1dcf   :  { %v4327_v43 = vmul.f32 1.442695, %v4324_v39 }
0x1dd0   :  { %v4418_v51 = vpop.permute.xlu1 %4417 }
0x1dd1   :  { %8281 = vpow2.f32 %v4327_v43  ;;  %7692 = vmatpush3.msra.mxu0 %v4418_v51 }
0x1dd2   :  { %7701 = vmatprep.subr.mxu0 %v8567_v13 }
0x1dd4   :  { %v4506_v20 = vpop.permute.xlu1 %4505 }
0x1dd7   :  { %v8280_v31 = vpop.eup %8279 }
0x1dd8   :  { %v4329_v45 = vsel %vm636_vm2, %v8280_v31, 0.0  ;;  %v4584_v55 = vpop.permute.xlu1 %4583 }
0x1dd9   :  { %4330 = vadd.xlane.f32.xlu0 %v4329_v45 }
0x1ddb   :  { %v8282_v42 = vpop.eup %8281 }
0x1ddc   :  { %v4332_v46 = vsel %vm636_vm2, %v8282_v42, 0.0  ;;  %v4582_v57 = vpop.permute.xlu1 %4581 }
0x1ddd   :  { %4333 = vadd.xlane.f32.xlu0 %v4332_v46 }
0x1df3   :  { %4503 = vrot.lane.b32.xlu0 %v9245_v48, %s8570_s25 }
0x1e66   :  { %v4331_v19 = vpop.xlane.xlu0 %4330 }
0x1e67   :  { %8283 = vrcp.f32 %v4331_v19 }
0x1e6a   :  { %v4334_v21 = vpop.xlane.xlu0 %4333 }
0x1e6b   :  { %8285 = vrcp.f32 %v4334_v21 }
0x1e6e   :  { %v4504_v41 = vpop.permute.xlu0 %4503 }
0x1e71   :  { %v8284_v29 = vpop.eup %8283 }
0x1e72   :  { %v4336_v49 = vmul.f32 %v8284_v29, %v8280_v31 }
0x1e74   :  { %7689 = vmatmul.mubr.msk.f32.vlgmr.msra.gmra.mrb[50].mxu1 %vm636_vm2, %v4336_v49 }
0x1e75   :  { %v8286_v54 = vpop.eup %8285  ;;  %7697 = vmatpush3.xpose.msk.msra.mxu1 %vm182_vm0, %v4506_v20  ;;  %7698 = vmatprep.mubr.msk.f32.mxu1 %vm8568_vm1, %v8567_v13 }
0x1e76   :  { %v4338_v35 = vmul.f32 %v8286_v54, %v8282_v42  ;;  %7706 = vmatprep.subr.mxu1 %v8567_v13 }
0x1e78   :  { %7694 = vmatmul.mubr.msk.f32.vlgmr.msra.gmra.mrb[50].mxu0 %vm636_vm2, %v4338_v35  ;;  %7699 = vmatmul.mubr.msk.f32.vlgmr.msra.gmra.mrb[52].mxu1 %vm182_vm0, %v4504_v41 }
0x1e79   :  { %7702 = vmatpush3.xpose.msk.msra.mxu0 %vm182_vm0, %v4584_v55  ;;  %7703 = vmatprep.mubr.msk.f32.mxu0 %vm8568_vm1, %v8567_v13 }
0x1e7a   :  { %7711 = vmatprep.subr.mxu0 %v8567_v13  ;;  %7708 = vmatprep.mubr.msk.f32.mxu1 %vm8568_vm1, %v8567_v13 }
0x1e7c   :  { %7704 = vmatmul.mubr.msk.f32.vlgmr.msra.gmra.mrb[52].mxu0 %vm182_vm0, %v4582_v57 }
0x1e7d   :  { %7713 = vmatprep.mubr.msk.f32.mxu0 %vm8568_vm1, %v8567_v13 }
0x1f47   :  { %v9335_v58 = vpop.f32.mrb[50].mxu1 }
0x1f48   :  { %v7690_v59 = vpop.f32.mrb[51].mxu1 }
0x1f4b   :  { %v9337_v60 = vpop.f32.mrb[50].mxu0  ;;  %v4577_v61 = vpop.f32.mrb[52].mxu1 }
0x1f4c   :  { %v7695_v62 = vpop.f32.mrb[51].mxu0  ;;  %v7700_v63 = vpop.f32.mrb[53].mxu1  ;;  %v4659_v0 = vsel %vm636_vm2, %v4577_v61, -inf }
0x1f4d   :  { %4660 = vmax.xlane.f32.xlu0 %v4659_v0 }
0x1f4f   :  { %v4655_v2 = vpop.f32.mrb[52].mxu0 }
0x1f50   :  { %v7705_v32 = vpop.f32.mrb[53].mxu0  ;;  %v4662_v4 = vsel %vm636_vm2, %v4655_v2, -inf }
0x1f51   :  { %4663 = vmax.xlane.f32.xlu1 %v4662_v4 }
0x1f62   :  { %4757 = vrot.lane.b32.xlu1 %v9247_v47, %s8570_s25 }
0x1f63   :  { %4681 = vrot.lane.b32.xlu0 %v9261_v27, %s8570_s25 }
0x1f66   :  { %4845 = vrot.lane.b32.xlu1 %v9241_v1, %s8571_s17 }
0x1f6a   :  { %4923 = vrot.lane.b32.xlu1 %v9250_v53, %s8571_s17 }
0x1f6e   :  { %4921 = vrot.lane.b32.xlu1 %v9258_v23, %s8571_s17 }
0x1fda   :  { %v4661_v5 = vpop.xlane.xlu0 %4660 }
0x1fdb   :  { %v4665_v6 = vsub.f32 %v4577_v61, %v4661_v5 }
0x1fdd   :  { %v4667_v7 = vmul.f32 1.442695, %v4665_v6 }
0x1fde   :  { %v4664_v8 = vpop.xlane.xlu1 %4663  ;;  %v4682_v9 = vpop.permute.xlu0 %4681 }
0x1fdf   :  { %8287 = vpow2.f32 %v4667_v7  ;;  %v4666_v10 = vsub.f32 %v4655_v2, %v4664_v8  ;;  %7707 = vmatpush3.msra.mxu1 %v4682_v9 }
0x1fe0   :  { %7716 = vmatprep.subr.mxu1 %v8567_v13 }
0x1fe1   :  { %v4669_v11 = vmul.f32 1.442695, %v4666_v10 }
0x1fe2   :  { %v4758_v12 = vpop.permute.xlu1 %4757 }
0x1fe3   :  { %8289 = vpow2.f32 %v4669_v11  ;;  %7712 = vmatpush3.msra.mxu0 %v4758_v12 }
0x1fe4   :  { %7721 = vmatprep.subr.mxu0 %v8567_v13 }
0x1fe6   :  { %v4846_v52 = vpop.permute.xlu1 %4845 }
0x1fe9   :  { %v8288_v14 = vpop.eup %8287 }
0x1fea   :  { %v4671_v15 = vsel %vm636_vm2, %v8288_v14, 0.0  ;;  %v4924_v3 = vpop.permute.xlu1 %4923 }
0x1feb   :  { %4672 = vadd.xlane.f32.xlu0 %v4671_v15 }
0x1fed   :  { %v8290_v36 = vpop.eup %8289 }
0x1fee   :  { %v4674_v16 = vsel %vm636_vm2, %v8290_v36, 0.0  ;;  %v4922_v30 = vpop.permute.xlu1 %4921 }
0x1fef   :  { %4675 = vadd.xlane.f32.xlu0 %v4674_v16 }
0x2005   :  { %4843 = vrot.lane.b32.xlu0 %v9245_v48, %s8571_s17 }
0x2078   :  { %v4673_v50 = vpop.xlane.xlu0 %4672 }
0x2079   :  { %8291 = vrcp.f32 %v4673_v50 }
0x207c   :  { %v4676_v17 = vpop.xlane.xlu0 %4675 }
0x207d   :  { %8293 = vrcp.f32 %v4676_v17 }
0x2080   :  { %v4844_v56 = vpop.permute.xlu0 %4843 }
0x2083   :  { %v8292_v18 = vpop.eup %8291 }
0x2084   :  { %v4678_v22 = vmul.f32 %v8292_v18, %v8288_v14 }
0x2086   :  { %7709 = vmatmul.mubr.msk.f32.vlgmr.msra.gmra.mrb[54].mxu1 %vm636_vm2, %v4678_v22 }
0x2087   :  { %v8294_v25 = vpop.eup %8293  ;;  %7717 = vmatpush3.xpose.msk.msra.mxu1 %vm182_vm0, %v4846_v52  ;;  %7718 = vmatprep.mubr.msk.f32.mxu1 %vm8568_vm1, %v8567_v13 }
0x2088   :  { %v4680_v28 = vmul.f32 %v8294_v25, %v8290_v36  ;;  %7726 = vmatprep.subr.mxu1 %v8567_v13 }
0x208a   :  { %7714 = vmatmul.mubr.msk.f32.vlgmr.msra.gmra.mrb[54].mxu0 %vm636_vm2, %v4680_v28  ;;  %7719 = vmatmul.mubr.msk.f32.vlgmr.msra.gmra.mrb[56].mxu1 %vm182_vm0, %v4844_v56 }
0x208b   :  { %7722 = vmatpush3.xpose.msk.msra.mxu0 %vm182_vm0, %v4924_v3  ;;  %7723 = vmatprep.mubr.msk.f32.mxu0 %vm8568_vm1, %v8567_v13 }
0x208c   :  { %7731 = vmatprep.subr.mxu0 %v8567_v13  ;;  %7728 = vmatprep.mubr.msk.f32.mxu1 %vm8568_vm1, %v8567_v13 }
0x208e   :  { %7724 = vmatmul.mubr.msk.f32.vlgmr.msra.gmra.mrb[56].mxu0 %vm182_vm0, %v4922_v30 }
0x208f   :  { %7733 = vmatprep.mubr.msk.f32.mxu0 %vm8568_vm1, %v8567_v13 }
0x2159   :  { %v9373_v33 = vpop.f32.mrb[54].mxu1 }
0x215a   :  { %v7710_v34 = vpop.f32.mrb[55].mxu1 }
0x215d   :  { %v9375_v40 = vpop.f32.mrb[54].mxu0  ;;  %v4917_v37 = vpop.f32.mrb[56].mxu1 }
0x215e   :  { %v7715_v39 = vpop.f32.mrb[55].mxu0  ;;  %v7720_v43 = vpop.f32.mrb[57].mxu1  ;;  %v4999_v51 = vsel %vm636_vm2, %v4917_v37, -inf }
0x215f   :  { %5000 = vmax.xlane.f32.xlu0 %v4999_v51 }
0x2161   :  { %v4995_v31 = vpop.f32.mrb[56].mxu0 }
0x2162   :  { %v7725_v45 = vpop.f32.mrb[57].mxu0  ;;  %v5002_v42 = vsel %vm636_vm2, %v4995_v31, -inf }
0x2163   :  { %5003 = vmax.xlane.f32.xlu1 %v5002_v42 }
0x2174   :  { %5097 = vrot.lane.b32.xlu1 %v9247_v47, %s8571_s17 }
0x2175   :  { %5021 = vrot.lane.b32.xlu0 %v9261_v27, %s8571_s17 }
0x2178   :  { %5185 = vrot.lane.b32.xlu1 %v9241_v1, %s8572_s19 }
0x217c   :  { %5263 = vrot.lane.b32.xlu1 %v9250_v53, %s8572_s19 }
0x2180   :  { %5261 = vrot.lane.b32.xlu1 %v9258_v23, %s8572_s19 }
0x21ec   :  { %v5001_v46 = vpop.xlane.xlu0 %5000 }
0x21ed   :  { %v5005_v19 = vsub.f32 %v4917_v37, %v5001_v46 }
0x21ef   :  { %v5007_v21 = vmul.f32 1.442695, %v5005_v19 }
0x21f0   :  { %v5004_v20 = vpop.xlane.xlu1 %5003  ;;  %v5022_v29 = vpop.permute.xlu0 %5021 }
0x21f1   :  { %8295 = vpow2.f32 %v5007_v21  ;;  %v5006_v49 = vsub.f32 %v4995_v31, %v5004_v20  ;;  %7727 = vmatpush3.msra.mxu1 %v5022_v29 }
0x21f2   :  { %7736 = vmatprep.subr.mxu1 %v8567_v13 }
0x21f3   :  { %v5009_v54 = vmul.f32 1.442695, %v5006_v49 }
0x21f4   :  { %v5098_v55 = vpop.permute.xlu1 %5097 }
0x21f5   :  { %8297 = vpow2.f32 %v5009_v54  ;;  %7732 = vmatpush3.msra.mxu0 %v5098_v55 }
0x21f6   :  { %7741 = vmatprep.subr.mxu0 %v8567_v13 }
0x21f8   :  { %v5186_v63 = vpop.permute.xlu1 %5185 }
0x21fb   :  { %v8296_v35 = vpop.eup %8295 }
0x21fc   :  { %v5011_v41 = vsel %vm636_vm2, %v8296_v35, 0.0  ;;  %v5264_v4 = vpop.permute.xlu1 %5263 }
0x21fd   :  { %5012 = vadd.xlane.f32.xlu0 %v5011_v41 }
0x21ff   :  { %v8298_v57 = vpop.eup %8297 }
0x2200   :  { %v5014_v59 = vsel %vm636_vm2, %v8298_v57, 0.0  ;;  %v5262_v7 = vpop.permute.xlu1 %5261 }
0x2201   :  { %5015 = vadd.xlane.f32.xlu0 %v5014_v59 }
0x2217   :  { %5183 = vrot.lane.b32.xlu0 %v9245_v48, %s8572_s19 }
0x228a   :  { %v5013_v61 = vpop.xlane.xlu0 %5012 }
0x228b   :  { %8299 = vrcp.f32 %v5013_v61 }
0x228e   :  { %v5016_v62 = vpop.xlane.xlu0 %5015 }
0x228f   :  { %8301 = vrcp.f32 %v5016_v62 }
0x2292   :  { %v5184_v6 = vpop.permute.xlu0 %5183 }
0x2295   :  { %v8300_v0 = vpop.eup %8299 }
0x2296   :  { %v5018_v2 = vmul.f32 %v8300_v0, %v8296_v35 }
0x2298   :  { %7729 = vmatmul.mubr.msk.f32.vlgmr.msra.gmra.mrb[58].mxu1 %vm636_vm2, %v5018_v2 }
0x2299   :  { %v8302_v32 = vpop.eup %8301  ;;  %7737 = vmatpush3.xpose.msk.msra.mxu1 %vm182_vm0, %v5186_v63  ;;  %7738 = vmatprep.mubr.msk.f32.mxu1 %vm8568_vm1, %v8567_v13 }
0x229a   :  { %v5020_v5 = vmul.f32 %v8302_v32, %v8298_v57  ;;  %7746 = vmatprep.subr.mxu1 %v8567_v13 }
0x229c   :  { %7734 = vmatmul.mubr.msk.f32.vlgmr.msra.gmra.mrb[58].mxu0 %vm636_vm2, %v5020_v5  ;;  %7739 = vmatmul.mubr.msk.f32.vlgmr.msra.gmra.mrb[60].mxu1 %vm182_vm0, %v5184_v6 }
0x229d   :  { %7742 = vmatpush3.xpose.msk.msra.mxu0 %vm182_vm0, %v5264_v4  ;;  %7743 = vmatprep.mubr.msk.f32.mxu0 %vm8568_vm1, %v8567_v13 }
0x229e   :  { %7751 = vmatprep.subr.mxu0 %v8567_v13  ;;  %7748 = vmatprep.mubr.msk.f32.mxu1 %vm8568_vm1, %v8567_v13 }
0x22a0   :  { %7744 = vmatmul.mubr.msk.f32.vlgmr.msra.gmra.mrb[60].mxu0 %vm182_vm0, %v5262_v7 }
0x22a1   :  { %7753 = vmatprep.mubr.msk.f32.mxu0 %vm8568_vm1, %v8567_v13 }
0x236b   :  { %v9411_v8 = vpop.f32.mrb[58].mxu1 }
0x236c   :  { %v7730_v9 = vpop.f32.mrb[59].mxu1 }
0x236f   :  { %v9413_v10 = vpop.f32.mrb[58].mxu0  ;;  %v5257_v11 = vpop.f32.mrb[60].mxu1 }
0x2370   :  { %v7735_v12 = vpop.f32.mrb[59].mxu0  ;;  %v7740_v14 = vpop.f32.mrb[61].mxu1  ;;  %v5339_v15 = vsel %vm636_vm2, %v5257_v11, -inf }
0x2371   :  { %5340 = vmax.xlane.f32.xlu0 %v5339_v15 }
0x2373   :  { %v5335_v36 = vpop.f32.mrb[60].mxu0 }
0x2374   :  { %v7745_v16 = vpop.f32.mrb[61].mxu0  ;;  %v5342_v50 = vsel %vm636_vm2, %v5335_v36, -inf }
0x2375   :  { %5343 = vmax.xlane.f32.xlu1 %v5342_v50 }
0x2386   :  { %5437 = vrot.lane.b32.xlu1 %v9247_v47, %s8572_s19 }
0x2387   :  { %5361 = vrot.lane.b32.xlu0 %v9261_v27, %s8572_s19 }
0x238a   :  { %5525 = vrot.lane.b32.xlu1 %v9241_v1, %s8573_s6 }
0x238e   :  { %5603 = vrot.lane.b32.xlu1 %v9250_v53, %s8573_s6 }
0x2392   :  { %5601 = vrot.lane.b32.xlu1 %v9258_v23, %s8573_s6 }
0x23fe   :  { %v5341_v17 = vpop.xlane.xlu0 %5340 }
0x23ff   :  { %v5345_v52 = vsub.f32 %v5257_v11, %v5341_v17 }
0x2401   :  { %v5347_v18 = vmul.f32 1.442695, %v5345_v52 }
0x2402   :  { %v5344_v22 = vpop.xlane.xlu1 %5343  ;;  %v5362_v25 = vpop.permute.xlu0 %5361 }
0x2403   :  { %8303 = vpow2.f32 %v5347_v18  ;;  %v5346_v3 = vsub.f32 %v5335_v36, %v5344_v22  ;;  %7747 = vmatpush3.msra.mxu1 %v5362_v25 }
0x2404   :  { %7756 = vmatprep.subr.mxu1 %v8567_v13 }
0x2405   :  { %v5349_v28 = vmul.f32 1.442695, %v5346_v3 }
0x2406   :  { %v5438_v56 = vpop.permute.xlu1 %5437 }
0x2407   :  { %8305 = vpow2.f32 %v5349_v28  ;;  %7752 = vmatpush3.msra.mxu0 %v5438_v56 }
0x2408   :  { %7761 = vmatprep.subr.mxu0 %v8567_v13 }
0x240a   :  { %v5526_v31 = vpop.permute.xlu1 %5525 }
0x240d   :  { %v8304_v30 = vpop.eup %8303 }
0x240e   :  { %v5351_v34 = vsel %vm636_vm2, %v8304_v30, 0.0  ;;  %v5604_v19 = vpop.permute.xlu1 %5603 }
0x240f   :  { %5352 = vadd.xlane.f32.xlu0 %v5351_v34 }
0x2411   :  { %v8306_v37 = vpop.eup %8305 }
0x2412   :  { %v5354_v39 = vsel %vm636_vm2, %v8306_v37, 0.0  ;;  %v5602_v29 = vpop.permute.xlu1 %5601 }
0x2413   :  { %5355 = vadd.xlane.f32.xlu0 %v5354_v39 }
0x2429   :  { %5523 = vrot.lane.b32.xlu0 %v9245_v48, %s8573_s6 }
0x249c   :  { %v5353_v43 = vpop.xlane.xlu0 %5352 }
0x249d   :  { %8307 = vrcp.f32 %v5353_v43 }
0x24a0   :  { %v5356_v51 = vpop.xlane.xlu0 %5355 }
0x24a1   :  { %8309 = vrcp.f32 %v5356_v51 }
0x24a4   :  { %v5524_v20 = vpop.permute.xlu0 %5523 }
0x24a7   :  { %v8308_v45 = vpop.eup %8307 }
0x24a8   :  { %v5358_v42 = vmul.f32 %v8308_v45, %v8304_v30 }
0x24aa   :  { %7749 = vmatmul.mubr.msk.f32.vlgmr.msra.gmra.mrb[62].mxu1 %vm636_vm2, %v5358_v42 }
0x24ab   :  { %v8310_v46 = vpop.eup %8309  ;;  %7757 = vmatpush3.xpose.msk.msra.mxu1 %vm182_vm0, %v5526_v31  ;;  %7758 = vmatprep.mubr.msk.f32.mxu1 %vm8568_vm1, %v8567_v13 }
0x24ac   :  { %v5360_v21 = vmul.f32 %v8310_v46, %v8306_v37  ;;  %7766 = vmatprep.subr.mxu1 %v8567_v13 }
0x24ae   :  { %7754 = vmatmul.mubr.msk.f32.vlgmr.msra.gmra.mrb[62].mxu0 %vm636_vm2, %v5360_v21  ;;  %7759 = vmatmul.mubr.msk.f32.vlgmr.msra.gmra.mrb[64].mxu1 %vm182_vm0, %v5524_v20 }
0x24af   :  { %7762 = vmatpush3.xpose.msk.msra.mxu0 %vm182_vm0, %v5604_v19  ;;  %7763 = vmatprep.mubr.msk.f32.mxu0 %vm8568_vm1, %v8567_v13 }
0x24b0   :  { %7771 = vmatprep.subr.mxu0 %v8567_v13  ;;  %7768 = vmatprep.mubr.msk.f32.mxu1 %vm8568_vm1, %v8567_v13 }
0x24b2   :  { %7764 = vmatmul.mubr.msk.f32.vlgmr.msra.gmra.mrb[64].mxu0 %vm182_vm0, %v5602_v29 }
0x24b3   :  { %7773 = vmatprep.mubr.msk.f32.mxu0 %vm8568_vm1, %v8567_v13 }
0x257d   :  { %v9449_v49 = vpop.f32.mrb[62].mxu1 }
0x257e   :  { %v7750_v54 = vpop.f32.mrb[63].mxu1 }
0x2581   :  { %v9451_v55 = vpop.f32.mrb[62].mxu0  ;;  %v5597_v35 = vpop.f32.mrb[64].mxu1 }
0x2582   :  { %v7755_v41 = vpop.f32.mrb[63].mxu0  ;;  %v7760_v57 = vpop.f32.mrb[65].mxu1  ;;  %v5679_v59 = vsel %vm636_vm2, %v5597_v35, -inf }
0x2583   :  { %5680 = vmax.xlane.f32.xlu0 %v5679_v59 }
0x2585   :  { %v5675_v61 = vpop.f32.mrb[64].mxu0 }
0x2586   :  { %v7765_v62 = vpop.f32.mrb[65].mxu0  ;;  %v5682_v63 = vsel %vm636_vm2, %v5675_v61, -inf }
0x2587   :  { %5683 = vmax.xlane.f32.xlu1 %v5682_v63 }
0x2598   :  { %5777 = vrot.lane.b32.xlu1 %v9247_v47, %s8573_s6 }
0x2599   :  { %5701 = vrot.lane.b32.xlu0 %v9261_v27, %s8573_s6 }
0x259c   :  { %5865 = vrot.lane.b32.xlu1 %v9241_v1, %s8574_s29 }
0x25a0   :  { %5943 = vrot.lane.b32.xlu1 %v9250_v53, %s8574_s29 }
0x25a4   :  { %5941 = vrot.lane.b32.xlu1 %v9258_v23, %s8574_s29 }
0x2610   :  { %v5681_v0 = vpop.xlane.xlu0 %5680 }
0x2611   :  { %v5685_v2 = vsub.f32 %v5597_v35, %v5681_v0 }
0x2613   :  { %v5687_v32 = vmul.f32 1.442695, %v5685_v2 }
0x2614   :  { %v5684_v4 = vpop.xlane.xlu1 %5683  ;;  %v5702_v5 = vpop.permute.xlu0 %5701 }
0x2615   :  { %8311 = vpow2.f32 %v5687_v32  ;;  %v5686_v6 = vsub.f32 %v5675_v61, %v5684_v4  ;;  %7767 = vmatpush3.msra.mxu1 %v5702_v5 }
0x2616   :  { %7776 = vmatprep.subr.mxu1 %v8567_v13 }
0x2617   :  { %v5689_v7 = vmul.f32 1.442695, %v5686_v6 }
0x2618   :  { %v5778_v9 = vpop.permute.xlu1 %5777 }
0x2619   :  { %8313 = vpow2.f32 %v5689_v7  ;;  %7772 = vmatpush3.msra.mxu0 %v5778_v9 }
0x261a   :  { %7781 = vmatprep.subr.mxu0 %v8567_v13 }
0x261c   :  { %v5866_v50 = vpop.permute.xlu1 %5865 }
0x261f   :  { %v8312_v11 = vpop.eup %8311 }
0x2620   :  { %v5691_v12 = vsel %vm636_vm2, %v8312_v11, 0.0  ;;  %v5944_v22 = vpop.permute.xlu1 %5943 }
0x2621   :  { %5692 = vadd.xlane.f32.xlu0 %v5691_v12 }
0x2623   :  { %v8314_v14 = vpop.eup %8313 }
0x2624   :  { %v5694_v15 = vsel %vm636_vm2, %v8314_v14, 0.0  ;;  %v5942_v28 = vpop.permute.xlu1 %5941 }
0x2625   :  { %5695 = vadd.xlane.f32.xlu0 %v5694_v15 }
0x263b   :  { %5863 = vrot.lane.b32.xlu0 %v9245_v48, %s8574_s29 }
0x26ae   :  { %v5693_v36 = vpop.xlane.xlu0 %5692 }
0x26af   :  { %8315 = vrcp.f32 %v5693_v36 }
0x26b2   :  { %v5696_v16 = vpop.xlane.xlu0 %5695 }
0x26b3   :  { %8317 = vrcp.f32 %v5696_v16 }
0x26b6   :  { %v5864_v3 = vpop.permute.xlu0 %5863 }
0x26b9   :  { %v8316_v17 = vpop.eup %8315 }
0x26ba   :  { %v5698_v52 = vmul.f32 %v8316_v17, %v8312_v11 }
0x26bc   :  { %7769 = vmatmul.mubr.msk.f32.vlgmr.msra.gmra.mrb[66].mxu1 %vm636_vm2, %v5698_v52 }
0x26bd   :  { %v8318_v18 = vpop.eup %8317  ;;  %7777 = vmatpush3.xpose.msk.msra.mxu1 %vm182_vm0, %v5866_v50  ;;  %7778 = vmatprep.mubr.msk.f32.mxu1 %vm8568_vm1, %v8567_v13 }
0x26be   :  { %v5700_v25 = vmul.f32 %v8318_v18, %v8314_v14  ;;  %7786 = vmatprep.subr.mxu1 %v8567_v13 }
0x26c0   :  { %7774 = vmatmul.mubr.msk.f32.vlgmr.msra.gmra.mrb[66].mxu0 %vm636_vm2, %v5700_v25  ;;  %7779 = vmatmul.mubr.msk.f32.vlgmr.msra.gmra.mrb[68].mxu1 %vm182_vm0, %v5864_v3 }
0x26c1   :  { %7782 = vmatpush3.xpose.msk.msra.mxu0 %vm182_vm0, %v5944_v22  ;;  %7783 = vmatprep.mubr.msk.f32.mxu0 %vm8568_vm1, %v8567_v13 }
0x26c2   :  { %7791 = vmatprep.subr.mxu0 %v8567_v13  ;;  %7788 = vmatprep.mubr.msk.f32.mxu1 %vm8568_vm1, %v8567_v13 }
0x26c4   :  { %7784 = vmatmul.mubr.msk.f32.vlgmr.msra.gmra.mrb[68].mxu0 %vm182_vm0, %v5942_v28 }
0x26c5   :  { %7793 = vmatprep.mubr.msk.f32.mxu0 %vm8568_vm1, %v8567_v13 }
0x278f   :  { %v9487_v56 = vpop.f32.mrb[66].mxu1 }
0x2790   :  { %v7770_v30 = vpop.f32.mrb[67].mxu1 }
0x2793   :  { %v9489_v34 = vpop.f32.mrb[66].mxu0  ;;  %v5937_v37 = vpop.f32.mrb[68].mxu1 }
0x2794   :  { %v7775_v39 = vpop.f32.mrb[67].mxu0  ;;  %v7780_v43 = vpop.f32.mrb[69].mxu1  ;;  %v6019_v51 = vsel %vm636_vm2, %v5937_v37, -inf }
0x2795   :  { %6020 = vmax.xlane.f32.xlu0 %v6019_v51 }
0x2797   :  { %v6015_v31 = vpop.f32.mrb[68].mxu0 }
0x2798   :  { %v7785_v45 = vpop.f32.mrb[69].mxu0  ;;  %v6022_v42 = vsel %vm636_vm2, %v6015_v31, -inf }
0x2799   :  { %6023 = vmax.xlane.f32.xlu1 %v6022_v42 }
0x27aa   :  { %6117 = vrot.lane.b32.xlu1 %v9247_v47, %s8574_s29 }
0x27ab   :  { %6041 = vrot.lane.b32.xlu0 %v9261_v27, %s8574_s29 }
0x27ae   :  { %6205 = vrot.lane.b32.xlu1 %v9241_v1, %s8557_s24 }
0x27b2   :  { %6283 = vrot.lane.b32.xlu1 %v9250_v53, %s8557_s24 }
0x27b6   :  { %6281 = vrot.lane.b32.xlu1 %v9258_v23, %s8557_s24 }
0x2822   :  { %v6021_v46 = vpop.xlane.xlu0 %6020 }
0x2823   :  { %v6025_v19 = vsub.f32 %v5937_v37, %v6021_v46 }
0x2825   :  { %v6027_v21 = vmul.f32 1.442695, %v6025_v19 }
0x2826   :  { %v6024_v20 = vpop.xlane.xlu1 %6023  ;;  %v6042_v29 = vpop.permute.xlu0 %6041 }
0x2827   :  { %8319 = vpow2.f32 %v6027_v21  ;;  %v6026_v54 = vsub.f32 %v6015_v31, %v6024_v20  ;;  %7787 = vmatpush3.msra.mxu1 %v6042_v29  ;;  %v6546_v20 = vld [vmem:[#allocation10 + $0x80] sm:$0xff]  ;;  %v6547_v29 = vld [vmem:[#allocation10 + $0x88] sm:$0xff] }
0x2828   :  { %7796 = vmatprep.subr.mxu1 %v8567_v13 }
0x2829   :  { %v6029_v35 = vmul.f32 1.442695, %v6026_v54  ;;  %v6548_v54 = vld [vmem:[#allocation10 + $0x90] sm:$0xff] }
0x282a   :  { %v6118_v41 = vpop.permute.xlu1 %6117 }
0x282b   :  { %8321 = vpow2.f32 %v6029_v35  ;;  %7792 = vmatpush3.msra.mxu0 %v6118_v41  ;;  %v8079_v35 = vpack.c.bf16 %v6547_v29, %v6546_v20  ;;  %v6549_v41 = vld [vmem:[#allocation10 + $0x98] sm:$0xff] }
0x282c   :  { %7801 = vmatprep.subr.mxu0 %v8567_v13 }
0x282e   :  { %v6206_v62 = vpop.permute.xlu1 %6205 }
0x2831   :  { %v8320_v1 = vpop.eup %8319 }
0x2832   :  { %v6031_v53 = vsel %vm636_vm2, %v8320_v1, 0.0  ;;  %v6284_v32 = vpop.permute.xlu1 %6283 }
0x2833   :  { %6032 = vadd.xlane.f32.xlu0 %v6031_v53  ;;  %v6550_v53 = vld [vmem:[#allocation10 + $0xa0] sm:$0xff] }
0x2835   :  { %v8322_v23 = vpop.eup %8321 }
0x2836   :  { %v6034_v57 = vsel %vm636_vm2, %v8322_v23, 0.0  ;;  %v6282_v5 = vpop.permute.xlu1 %6281 }
0x2837   :  { %6035 = vadd.xlane.f32.xlu0 %v6034_v57 }
0x284d   :  { %6203 = vrot.lane.b32.xlu0 %v9245_v48, %s8557_s24 }
0x28c0   :  { %v6033_v59 = vpop.xlane.xlu0 %6032 }
0x28c1   :  { %8323 = vrcp.f32 %v6033_v59  ;;  %v6552_v59 = vld [vmem:[#allocation10 + $0xb0] sm:$0xff] }
0x28c4   :  { %v6036_v61 = vpop.xlane.xlu0 %6035 }
0x28c5   :  { %8325 = vrcp.f32 %v6036_v61  ;;  %v6553_v61 = vld [vmem:[#allocation10 + $0xb8] sm:$0xff] }
0x28c8   :  { %v6204_v48 = vpop.permute.xlu0 %6203 }
0x28cb   :  { %v8324_v63 = vpop.eup %8323 }
0x28cc   :  { %v6038_v0 = vmul.f32 %v8324_v63, %v8320_v1  ;;  %v8083_v1 = vpack.c.bf16 %v6549_v41, %v6548_v54  ;;  %v6554_v63 = vld [vmem:[#allocation10 + $0xc0] sm:$0xff]  ;;  %v6703_v41 = vld [vmem:[#allocation11 + $0x168] sm:$0xff] }
0x28ce   :  { %7789 = vmatmul.mubr.msk.f32.vlgmr.msra.gmra.mrb[70].mxu1 %vm636_vm2, %v6038_v0  ;;  %v6555_v0 = vld [vmem:[#allocation10 + $0xc8] sm:$0xff] }
0x28cf   :  { %v8326_v2 = vpop.eup %8325  ;;  %7797 = vmatpush3.xpose.msk.msra.mxu1 %vm182_vm0, %v6206_v62  ;;  %7798 = vmatprep.mubr.msk.f32.mxu1 %vm8568_vm1, %v8567_v13  ;;  %v8091_v62 = vpack.c.bf16 %v6553_v61, %v6552_v59  ;;  %v6707_v61 = vld [vmem:[#allocation11 + $0x188] sm:$0xff] }
0x28d0   :  { %v6040_v4 = vmul.f32 %v8326_v2, %v8322_v23  ;;  %7806 = vmatprep.subr.mxu1 %v8567_v13  ;;  %v6551_v23 = vld [vmem:[#allocation10 + $0xa8] sm:$0xff]  ;;  %v8095_v2 = vpack.c.bf16 %v6555_v0, %v6554_v63  ;;  %v6706_v0 = vld [vmem:[#allocation11 + $0x180] sm:$0xff] }
0x28d1   :  { %v8087_v57 = vpack.c.bf16 %v6551_v23, %v6550_v53  ;;  %v6702_v23 = vld [vmem:[#allocation11 + $0x160] sm:$0xff] }
0x28d2   :  { %7794 = vmatmul.mubr.msk.f32.vlgmr.msra.gmra.mrb[70].mxu0 %vm636_vm2, %v6040_v4  ;;  %7799 = vmatmul.mubr.msk.f32.vlgmr.msra.gmra.mrb[72].mxu1 %vm182_vm0, %v6204_v48  ;;  %v6557_v4 = vld [vmem:[#allocation10 + $0xd8] sm:$0xff] }
0x28d3   :  { %7802 = vmatpush3.xpose.msk.msra.mxu0 %vm182_vm0, %v6284_v32  ;;  %7803 = vmatprep.mubr.msk.f32.mxu0 %vm8568_vm1, %v8567_v13  ;;  %v6556_v32 = vld [vmem:[#allocation10 + $0xd0] sm:$0xff] }
0x28d4   :  { %7811 = vmatprep.subr.mxu0 %v8567_v13  ;;  %7808 = vmatprep.mubr.msk.f32.mxu1 %vm8568_vm1, %v8567_v13  ;;  %v8099_v48 = vpack.c.bf16 %v6557_v4, %v6556_v32  ;;  %v6711_v4 = vld [vmem:[#allocation11 + $0x1a8] sm:$0xff] }
0x28d6   :  { %7804 = vmatmul.mubr.msk.f32.vlgmr.msra.gmra.mrb[72].mxu0 %vm182_vm0, %v6282_v5  ;;  %v6558_v5 = vld [vmem:[#allocation10 + $0xe0] sm:$0xff] }
0x28d7   :  { %7813 = vmatprep.mubr.msk.f32.mxu0 %vm8568_vm1, %v8567_v13 }
0x29a1   :  { %v6113_v6 = vpop.f32.mrb[70].mxu1 }
0x29a2   :  { %v7790_v7 = vpop.f32.mrb[71].mxu1 }
0x29a5   :  { %v6189_v9 = vpop.f32.mrb[70].mxu0  ;;  %v6277_v11 = vpop.f32.mrb[72].mxu1 }
0x29a6   :  { %v7795_v12 = vpop.f32.mrb[71].mxu0  ;;  %v7800_v14 = vpop.f32.mrb[73].mxu1  ;;  %v6359_v15 = vsel %vm636_vm2, %v6277_v11, -inf }
0x29a7   :  { %6360 = vmax.xlane.f32.xlu0 %v6359_v15 }
0x29a9   :  { %v6355_v36 = vpop.f32.mrb[72].mxu0 }
0x29aa   :  { %v7805_v16 = vpop.f32.mrb[73].mxu0  ;;  %v6362_v50 = vsel %vm636_vm2, %v6355_v36, -inf }
0x29ab   :  { %6363 = vmax.xlane.f32.xlu1 %v6362_v50 }
0x29bc   :  { %6457 = vrot.lane.b32.xlu1 %v9247_v47, %s8557_s24 }
0x29c0   :  { %4495 = vrot.lane.b32.xlu1 %v9335_v58, %s8557_s24 }
0x29c4   :  { %4497 = vrot.lane.b32.xlu1 %v9337_v60, %s8557_s24 }
0x29c8   :  { %4837 = vrot.lane.b32.xlu1 %v9375_v40, %s8574_s29 }
0x29cc   :  { %5177 = vrot.lane.b32.xlu1 %v9413_v10, %s8573_s6 }
0x29d0   :  { %5517 = vrot.lane.b32.xlu1 %v9451_v55, %s8572_s19 }
0x29d4   :  { %5857 = vrot.lane.b32.xlu1 %v9489_v34, %s8571_s17 }
0x29d8   :  { %6197 = vrot.lane.b32.xlu1 %v6189_v9, %s8570_s25  ;;  %v6560_v9 = vld [vmem:[#allocation10 + $0xf0] sm:$0xff] }
0x2a34   :  { %v6361_v47 = vpop.xlane.xlu0 %6360 }
0x2a35   :  { %v6365_v17 = vsub.f32 %v6277_v11, %v6361_v47  ;;  %v6561_v11 = vld [vmem:[#allocation10 + $0xf8] sm:$0xff] }
0x2a36   :  { %v8107_v12 = vpack.c.bf16 %v6561_v11, %v6560_v9  ;;  %v6715_v9 = vld [vmem:[#allocation11 + $0x1c8] sm:$0xff] }
0x2a37   :  { %v6367_v58 = vmul.f32 1.442695, %v6365_v17 }
0x2a38   :  { %v6364_v52 = vpop.xlane.xlu1 %6363 }
0x2a39   :  { %8327 = vpow2.f32 %v6367_v58  ;;  %v6366_v60 = vsub.f32 %v6355_v36, %v6364_v52  ;;  %v7094_v52 = vld [vmem:[%s9617_s7 + $0x1] ss:$0 sm:$0xff] }
0x2a3b   :  { %v6369_v18 = vmul.f32 1.442695, %v6366_v60 }
0x2a3c   :  { %v6458_v22 = vpop.permute.xlu1 %6457 }
0x2a3d   :  { %8329 = vpow2.f32 %v6369_v18  ;;  %7812 = vmatpush3.msra.mxu0 %v6458_v22 }
0x2a40   :  { %v4496_v40 = vpop.permute.xlu1 %4495 }
0x2a41   :  { %4501 = vst.msk [vmem:[#allocation2] sm:$0xff] %vm1147_vm3, %v4496_v40 }
0x2a43   :  { %v8328_v10 = vpop.eup %8327 }
0x2a44   :  { %v4498_v55 = vpop.permute.xlu1 %4497  ;;  %v6371_v25 = vsel %vm636_vm2, %v8328_v10, 0.0 }
0x2a45   :  { %4502 = vst.msk [vmem:[#allocation2 + $0x8] sm:$0xff] %vm1147_vm3, %v4498_v55  ;;  %6372 = vadd.xlane.f32.xlu0 %v6371_v25  ;;  %v6691_v25 = vld [vmem:[#allocation11 + $0x108] sm:$0xff] }
0x2a47   :  { %v8330_v3 = vpop.eup %8329 }
0x2a48   :  { %v4838_v28 = vpop.permute.xlu1 %4837  ;;  %v6374_v30 = vsel %vm636_vm2, %v8330_v3, 0.0 }
0x2a49   :  { %4842 = vst.msk [vmem:[#allocation2 + $0x8] sm:$0xff] %vm1488_vm4, %v4838_v28  ;;  %6375 = vadd.xlane.f32.xlu0 %v6374_v30  ;;  %v6690_v28 = vld [vmem:[#allocation11 + $0x100] sm:$0xff] }
0x2a4c   :  { %v5178_v34 = vpop.permute.xlu1 %5177 }
0x2a4d   :  { %5182 = vst.msk [vmem:[#allocation2 + $0x8] sm:$0xff] %vm1829_vm5, %v5178_v34  ;;  %v6692_v34 = vld [vmem:[#allocation11 + $0x110] sm:$0xff] }
0x2a50   :  { %v5518_v37 = vpop.permute.xlu1 %5517 }
0x2a51   :  { %5522 = vst.msk [vmem:[#allocation2 + $0x8] sm:$0xff] %vm2170_vm6, %v5518_v37  ;;  %v6695_v37 = vld [vmem:[#allocation11 + $0x128] sm:$0xff] }
0x2a54   :  { %v5858_v39 = vpop.permute.xlu1 %5857 }
0x2a55   :  { %5862 = vst.msk [vmem:[#allocation2 + $0x8] sm:$0xff] %vm2511_vm7, %v5858_v39  ;;  %v6697_v39 = vld [vmem:[#allocation11 + $0x138] sm:$0xff] }
0x2a58   :  { %v6198_v43 = vpop.permute.xlu1 %6197 }
0x2a59   :  { %6202 = vst.msk [vmem:[#allocation2 + $0x8] sm:$0xff] %vm2852_vm8, %v6198_v43  ;;  %v8113_v43 = vpack.c.bf16 %v6692_v34, %v6690_v28  ;;  %v6819_v34 = vld [vmem:[#allocation13 + $0x110] sm:$0xff] }
0x2a5f   :  { %6381 = vrot.lane.b32.xlu0 %v9261_v27, %s8557_s24 }
0x2a63   :  { %4835 = vrot.lane.b32.xlu0 %v9373_v33, %s8574_s29 }
0x2a67   :  { %5175 = vrot.lane.b32.xlu0 %v9411_v8, %s8573_s6 }
0x2a6b   :  { %5515 = vrot.lane.b32.xlu0 %v9449_v49, %s8572_s19 }
0x2a6f   :  { %5855 = vrot.lane.b32.xlu0 %v9487_v56, %s8571_s17 }
0x2a73   :  { %6195 = vrot.lane.b32.xlu0 %v6113_v6, %s8570_s25  ;;  %v6559_v6 = vld [vmem:[#allocation10 + $0xe8] sm:$0xff] }
0x2a74   :  { %v8103_v7 = vpack.c.bf16 %v6559_v6, %v6558_v5  ;;  %v6710_v6 = vld [vmem:[#allocation11 + $0x1a0] sm:$0xff] }
0x2ad2   :  { %v6373_v51 = vpop.xlane.xlu0 %6372 }
0x2ad3   :  { %8331 = vrcp.f32 %v6373_v51  ;;  %v8115_v51 = vpack.c.bf16 %v6697_v39, %v6695_v37  ;;  %v6820_v37 = vld [vmem:[#allocation13 + $0x118] sm:$0xff]  ;;  %v6837_v39 = vld [vmem:[#allocation13 + $0x1a0] sm:$0xff] }
0x2ad6   :  { %v6376_v31 = vpop.xlane.xlu0 %6375 }
0x2ad7   :  { %8333 = vrcp.f32 %v6376_v31  ;;  %v6694_v31 = vld [vmem:[#allocation11 + $0x120] sm:$0xff] }
0x2ada   :  { %v6382_v45 = vpop.permute.xlu0 %6381 }
0x2adb   :  { %7807 = vmatpush3.msra.mxu1 %v6382_v45  ;;  %v6696_v45 = vld [vmem:[#allocation11 + $0x130] sm:$0xff] }
0x2adc   :  { %8080 = vmatprep.subr.bf16.mxu1 %v8079_v35 }
0x2add   :  { %v8332_v27 = vpop.eup %8331 }
0x2ade   :  { %v6378_v42 = vmul.f32 %v8332_v27, %v8328_v10  ;;  %v4836_v33 = vpop.permute.xlu0 %4835  ;;  %v6699_v27 = vld [vmem:[#allocation11 + $0x148] sm:$0xff] }
0x2adf   :  { %4841 = vst.msk [vmem:[#allocation2] sm:$0xff] %vm1488_vm4, %v4836_v33  ;;  %v6698_v33 = vld [vmem:[#allocation11 + $0x140] sm:$0xff] }
0x2ae0   :  { %7809 = vmatmul.mubr.msk.f32.vlgmr.msra.gmra.mrb[74].mxu1 %vm636_vm2, %v6378_v42  ;;  %v6701_v42 = vld [vmem:[#allocation11 + $0x158] sm:$0xff] }
0x2ae1   :  { %v8334_v8 = vpop.eup %8333  ;;  %8082 = vmatpush3.bf16.msra.mxu1 %v8079_v35 }
0x2ae2   :  { %v6380_v49 = vmul.f32 %v8334_v8, %v8330_v3  ;;  %v5176_v46 = vpop.permute.xlu0 %5175  ;;  %8084 = vmatprep.subr.bf16.mxu1 %v8083_v1  ;;  %v6693_v3 = vld [vmem:[#allocation11 + $0x118] sm:$0xff]  ;;  %v6700_v8 = vld [vmem:[#allocation11 + $0x150] sm:$0xff] }
0x2ae3   :  { %5181 = vst.msk [vmem:[#allocation2] sm:$0xff] %vm1829_vm5, %v5176_v46  ;;  %v8111_v30 = vpack.c.bf16 %v6693_v3, %v6691_v25  ;;  %v6835_v25 = vld [vmem:[#allocation13 + $0x190] sm:$0xff]  ;;  %v6836_v3 = vld [vmem:[#allocation13 + $0x198] sm:$0xff] }
0x2ae4   :  { %7814 = vmatmul.mubr.msk.f32.vlgmr.msra.gmra.mrb[74].mxu0 %vm636_vm2, %v6380_v49  ;;  %v8121_v49 = vpack.c.bf16 %v6700_v8, %v6698_v33  ;;  %v6823_v8 = vld [vmem:[#allocation13 + $0x130] sm:$0xff] }
0x2ae5   :  { %6799 = vmatprep.mubr.f32.mxu0 %v8567_v13  ;;  %8086 = vmatpush3.bf16.msra.mxu1 %v8083_v1  ;;  %v6705_v1 = vld [vmem:[#allocation11 + $0x178] sm:$0xff] }
0x2ae6   :  { %v5516_v56 = vpop.permute.xlu0 %5515  ;;  %8088 = vmatprep.subr.bf16.mxu1 %v8087_v57  ;;  %8112 = vmatprep.subr.bf16.mxu0 %v8111_v30  ;;  %v8123_v53 = vpack.c.bf16 %v6705_v1, %v6703_v41  ;;  %v8147_v30 = vpack.c.bf16 %v6836_v3, %v6835_v25  ;;  %v6843_v41 = vld [vmem:[#allocation13 + $0x1d0] sm:$0xff]  ;;  %v6844_v1 = vld [vmem:[#allocation13 + $0x1d8] sm:$0xff] }
0x2ae7   :  { %5521 = vst.msk [vmem:[#allocation2] sm:$0xff] %vm2170_vm6, %v5516_v56  ;;  %8114 = vmatpush1.bf16.msra.mxu0 %v8113_v43  ;;  %v6838_v43 = vld [vmem:[#allocation13 + $0x1a8] sm:$0xff] }
0x2ae8   :  { %8116 = vmatprep.subr.bf16.mxu0 %v8115_v51  ;;  %v8149_v51 = vpack.c.bf16 %v6820_v37, %v6819_v34 }
0x2ae9   :  { %8090 = vmatpush3.bf16.msra.mxu1 %v8087_v57  ;;  %v6704_v57 = vld [vmem:[#allocation11 + $0x170] sm:$0xff] }
0x2aea   :  { %v5856_v19 = vpop.permute.xlu0 %5855  ;;  %8092 = vmatprep.subr.bf16.mxu1 %v8091_v62  ;;  %v8125_v59 = vpack.c.bf16 %v6704_v57, %v6702_v23  ;;  %v8163_v23 = vpack.c.bf16 %v6844_v1, %v6843_v41  ;;  %v6827_v57 = vld [vmem:[#allocation13 + $0x150] sm:$0xff] }
0x2aeb   :  { %5861 = vst.msk [vmem:[#allocation2] sm:$0xff] %vm2511_vm7, %v5856_v19 }
0x2aed   :  { %8094 = vmatpush3.bf16.msra.mxu1 %v8091_v62  ;;  %v6709_v62 = vld [vmem:[#allocation11 + $0x198] sm:$0xff] }
0x2aee   :  { %v6196_v21 = vpop.permute.xlu0 %6195  ;;  %8096 = vmatprep.subr.bf16.mxu1 %v8095_v2  ;;  %v8127_v63 = vpack.c.bf16 %v6709_v62, %v6707_v61  ;;  %v6845_v61 = vld [vmem:[#allocation13 + $0x1e0] sm:$0xff]  ;;  %v6846_v62 = vld [vmem:[#allocation13 + $0x1e8] sm:$0xff] }
0x2aef   :  { %6201 = vst.msk [vmem:[#allocation2] sm:$0xff] %vm2852_vm8, %v6196_v21 }
0x2af1   :  { %8098 = vmatpush3.bf16.msra.mxu1 %v8095_v2  ;;  %v6708_v2 = vld [vmem:[#allocation11 + $0x190] sm:$0xff] }
0x2af2   :  { %8100 = vmatprep.subr.bf16.mxu1 %v8099_v48  ;;  %v8129_v32 = vpack.c.bf16 %v6708_v2, %v6706_v0  ;;  %v8167_v0 = vpack.c.bf16 %v6846_v62, %v6845_v61 }
0x2af5   :  { %8102 = vmatpush3.bf16.msra.mxu1 %v8099_v48  ;;  %v6713_v48 = vld [vmem:[#allocation11 + $0x1b8] sm:$0xff] }
0x2af6   :  { %8104 = vmatprep.subr.bf16.mxu1 %v8103_v7  ;;  %v8131_v5 = vpack.c.bf16 %v6713_v48, %v6711_v4 }
0x2af9   :  { %8106 = vmatpush3.bf16.msra.mxu1 %v8103_v7  ;;  %v6712_v7 = vld [vmem:[#allocation11 + $0x1b0] sm:$0xff] }
0x2afa   :  { %8108 = vmatprep.subr.bf16.mxu1 %v8107_v12  ;;  %v8133_v11 = vpack.c.bf16 %v6712_v7, %v6710_v6 }
0x2afd   :  { %8110 = vmatpush3.bf16.msra.mxu1 %v8107_v12  ;;  %v6717_v12 = vld [vmem:[#allocation11 + $0x1d8] sm:$0xff] }
0x2bb3   :  { %v6453_v14 = vpop.f32.mrb[74].mxu1 }
0x2bb4   :  { %6535 = vrot.lane.b32.xlu0 %v6453_v14, %s8569_s8  ;;  %v7810_v15 = vpop.f32.mrb[75].mxu1  ;;  %v6714_v14 = vld [vmem:[#allocation11 + $0x1c0] sm:$0xff] }
0x2bb5   :  { %v6716_v15 = vld [vmem:[#allocation11 + $0x1d0] sm:$0xff] }
0x2bb7   :  { %v6529_v36 = vpop.f32.mrb[74].mxu0 }
0x2bb8   :  { %6537 = vrot.lane.b32.xlu1 %v6529_v36, %s8569_s8  ;;  %v7815_v16 = vpop.f32.mrb[75].mxu0  ;;  %v8135_v36 = vpack.c.bf16 %v6717_v12, %v6715_v9  ;;  %v7096_v9 = vld [vmem:[%s9622_s12 + $0x1] ss:$0 sm:$0xff]  ;;  %v7097_v12 = vld [vmem:[#allocation14 + $0x1] ss:$0 sm:$0xff] }
0x2bb9   :  { %v6719_v16 = vld [vmem:[#allocation11 + $0x1e8] sm:$0xff] }
0x2c26   :  { %v6536_v50 = vpop.permute.xlu0 %6535 }
0x2c27   :  { %6541 = vst.msk [vmem:[#allocation2] sm:$0xff] %vm3193_vm9, %v6536_v50  ;;  %v6721_v50 = vld [vmem:[#allocation11 + $0x1f8] sm:$0xff] }
0x2c2a   :  { %v6538_v47 = vpop.permute.xlu1 %6537 }
0x2c2b   :  { %6542 = vst.msk [vmem:[#allocation2 + $0x8] sm:$0xff] %vm3193_vm9, %v6538_v47  ;;  %v8137_v47 = vpack.c.bf16 %v6716_v15, %v6714_v14 }
0x2c2e   :  { %v6543_v17 = vld [vmem:[#allocation2] sm:$0xff] }
0x2c2f   :  { %7848 = vmatprep.mubr.f32.mxu1 %v6543_v17  ;;  %v8139_v17 = vpack.c.bf16 %v6721_v50, %v6719_v16 }
0x2c32   :  { %v6544_v58 = vld [vmem:[#allocation2 + $0x8] sm:$0xff] }
0x2c33   :  { %7849 = vmatmul.mubr.f32.vlgmr.msra.gmra.mrb[76].mxu1 %v6544_v58  ;;  %v6718_v58 = vld [vmem:[#allocation11 + $0x1e0] sm:$0xff] }
0x2d06   :  { %v7850_v60 = vpop.f32.mrb[76].mxu1 }
0x2d07   :  { %v6642_v18 = vadd.f32 %v7850_v60, %v7094_v52  ;;  %v6636_v22 = vpop.f32.mrb[77].mxu1 }
0x2d08   :  { %v6637_v40 = vadd.f32 %v7094_v52, %v6636_v22  ;;  %v6720_v52 = vld [vmem:[#allocation11 + $0x1f0] sm:$0xff]  ;;  %v6834_v22 = vld [vmem:[#allocation13 + $0x188] sm:$0xff] }
0x2d09   :  { %v6646_v10 = vadd.f32 %v6642_v18, %v9226_v44  ;;  %v8117_v44 = vpack.c.bf16 %v6696_v45, %v6694_v31  ;;  %v8141_v60 = vpack.c.bf16 %v6720_v52, %v6718_v58  ;;  %v6833_v18 = vld [vmem:[#allocation13 + $0x180] sm:$0xff]  ;;  %v8151_v31 = vpack.c.bf16 %v6838_v43, %v6837_v39  ;;  %v6830_v58 = vld [vmem:[#allocation13 + $0x168] sm:$0xff] }
0x2d0a   :  { %v6645_v55 = vadd.f32 %v6637_v40, %v9220_v38  ;;  %v8119_v38 = vpack.c.bf16 %v6701_v42, %v6699_v27  ;;  %v6817_v40 = vld [vmem:[#allocation13 + $0x100] sm:$0xff]  ;;  %v6822_v27 = vld [vmem:[#allocation13 + $0x128] sm:$0xff]  ;;  %v6839_v42 = vld [vmem:[#allocation13 + $0x1b0] sm:$0xff] }
0x2d0b   :  { %6653 = vadd.xlane.f32.xlu1 %v6646_v10  ;;  %8118 = vmatpush1.bf16.msra.mxu0 %v8117_v44  ;;  %v6821_v45 = vld [vmem:[#allocation13 + $0x120] sm:$0xff]  ;;  %v6840_v44 = vld [vmem:[#allocation13 + $0x1b8] sm:$0xff] }
0x2d0c   :  { %6651 = vadd.xlane.f32.xlu0 %v6645_v55  ;;  %8120 = vmatprep.subr.bf16.mxu0 %v8119_v38  ;;  %v8153_v38 = vpack.c.bf16 %v6822_v27, %v6821_v45  ;;  %v8155_v33 = vpack.c.bf16 %v6840_v44, %v6839_v42 }
0x2d0f   :  { %8122 = vmatpush1.bf16.msra.mxu0 %v8121_v49  ;;  %v6824_v49 = vld [vmem:[#allocation13 + $0x138] sm:$0xff] }
0x2d10   :  { %8124 = vmatprep.subr.bf16.mxu0 %v8123_v53 }
0x2d13   :  { %8126 = vmatpush1.bf16.msra.mxu0 %v8125_v59  ;;  %v6828_v59 = vld [vmem:[#allocation13 + $0x158] sm:$0xff] }
0x2d14   :  { %8128 = vmatprep.subr.bf16.mxu0 %v8127_v63  ;;  %v8165_v63 = vpack.c.bf16 %v6828_v59, %v6827_v57 }
0x2d17   :  { %8130 = vmatpush1.bf16.msra.mxu0 %v8129_v32 }
0x2d18   :  { %8132 = vmatprep.subr.bf16.mxu0 %v8131_v5 }
0x2d1b   :  { %8134 = vmatpush1.bf16.msra.mxu0 %v8133_v11 }
0x2d1c   :  { %8136 = vmatprep.subr.bf16.mxu0 %v8135_v36 }
0x2d1f   :  { %8138 = vmatpush1.bf16.msra.mxu0 %v8137_v47 }
0x2d20   :  { %8140 = vmatprep.subr.bf16.mxu0 %v8139_v17  ;;  %v6829_v17 = vld [vmem:[#allocation13 + $0x160] sm:$0xff] }
0x2d21   :  { %v8169_v52 = vpack.c.bf16 %v6830_v58, %v6829_v17 }
0x2d23   :  { %8142 = vmatpush1.bf16.msra.mxu0 %v8141_v60  ;;  %v6847_v60 = vld [vmem:[#allocation13 + $0x1f0] sm:$0xff] }
0x2d98   :  { %v6654_v46 = vpop.xlane.xlu1 %6653 }
0x2d99   :  { %v6652_v56 = vpop.xlane.xlu0 %6651  ;;  %v6656_v19 = vmul.f32 0.0078125, %v6654_v46  ;;  %v6841_v46 = vld [vmem:[#allocation13 + $0x1c0] sm:$0xff] }
0x2d9a   :  { %v6655_v21 = vmul.f32 0.0078125, %v6652_v56  ;;  %v6842_v56 = vld [vmem:[#allocation13 + $0x1c8] sm:$0xff] }
0x2d9b   :  { %v9581_v29 = vsub.f32 %v6646_v10, %v6656_v19  ;;  %v8143_v10 = vpack.c.bf16 %v6834_v22, %v6833_v18  ;;  %v8157_v19 = vpack.c.bf16 %v6824_v49, %v6823_v8  ;;  %v6848_v18 = vld [vmem:[#allocation13 + $0x1f8] sm:$0xff] }
0x2d9c   :  { %v9579_v20 = vsub.f32 %v6645_v55, %v6655_v21  ;;  %v6818_v55 = vld [vmem:[#allocation13 + $0x108] sm:$0xff]  ;;  %v8159_v21 = vpack.c.bf16 %v6842_v56, %v6841_v46  ;;  %v8171_v22 = vpack.c.bf16 %v6848_v18, %v6847_v60 }
0x2d9d   :  { %v6660_v35 = vmul.f32 %v9581_v29, %v9581_v29  ;;  %v8145_v28 = vpack.c.bf16 %v6818_v55, %v6817_v40  ;;  %8144 = vmatprep.subr.bf16.mxu1 %v8143_v10  ;;  %v6832_v40 = vld [vmem:[#allocation13 + $0x178] sm:$0xff] }
0x2d9e   :  { %v6659_v54 = vmul.f32 %v9579_v20, %v9579_v20 }
0x2d9f   :  { %8146 = vmatpush3.bf16.msra.mxu1 %v8145_v28 }
0x2da0   :  { %6661 = vadd.xlane.f32.xlu0 %v6659_v54  ;;  %8148 = vmatprep.subr.bf16.mxu1 %v8147_v30  ;;  %v6825_v54 = vld [vmem:[#allocation13 + $0x140] sm:$0xff] }
0x2da3   :  { %8150 = vmatpush3.bf16.msra.mxu1 %v8149_v51 }
0x2da4   :  { %6663 = vadd.xlane.f32.xlu0 %v6660_v35  ;;  %8152 = vmatprep.subr.bf16.mxu1 %v8151_v31  ;;  %v6826_v35 = vld [vmem:[#allocation13 + $0x148] sm:$0xff] }
0x2da5   :  { %v8161_v53 = vpack.c.bf16 %v6826_v35, %v6825_v54 }
0x2da7   :  { %8154 = vmatpush3.bf16.msra.mxu1 %v8153_v38 }
0x2da8   :  { %8156 = vmatprep.subr.bf16.mxu1 %v8155_v33 }
0x2dab   :  { %8158 = vmatpush3.bf16.msra.mxu1 %v8157_v19 }
0x2dac   :  { %8160 = vmatprep.subr.bf16.mxu1 %v8159_v21 }
0x2daf   :  { %8162 = vmatpush3.bf16.msra.mxu1 %v8161_v53 }
0x2db0   :  { %8164 = vmatprep.subr.bf16.mxu1 %v8163_v23 }
0x2db3   :  { %8166 = vmatpush3.bf16.msra.mxu1 %v8165_v63 }
0x2db4   :  { %8168 = vmatprep.subr.bf16.mxu1 %v8167_v0 }
0x2db7   :  { %8170 = vmatpush3.bf16.msra.mxu1 %v8169_v52 }
0x2db8   :  { %8172 = vmatprep.subr.bf16.mxu1 %v8171_v22 }
0x2e2d   :  { %v6662_v2 = vpop.xlane.xlu0 %6661 }
0x2e2e   :  { %v6665_v32 = vmul.f32 0.0078125, %v6662_v2 }
0x2e30   :  { %v6667_v4 = vadd.f32 1e-05, %v6665_v32 }
0x2e31   :  { %v6664_v48 = vpop.xlane.xlu0 %6663 }
0x2e32   :  { %8335 = vrsqrt.f32 %v6667_v4  ;;  %v6666_v5 = vmul.f32 0.0078125, %v6664_v48  ;;  %v7102_v4 = vld [vmem:[%s9624_s14 + $0x1] ss:$0 sm:$0xff] }
0x2e34   :  { %v6668_v6 = vadd.f32 1e-05, %v6666_v5  ;;  %v7103_v5 = vld [vmem:[#allocation16 + $0x1] ss:$0 sm:$0xff] }
0x2e36   :  { %8337 = vrsqrt.f32 %v6668_v6 }
0x2e3c   :  { %v8336_v7 = vpop.eup %8335 }
0x2e3d   :  { %v6671_v11 = vmul.f32 %v8336_v7, %v9579_v20  ;;  %v6831_v20 = vld [vmem:[#allocation13 + $0x170] sm:$0xff] }
0x2e3e   :  { %v8173_v10 = vpack.c.bf16 %v6832_v40, %v6831_v20 }
0x2e3f   :  { %v6679_v14 = vmul.f32 %v7096_v9, %v6671_v11 }
0x2e40   :  { %v8338_v15 = vpop.eup %8337  ;;  %8174 = vmatpush3.bf16.msra.mxu1 %v8173_v10 }
0x2e41   :  { %v6687_v36 = vadd.f32 %v7097_v12, %v6679_v14  ;;  %v6672_v16 = vmul.f32 %v8338_v15, %v9581_v29  ;;  %v7098_v29 = vld [vmem:[%s9619_s9 + $0x2] sm:$0x3] }
0x2e42   :  { %v6732_v55 = vrot.slane %v7098_v29, %v8838_v26 }
0x2e43   :  { %6800 = vmatmul.mubr.f32.vlgmr.msra.gmra.mrb[76].mxu0 %v6687_v36  ;;  %v6680_v50 = vmul.f32 %v7096_v9, %v6672_v16 }
0x2e44   :  { %6805 = vmatprep.mubr.f32.mxu0 %v8567_v13  ;;  %v6728_v13 = vrot.slane %v7098_v29, %v8832_v24  ;;  %v7100_v24 = vld [vmem:[%s9621_s11 + $0x1] ss:$0 sm:$0xff] }
0x2e45   :  { %v6688_v47 = vadd.f32 %v7097_v12, %v6680_v50 }
0x2e47   :  { %6806 = vmatmul.mubr.f32.gmra.mrb[78].mxu0 %v6688_v47 }
0x2f16   :  { %v6801_v25 = vpop.f32.mrb[76].mxu0 }
0x2f17   :  { %v6802_v3 = vadd.f32 %v6801_v25, %v6728_v13  ;;  %v6803_v28 = vpop.f32.mrb[77].mxu0 }
0x2f18   :  { %v6804_v30 = vadd.f32 %v6803_v28, %v6732_v55 }
0x2f19   :  { %v6812_v39 = vmax.f32 %v6802_v3, 0.0 }
0x2f1a   :  { %v6813_v34 = vmax.f32 %v6804_v30, 0.0  ;;  %v6807_v37 = vpop.f32.mrb[78].mxu0 }
0x2f1b   :  { %v6808_v43 = vadd.f32 %v6807_v37, %v6728_v13  ;;  %v6809_v51 = vpop.f32.mrb[79].mxu0 }
0x2f1c   :  { %v6810_v31 = vadd.f32 %v6809_v51, %v6732_v55  ;;  %6921 = vmatprep.mubr.f32.mxu1 %v6813_v34 }
0x2f1d   :  { %6922 = vmatmul.mubr.f32.vlgmr.msra.gmra.mrb[78].mxu1 %v6812_v39  ;;  %v6814_v27 = vmax.f32 %v6808_v43, 0.0 }
0x2f1e   :  { %v6815_v45 = vmax.f32 %v6810_v31, 0.0 }
0x2f20   :  { %6926 = vmatprep.mubr.f32.mxu1 %v6815_v45 }
0x2f21   :  { %6927 = vmatmul.mubr.f32.gmra.mrb[80].mxu1 %v6814_v27 }
0x2ff0   :  { %v7378_v42 = vpop.f32.mrb[78].mxu1 }
0x2ff1   :  { %v7379_v26 = vpop.f32.mrb[79].mxu1 }
0x2ff2   :  { %v7380_v44 = vadd.f32 %v7379_v26, %v7378_v42 }
0x2ff4   :  { %v6924_v38 = vadd.f32 %v7380_v44, %v7100_v24  ;;  %v7381_v33 = vpop.f32.mrb[80].mxu1 }
0x2ff5   :  { %v7382_v8 = vpop.f32.mrb[81].mxu1 }
0x2ff6   :  { %v7383_v49 = vadd.f32 %v7382_v8, %v7381_v33  ;;  %v6932_v46 = vadd.f32 %v6924_v38, %v6687_v36 }
0x2ff8   :  { %v6929_v56 = vadd.f32 %v7383_v49, %v7100_v24  ;;  %6938 = vadd.xlane.f32.xlu0 %v6932_v46 }
0x2ffa   :  { %v6933_v19 = vadd.f32 %v6929_v56, %v6688_v47 }
0x2ffc   :  { %6940 = vadd.xlane.f32.xlu1 %v6933_v19 }
0x3085   :  { %v6939_v21 = vpop.xlane.xlu0 %6938 }
0x3086   :  { %v6942_v54 = vmul.f32 0.0078125, %v6939_v21 }
0x3088   :  { %v6944_v35 = vsub.f32 %v6932_v46, %v6942_v54 }
0x3089   :  { %v6941_v41 = vpop.xlane.xlu1 %6940 }
0x308a   :  { %v6943_v1 = vmul.f32 0.0078125, %v6941_v41  ;;  %v6946_v53 = vmul.f32 %v6944_v35, %v6944_v35 }
0x308c   :  { %v6945_v23 = vsub.f32 %v6933_v19, %v6943_v1  ;;  %6948 = vadd.xlane.f32.xlu0 %v6946_v53 }
0x308e   :  { %v6947_v57 = vmul.f32 %v6945_v23, %v6945_v23 }
0x3090   :  { %6950 = vadd.xlane.f32.xlu1 %v6947_v57 }
0x3119   :  { %v6949_v59 = vpop.xlane.xlu0 %6948 }
0x311a   :  { %v6952_v61 = vmul.f32 0.0078125, %v6949_v59 }
0x311c   :  { %v6954_v62 = vadd.f32 1e-05, %v6952_v61 }
0x311d   :  { %v6951_v63 = vpop.xlane.xlu1 %6950 }
0x311e   :  { %8339 = vrsqrt.f32 %v6954_v62  ;;  %v6953_v0 = vmul.f32 0.0078125, %v6951_v63 }
0x3120   :  { %v6955_v2 = vadd.f32 1e-05, %v6953_v0 }
0x3122   :  { %8341 = vrsqrt.f32 %v6955_v2 }
0x3128   :  { %v8340_v32 = vpop.eup %8339 }
0x3129   :  { %v6958_v48 = vmul.f32 %v8340_v32, %v6944_v35 }
0x312b   :  { %v6966_v6 = vmul.f32 %v7102_v4, %v6958_v48 }
0x312c   :  { %v8342_v7 = vpop.eup %8341 }
0x312d   :  { %v6974_v9 = vadd.f32 %v7103_v5, %v6966_v6  ;;  %v6959_v11 = vmul.f32 %v8342_v7, %v6945_v23 }
0x312f   :  { %6976 = vst [vmem:[%s9626_s16] sm:$0xff] %v6974_v9  ;;  %v6967_v12 = vmul.f32 %v7102_v4, %v6959_v11 }
0x3131   :  { %v6975_v14 = vadd.f32 %v7103_v5, %v6967_v12 }
0x3133   :  { %6977 = vst [vmem:[%s9626_s16 + $0x8] sm:$0xff] %v6975_v14 }
0x3134   :  { %6982 = vsyncpa [#allocation4], 1 }
0x3135   :  { %6983 = vsyncpa [#allocation6], 1 }
0x3136   :  { %6984 = vsyncpa [#allocation9], 1 }
0x3137   :  { %6985 = vsyncpa [#allocation12], 1 }
0x3138   :  { %6986 = vsyncpa [#allocation15], 1 }

</bundles_post_ra>
